<compile_context>
chip_gen: v7x
topology: tpu7x:2x2x1
jax: 0.10.0
libtpu: 0.0.40
codegen_flags: <defaults>
</compile_context>

<pallas_src>
import functools

import jax
import jax.numpy as jnp
from jax import lax
from jax.experimental import pallas as pl

# ----------------------------- config (synthetic, small) -----------------------------
VOCAB = 50
HIDDEN = 32
NUM_HEADS = 2
HEAD_DIM = HIDDEN // NUM_HEADS
FFN = 64
NUM_LAYERS = 2
B = 2
SEQ = 10          # padded sub-token length, includes [CLS]/[SEP]
SSUB = SEQ - 2    # sub-token length after stripping [CLS]/[SEP]; also padded word capacity
CLS, SEP, PAD = 1, 2, 0
LN_EPS = 1e-12

HP = 128          # lane-padded hidden width
FP = 128          # lane-padded FFN width
QKV_LANES = 128   # 3*HIDDEN = 96 real output lanes, padded to 128


# ----------------------------- shared elementwise math -----------------------------
def _gelu(x):
    # TODO(synk): tanh-approx GELU (HF BERT uses erf GELU); acceptable for the synthetic
    # encoder stand-in for the external `config.bert_like` model.
    c = 0.7978845608028654  # sqrt(2/pi)
    return 0.5 * x * (1.0 + jnp.tanh(c * (x + 0.044715 * x * x * x)))


def _ln_masked(x, g, b, lane_mask, real_dim, out_dtype, eps=LN_EPS):
    """LayerNorm over the first `real_dim` lanes of a zero-padded 128-lane f32 tensor.
    Two-pass variance with an explicit lane mask; padded lanes stay exactly zero."""
    inv_n = 1.0 / float(real_dim)
    mu = jnp.sum(x, axis=-1, keepdims=True) * inv_n        # padded lanes are zero -> exact
    d = (x - mu) * lane_mask
    var = jnp.sum(d * d, axis=-1, keepdims=True) * inv_n
    y = d * lax.rsqrt(var + eps) * g + b                   # g/b zero beyond real_dim
    return y.astype(out_dtype)


# ----------------------------- fused Pallas kernel -----------------------------
def _fused_bert_kernel(ids_ref, mask_ref, ori_ref,
                       wemb_ref, pos_ref, embln_ref,
                       wqkv_ref, bqkv_ref, wo_ref, w1_ref, w2_ref, vecs_ref,
                       out_ref, *, batch, seq, num_heads, head_dim, hidden,
                       num_layers, num_words):
    f32, bf16 = jnp.float32, jnp.bfloat16
    BS = batch * seq
    lane_mask = (lax.broadcasted_iota(jnp.int32, (1, HP), 1) < hidden).astype(f32)

    # ---- fused embedding: one-hot gather (MXU) + (pos + token-type) add + LayerNorm ----
    vocab = wemb_ref.shape[0]
    onehot_tok = (lax.broadcasted_iota(jnp.int32, (BS, vocab), 1)
                  == ids_ref[...]).astype(f32)                                # (BS, V)
    emb = jnp.dot(onehot_tok, wemb_ref[...], preferred_element_type=f32)      # (BS, HP)
    emb = emb + jnp.concatenate([pos_ref[...]] * batch, axis=0)               # pos+type, tiled
    x = _ln_masked(emb, embln_ref[0:1, :], embln_ref[1:2, :], lane_mask, hidden, bf16)

    # ---- per-sentence additive attention bias, broadcast hoisted out of all loops ----
    mask = mask_ref[...]                                                      # (B, S) int32
    biases = [jnp.broadcast_to(jnp.where(mask[b:b + 1, :] != 0, -1e9, 0.0).astype(f32),
                               (seq, seq)) for b in range(batch)]

    qo, ko, vo = 0, num_heads * head_dim, 2 * num_heads * head_dim

    for l in range(num_layers):                      # static unrolled layer loop
        wqkv = wqkv_ref[l]                           # (HP, QKV_LANES) bf16, Q pre-scaled
        bqkv = bqkv_ref[l]                           # (1, QKV_LANES)  f32
        wo = wo_ref[l]                               # (hidden, HP)    bf16
        w1 = w1_ref[l]                               # (HP, FP)        bf16
        w2 = w2_ref[l]                               # (FP, HP)        bf16
        vecs = vecs_ref[l]                           # (8, HP)         f32
        bo, ln1g, ln1b = vecs[0:1, :], vecs[1:2, :], vecs[2:3, :]
        b1, b2 = vecs[3:4, :], vecs[4:5, :]
        ln2g, ln2b = vecs[5:6, :], vecs[6:7, :]

        # fused QKV projection for the whole flattened batch (single MXU matmul, f32 acc)
        qkv = (jnp.dot(x, wqkv, preferred_element_type=f32) + bqkv).astype(bf16)

        attn_rows = []
        for b in range(batch):                       # attention per sentence (static slices)
            r0 = b * seq
            acc = None
            for h in range(num_heads):
                c0 = h * head_dim
                qh = qkv[r0:r0 + seq, qo + c0:qo + c0 + head_dim]
                kh = qkv[r0:r0 + seq, ko + c0:ko + c0 + head_dim]
                vh = qkv[r0:r0 + seq, vo + c0:vo + c0 + head_dim]
                scores = lax.dot_general(qh, kh, (((1,), (1,)), ((), ())),
                                         preferred_element_type=f32) + biases[b]
                m = jnp.max(scores, axis=-1, keepdims=True)
                e = jnp.exp(scores - m)
                probs = (e * pl.reciprocal(jnp.sum(e, axis=-1, keepdims=True),
                                           approx=True)).astype(bf16)
                ctx = jnp.dot(probs, vh, preferred_element_type=f32).astype(bf16)  # (S, hd)
                part = jnp.dot(ctx, wo[c0:c0 + head_dim, :],
                               preferred_element_type=f32)                    # (S, HP)
                acc = part if acc is None else acc + part                     # no concat
            attn_rows.append(acc)
        attn_out = jnp.concatenate(attn_rows, axis=0) + bo                    # (BS, HP)

        is_last = (l == num_layers - 1)
        x1 = _ln_masked(x + attn_out, ln1g, ln1b, lane_mask, hidden, bf16)
        h1 = _gelu(jnp.dot(x1, w1, preferred_element_type=f32) + b1).astype(bf16)
        ffn_out = jnp.dot(h1, w2, preferred_element_type=f32) + b2
        x = _ln_masked(x1 + ffn_out, ln2g, ln2b, lane_mask, hidden,
                       f32 if is_last else bf16)

    # ---- SequenceGroupAggregating(mode='mean') over rows 1..seq-2 of each sentence ----
    nw = seq - 2
    w_iota = lax.broadcasted_iota(jnp.int32, (num_words, nw), 0)
    for b in range(batch):
        onehot = (w_iota == ori_ref[b:b + 1, :]).astype(f32)                  # (W, nw)
        counts = jnp.sum(onehot, axis=-1, keepdims=True)
        agg = jnp.dot(onehot, x[b * seq + 1:b * seq + 1 + nw, :],
                      preferred_element_type=f32)                             # (W, HP)
        out_ref[b, :, :] = agg / jnp.maximum(counts, 1.0)                     # exact mean


# ----------------------------- weight packing (compact, lane-dense) -----------------
def _pack_layer(layer):
    (wq, bq, wk, bk, wv, bv, wo, bo,
     ln1g, ln1b, w1, b1, w2, b2, ln2g, ln2b) = layer
    H = HIDDEN
    scale = 1.0 / float(HEAD_DIM) ** 0.5
    # compact QKV: lanes [0:H)=Q*scale, [H:2H)=K, [2H:3H)=V (heads contiguous, HEAD_DIM offsets)
    wqkv = jnp.zeros((HP, QKV_LANES), jnp.float32)
    wqkv = wqkv.at[:H, 0:H].set(wq * scale)
    wqkv = wqkv.at[:H, H:2 * H].set(wk)
    wqkv = wqkv.at[:H, 2 * H:3 * H].set(wv)
    bqkv = jnp.zeros((1, QKV_LANES), jnp.float32)
    bqkv = bqkv.at[:, 0:H].set(bq * scale)
    bqkv = bqkv.at[:, H:2 * H].set(bk)
    bqkv = bqkv.at[:, 2 * H:3 * H].set(bv)
    wop = jnp.zeros((H, HP), jnp.float32).at[:, :H].set(wo)     # compact: (32, 128)
    w1p = jnp.zeros((HP, FP), jnp.float32).at[:H, :FFN].set(w1)
    w2p = jnp.zeros((FP, HP), jnp.float32).at[:FFN, :H].set(w2)
    vecs = jnp.zeros((8, HP), jnp.float32)
    vecs = vecs.at[0, :H].set(bo[0])
    vecs = vecs.at[1, :H].set(ln1g[0])
    vecs = vecs.at[2, :H].set(ln1b[0])
    vecs = vecs.at[3, :FFN].set(b1[0])
    vecs = vecs.at[4, :H].set(b2[0])
    vecs = vecs.at[5, :H].set(ln2g[0])
    vecs = vecs.at[6, :H].set(ln2b[0])
    return wqkv, bqkv, wop, w1p, w2p, vecs


def pack_params(params):
    packed = [_pack_layer(l) for l in params["layers"]]
    emb_ln = jnp.zeros((2, HP), jnp.float32)
    emb_ln = emb_ln.at[0, :HIDDEN].set(params["emb_ln_g"][0])
    emb_ln = emb_ln.at[1, :HIDDEN].set(params["emb_ln_b"][0])
    # pre-pad embedding tables to 128 lanes; fold the constant token-type-0 row into pos_emb
    wemb = jnp.zeros((VOCAB, HP), jnp.float32).at[:, :HIDDEN].set(params["word_emb"])
    pos_type = jnp.zeros((SEQ, HP), jnp.float32).at[:, :HIDDEN].set(
        params["pos_emb"] + params["type_emb"][0][None, :])
    return {
        "wemb": wemb, "pos_type": pos_type, "emb_ln": emb_ln,
        "wqkv": jnp.stack([p[0] for p in packed]).astype(jnp.bfloat16),
        "bqkv": jnp.stack([p[1] for p in packed]),
        "wo":   jnp.stack([p[2] for p in packed]).astype(jnp.bfloat16),
        "w1":   jnp.stack([p[3] for p in packed]).astype(jnp.bfloat16),
        "w2":   jnp.stack([p[4] for p in packed]).astype(jnp.bfloat16),
        "vecs": jnp.stack([p[5] for p in packed]),
    }


# ----------------------------- BertLikeEmbedder.forward (Pallas path) -----------------
def bert_like_embedder_forward(packed, sub_tok_ids, sub_mask, ori_indexes):
    """BertLikeEmbedder.forward (default config). sub_mask: True = padding position.
    Returns the lane-padded (B, max_words, 128) word aggregation; downstream consumers
    slice [..., :HIDDEN] (and [:, :actual_num_words]) -- kept padded to avoid extra
    XLA copies and data-dependent recompiles."""
    Bb, S = sub_tok_ids.shape
    W = ori_indexes.shape[1]                      # static padded word capacity (== S - 2)
    ids_col = sub_tok_ids.reshape(Bb * S, 1).astype(jnp.int32)
    mask_i = sub_mask.astype(jnp.int32)

    kernel = functools.partial(
        _fused_bert_kernel, batch=Bb, seq=S, num_heads=NUM_HEADS, head_dim=HEAD_DIM,
        hidden=HIDDEN, num_layers=NUM_LAYERS, num_words=W)

    # Single kernel invocation (no grid): every operand is mapped in full into VMEM once
    # and the batch is folded into the matmul M dimension inside the kernel.
    # TODO(synk): for a real HF BERT (12+ layers, 768 hidden) add a layer grid axis or
    # pltpu.emit_pipeline so only ~2 layers of weights are VMEM-resident at a time.
    return pl.pallas_call(
        kernel,
        out_shape=jax.ShapeDtypeStruct((Bb, W, HP), jnp.float32),
    )(ids_col, mask_i, ori_indexes.astype(jnp.int32),
      packed["wemb"], packed["pos_type"], packed["emb_ln"],
      packed["wqkv"], packed["bqkv"], packed["wo"],
      packed["w1"], packed["w2"], packed["vecs"])


# ----------------------------- pure-JAX reference (f32, unpadded) ---------------------
def _layer_norm(x, g, b, eps=LN_EPS):
    mu = jnp.mean(x, axis=-1, keepdims=True)
    var = jnp.mean((x - mu) ** 2, axis=-1, keepdims=True)
    return (x - mu) * lax.rsqrt(var + eps) * g + b


def _bert_layer_math(x, attn_bias, p, num_heads):
    (wq, bq, wk, bk, wv, bv, wo, bo,
     ln1g, ln1b, w1, b1, w2, b2, ln2g, ln2b) = p
    S, H = x.shape
    hd = H // num_heads
    q = jnp.dot(x, wq, preferred_element_type=jnp.float32) + bq
    k = jnp.dot(x, wk, preferred_element_type=jnp.float32) + bk
    v = jnp.dot(x, wv, preferred_element_type=jnp.float32) + bv
    scale = 1.0 / float(hd) ** 0.5
    ctx_heads = []
    for h in range(num_heads):
        qh = q[:, h * hd:(h + 1) * hd]
        kh = k[:, h * hd:(h + 1) * hd]
        vh = v[:, h * hd:(h + 1) * hd]
        scores = jnp.dot(qh, kh.T, preferred_element_type=jnp.float32) * scale + attn_bias
        m = jnp.max(scores, axis=-1, keepdims=True)
        e = jnp.exp(scores - m)
        probs = e / jnp.sum(e, axis=-1, keepdims=True)
        ctx_heads.append(jnp.dot(probs, vh, preferred_element_type=jnp.float32))
    ctx = jnp.concatenate(ctx_heads, axis=-1)
    attn_out = jnp.dot(ctx, wo, preferred_element_type=jnp.float32) + bo
    x1 = _layer_norm(x + attn_out, ln1g, ln1b)
    ffn = jnp.dot(_gelu(jnp.dot(x1, w1, preferred_element_type=jnp.float32) + b1),
                  w2, preferred_element_type=jnp.float32) + b2
    return _layer_norm(x1 + ffn, ln2g, ln2b)


def _group_agg_math(h, ori_row, num_words):
    w_iota = lax.broadcasted_iota(jnp.int32, (num_words, h.shape[0]), 0)
    onehot = (w_iota == ori_row).astype(jnp.float32)
    counts = jnp.sum(onehot, axis=-1, keepdims=True)
    agg = jnp.dot(onehot, h, preferred_element_type=jnp.float32)
    return agg / jnp.maximum(counts, 1.0)


def _embed(params, sub_tok_ids):
    S = sub_tok_ids.shape[1]
    emb = (jnp.take(params["word_emb"], sub_tok_ids, axis=0)
           + params["pos_emb"][None, :S, :]
           + params["type_emb"][0][None, None, :])
    return _layer_norm(emb, params["emb_ln_g"], params["emb_ln_b"])


def reference_forward(params, sub_tok_ids, sub_mask, ori_indexes, num_words):
    attn_mask = (~sub_mask).astype(jnp.float32)
    mask_bias = ((attn_mask - 1.0) * 1e9)[:, None, :]
    h = _embed(params, sub_tok_ids)
    for lp in params["layers"]:
        h = jnp.stack([_bert_layer_math(h[b], mask_bias[b], lp, NUM_HEADS)
                       for b in range(h.shape[0])])
    bert_hidden = h[:, 1:-1]
    ori3 = ori_indexes.astype(jnp.int32)[:, None, :]
    return jnp.stack([_group_agg_math(bert_hidden[b], ori3[b], num_words)
                      for b in range(bert_hidden.shape[0])])


# ----------------------------- parameter init -----------------------------
def init_params(key):
    ks = jax.random.split(key, 3)
    std = 0.02

    def normal(k, shape):
        return jax.random.normal(k, shape, dtype=jnp.float32) * std

    params = {
        "word_emb": normal(ks[0], (VOCAB, HIDDEN)),
        "pos_emb": normal(ks[1], (SEQ, HIDDEN)),
        "type_emb": normal(ks[2], (2, HIDDEN)),
        "emb_ln_g": jnp.ones((1, HIDDEN), jnp.float32),
        "emb_ln_b": jnp.zeros((1, HIDDEN), jnp.float32),
        "layers": [],
    }
    for l in range(NUM_LAYERS):
        lk = jax.random.split(jax.random.fold_in(key, 100 + l), 8)
        layer = (
            normal(lk[0], (HIDDEN, HIDDEN)), jnp.zeros((1, HIDDEN), jnp.float32),    # wq, bq
            normal(lk[1], (HIDDEN, HIDDEN)), jnp.zeros((1, HIDDEN), jnp.float32),    # wk, bk
            normal(lk[2], (HIDDEN, HIDDEN)), jnp.zeros((1, HIDDEN), jnp.float32),    # wv, bv
            normal(lk[3], (HIDDEN, HIDDEN)), jnp.zeros((1, HIDDEN), jnp.float32),    # wo, bo
            jnp.ones((1, HIDDEN), jnp.float32), jnp.zeros((1, HIDDEN), jnp.float32), # ln1 g,b
            normal(lk[4], (HIDDEN, FFN)), jnp.zeros((1, FFN), jnp.float32),          # w1, b1
            normal(lk[5], (FFN, HIDDEN)), jnp.zeros((1, HIDDEN), jnp.float32),       # w2, b2
            jnp.ones((1, HIDDEN), jnp.float32), jnp.zeros((1, HIDDEN), jnp.float32), # ln2 g,b
        )
        params["layers"].append(layer)
    return params


# ----------------------------- main -----------------------------
if __name__ == "__main__":
    key = jax.random.PRNGKey(0)
    k_par, k_tok = jax.random.split(key)
    params = init_params(k_par)
    packed = pack_params(params)

    # sentence 0: 5 words, sub-token counts [1,2,2,1,2] -> 8 sub-tokens (full length)
    # sentence 1: 4 words, sub-token counts [1,1,2,1]   -> 5 sub-tokens (padded)
    rand_ids = jax.random.randint(k_tok, (B, SSUB), 3, VOCAB, dtype=jnp.int32)
    ids0 = [CLS] + [int(t) for t in rand_ids[0]] + [SEP]
    ids1 = [CLS] + [int(t) for t in rand_ids[1][:5]] + [SEP] + [PAD] * 3
    sub_tok_ids = jnp.array([ids0, ids1], dtype=jnp.int32)                 # (B, SEQ)
    sub_mask = jnp.array([[False] * SEQ,
                          [False] * 7 + [True] * 3], dtype=bool)           # True = padding
    ori_indexes = jnp.array([[0, 1, 1, 2, 2, 3, 4, 4],
                             [0, 1, 2, 2, 3, -1, -1, -1]], dtype=jnp.int32)  # (B, SSUB)

    fwd = jax.jit(bert_like_embedder_forward)
    out = jax.block_until_ready(fwd(packed, sub_tok_ids, sub_mask, ori_indexes))

    ref = reference_forward(params, sub_tok_ids, sub_mask, ori_indexes, SSUB)  # (B, SSUB, H)
    assert out.shape == (B, SSUB, HP), out.shape
    assert bool(jnp.all(jnp.isfinite(out)))
    assert bool(jnp.allclose(out[:, :, :HIDDEN], ref, atol=5e-2, rtol=5e-2))
    print("KERNEL_OK")
</pallas_src>

<mosaic_0001>
module attributes {stable_mosaic.version = 11 : i64} {
  func.func @_fused_bert_kernel(%arg0: memref<20x1xi32, #tpu.memory_space<vmem>>, %arg1: memref<2x10xi32, #tpu.memory_space<vmem>>, %arg2: memref<2x8xi32, #tpu.memory_space<vmem>>, %arg3: memref<50x128xf32, #tpu.memory_space<vmem>>, %arg4: memref<10x128xf32, #tpu.memory_space<vmem>>, %arg5: memref<2x128xf32, #tpu.memory_space<vmem>>, %arg6: memref<2x128x128xbf16, #tpu.memory_space<vmem>>, %arg7: memref<2x1x128xf32, #tpu.memory_space<vmem>>, %arg8: memref<2x32x128xbf16, #tpu.memory_space<vmem>>, %arg9: memref<2x128x128xbf16, #tpu.memory_space<vmem>>, %arg10: memref<2x128x128xbf16, #tpu.memory_space<vmem>>, %arg11: memref<2x8x128xf32, #tpu.memory_space<vmem>>, %arg12: memref<2x8x128xf32, #tpu.memory_space<vmem>>) attributes {dimension_semantics = [], scalar_prefetch = 0 : i64, scratch_operands = 0 : i64, tpu.core_type = #tpu.core_type<tc>} {
    %0 = tpu.iota {dimensions = array<i32: 1>} : vector<1x128xi32>
    %c32_i32 = arith.constant 32 : i32
    %1 = vector.broadcast %c32_i32 : i32 to vector<1x128xi32>
    %2 = arith.cmpi slt, %0, %1 : vector<1x128xi32>
    %3 = arith.extui %2 : vector<1x128xi1> to vector<1x128xi32>
    %4 = arith.sitofp %3 : vector<1x128xi32> to vector<1x128xf32>
    %5 = tpu.iota {dimensions = array<i32: 1>} : vector<20x50xi32>
    %c0 = arith.constant 0 : index
    %c0_0 = arith.constant 0 : index
    %6 = vector.load %arg0[%c0, %c0_0] : memref<20x1xi32, #tpu.memory_space<vmem>>, vector<20x1xi32>
    %7 = vector.broadcast %6 : vector<20x1xi32> to vector<20x50xi32>
    %8 = arith.cmpi eq, %5, %7 : vector<20x50xi32>
    %9 = arith.extui %8 : vector<20x50xi1> to vector<20x50xi32>
    %10 = arith.sitofp %9 : vector<20x50xi32> to vector<20x50xf32>
    %c0_1 = arith.constant 0 : index
    %c0_2 = arith.constant 0 : index
    %11 = vector.load %arg3[%c0_1, %c0_2] : memref<50x128xf32, #tpu.memory_space<vmem>>, vector<50x128xf32>
    %cst = arith.constant dense<0.000000e+00> : vector<20x128xf32>
    %12 = tpu.matmul %10, %11, %cst {dimension_numbers = #tpu.dot_dimension_numbers<[1], [0], [0], [1], [0, 0, 1, 1], [], []>} : vector<20x50xf32>, vector<50x128xf32>, vector<20x128xf32> -> vector<20x128xf32>
    %c0_3 = arith.constant 0 : index
    %c0_4 = arith.constant 0 : index
    %13 = vector.load %arg4[%c0_3, %c0_4] : memref<10x128xf32, #tpu.memory_space<vmem>>, vector<10x128xf32>
    %14 = tpu.concatenate %13, %13 in 0 : vector<10x128xf32>, vector<10x128xf32> -> vector<20x128xf32>
    %15 = arith.addf %12, %14 : vector<20x128xf32>
    %c0_5 = arith.constant 0 : index
    %c0_6 = arith.constant 0 : index
    %16 = vector.load %arg5[%c0_5, %c0_6] : memref<2x128xf32, #tpu.memory_space<vmem>>, vector<1x128xf32>
    %c1 = arith.constant 1 : index
    %c0_7 = arith.constant 0 : index
    %17 = vector.load %arg5[%c1, %c0_7] : memref<2x128xf32, #tpu.memory_space<vmem>>, vector<1x128xf32>
    %cst_8 = arith.constant dense<0.000000e+00> : vector<20xf32>
    %18 = vector.multi_reduction <add>, %15, %cst_8 [1] : vector<20x128xf32> to vector<20xf32>
    %19 = vector.shape_cast %18 : vector<20xf32> to vector<20x1xf32>
    %cst_9 = arith.constant 3.125000e-02 : f32
    %20 = vector.broadcast %cst_9 : f32 to vector<20x1xf32>
    %21 = arith.mulf %19, %20 : vector<20x1xf32>
    %22 = vector.broadcast %21 : vector<20x1xf32> to vector<20x128xf32>
    %23 = arith.subf %15, %22 : vector<20x128xf32>
    %24 = vector.broadcast %4 : vector<1x128xf32> to vector<20x128xf32>
    %25 = arith.mulf %23, %24 : vector<20x128xf32>
    %26 = arith.mulf %25, %25 : vector<20x128xf32>
    %cst_10 = arith.constant dense<0.000000e+00> : vector<20xf32>
    %27 = vector.multi_reduction <add>, %26, %cst_10 [1] : vector<20x128xf32> to vector<20xf32>
    %28 = vector.shape_cast %27 : vector<20xf32> to vector<20x1xf32>
    %cst_11 = arith.constant 3.125000e-02 : f32
    %29 = vector.broadcast %cst_11 : f32 to vector<20x1xf32>
    %30 = arith.mulf %28, %29 : vector<20x1xf32>
    %cst_12 = arith.constant 9.99999996E-13 : f32
    %31 = vector.broadcast %cst_12 : f32 to vector<20x1xf32>
    %32 = arith.addf %30, %31 : vector<20x1xf32>
    %33 = math.rsqrt %32 : vector<20x1xf32>
    %34 = vector.broadcast %33 : vector<20x1xf32> to vector<20x128xf32>
    %35 = arith.mulf %25, %34 : vector<20x128xf32>
    %36 = vector.broadcast %16 : vector<1x128xf32> to vector<20x128xf32>
    %37 = arith.mulf %35, %36 : vector<20x128xf32>
    %38 = vector.broadcast %17 : vector<1x128xf32> to vector<20x128xf32>
    %39 = arith.addf %37, %38 : vector<20x128xf32>
    %40 = arith.truncf %39 : vector<20x128xf32> to vector<20x128xbf16>
    %c0_13 = arith.constant 0 : index
    %c0_14 = arith.constant 0 : index
    %41 = vector.load %arg1[%c0_13, %c0_14] : memref<2x10xi32, #tpu.memory_space<vmem>>, vector<2x10xi32>
    %42 = vector.extract_strided_slice %41 {offsets = [0, 0], sizes = [1, 10], strides = [1, 1]} : vector<2x10xi32> to vector<1x10xi32>
    %c0_i32 = arith.constant 0 : i32
    %43 = vector.broadcast %c0_i32 : i32 to vector<1x10xi32>
    %44 = arith.cmpi ne, %42, %43 : vector<1x10xi32>
    %cst_15 = arith.constant -1.000000e+09 : f32
    %cst_16 = arith.constant 0.000000e+00 : f32
    %45 = vector.broadcast %cst_15 : f32 to vector<1x10xf32>
    %46 = vector.broadcast %cst_16 : f32 to vector<1x10xf32>
    %47 = arith.select %44, %45, %46 : vector<1x10xi1>, vector<1x10xf32>
    %48 = vector.shape_cast %47 : vector<1x10xf32> to vector<1x10xf32>
    %49 = vector.broadcast %48 : vector<1x10xf32> to vector<10x10xf32>
    %50 = vector.extract_strided_slice %41 {offsets = [1, 0], sizes = [1, 10], strides = [1, 1]} : vector<2x10xi32> to vector<1x10xi32>
    %c0_i32_17 = arith.constant 0 : i32
    %51 = vector.broadcast %c0_i32_17 : i32 to vector<1x10xi32>
    %52 = arith.cmpi ne, %50, %51 : vector<1x10xi32>
    %cst_18 = arith.constant -1.000000e+09 : f32
    %cst_19 = arith.constant 0.000000e+00 : f32
    %53 = vector.broadcast %cst_18 : f32 to vector<1x10xf32>
    %54 = vector.broadcast %cst_19 : f32 to vector<1x10xf32>
    %55 = arith.select %52, %53, %54 : vector<1x10xi1>, vector<1x10xf32>
    %56 = vector.shape_cast %55 : vector<1x10xf32> to vector<1x10xf32>
    %57 = vector.broadcast %56 : vector<1x10xf32> to vector<10x10xf32>
    %c0_20 = arith.constant 0 : index
    %c0_21 = arith.constant 0 : index
    %c0_22 = arith.constant 0 : index
    %58 = vector.load %arg6[%c0_20, %c0_21, %c0_22] : memref<2x128x128xbf16, #tpu.memory_space<vmem>>, vector<1x128x128xbf16>
    %59 = vector.shape_cast %58 : vector<1x128x128xbf16> to vector<128x128xbf16>
    %c0_23 = arith.constant 0 : index
    %c0_24 = arith.constant 0 : index
    %c0_25 = arith.constant 0 : index
    %60 = vector.load %arg7[%c0_23, %c0_24, %c0_25] : memref<2x1x128xf32, #tpu.memory_space<vmem>>, vector<1x1x128xf32>
    %61 = vector.shape_cast %60 : vector<1x1x128xf32> to vector<1x128xf32>
    %c0_26 = arith.constant 0 : index
    %c0_27 = arith.constant 0 : index
    %c0_28 = arith.constant 0 : index
    %62 = vector.load %arg8[%c0_26, %c0_27, %c0_28] : memref<2x32x128xbf16, #tpu.memory_space<vmem>>, vector<1x32x128xbf16>
    %63 = vector.shape_cast %62 : vector<1x32x128xbf16> to vector<32x128xbf16>
    %c0_29 = arith.constant 0 : index
    %c0_30 = arith.constant 0 : index
    %c0_31 = arith.constant 0 : index
    %64 = vector.load %arg9[%c0_29, %c0_30, %c0_31] : memref<2x128x128xbf16, #tpu.memory_space<vmem>>, vector<1x128x128xbf16>
    %65 = vector.shape_cast %64 : vector<1x128x128xbf16> to vector<128x128xbf16>
    %c0_32 = arith.constant 0 : index
    %c0_33 = arith.constant 0 : index
    %c0_34 = arith.constant 0 : index
    %66 = vector.load %arg10[%c0_32, %c0_33, %c0_34] : memref<2x128x128xbf16, #tpu.memory_space<vmem>>, vector<1x128x128xbf16>
    %67 = vector.shape_cast %66 : vector<1x128x128xbf16> to vector<128x128xbf16>
    %c0_35 = arith.constant 0 : index
    %c0_36 = arith.constant 0 : index
    %c0_37 = arith.constant 0 : index
    %68 = vector.load %arg11[%c0_35, %c0_36, %c0_37] : memref<2x8x128xf32, #tpu.memory_space<vmem>>, vector<1x8x128xf32>
    %69 = vector.shape_cast %68 : vector<1x8x128xf32> to vector<8x128xf32>
    %70 = vector.extract_strided_slice %69 {offsets = [0, 0], sizes = [1, 128], strides = [1, 1]} : vector<8x128xf32> to vector<1x128xf32>
    %71 = vector.extract_strided_slice %69 {offsets = [1, 0], sizes = [1, 128], strides = [1, 1]} : vector<8x128xf32> to vector<1x128xf32>
    %72 = vector.extract_strided_slice %69 {offsets = [2, 0], sizes = [1, 128], strides = [1, 1]} : vector<8x128xf32> to vector<1x128xf32>
    %73 = vector.extract_strided_slice %69 {offsets = [3, 0], sizes = [1, 128], strides = [1, 1]} : vector<8x128xf32> to vector<1x128xf32>
    %74 = vector.extract_strided_slice %69 {offsets = [4, 0], sizes = [1, 128], strides = [1, 1]} : vector<8x128xf32> to vector<1x128xf32>
    %75 = vector.extract_strided_slice %69 {offsets = [5, 0], sizes = [1, 128], strides = [1, 1]} : vector<8x128xf32> to vector<1x128xf32>
    %76 = vector.extract_strided_slice %69 {offsets = [6, 0], sizes = [1, 128], strides = [1, 1]} : vector<8x128xf32> to vector<1x128xf32>
    %cst_38 = arith.constant dense<0.000000e+00> : vector<20x128xf32>
    %77 = tpu.matmul %40, %59, %cst_38 {dimension_numbers = #tpu.dot_dimension_numbers<[1], [0], [0], [1], [0, 0, 1, 1], [], []>} : vector<20x128xbf16>, vector<128x128xbf16>, vector<20x128xf32> -> vector<20x128xf32>
    %78 = vector.broadcast %61 : vector<1x128xf32> to vector<20x128xf32>
    %79 = arith.addf %77, %78 : vector<20x128xf32>
    %80 = arith.truncf %79 : vector<20x128xf32> to vector<20x128xbf16>
    %81 = vector.extract_strided_slice %80 {offsets = [0, 0], sizes = [10, 16], strides = [1, 1]} : vector<20x128xbf16> to vector<10x16xbf16>
    %82 = vector.extract_strided_slice %80 {offsets = [0, 32], sizes = [10, 16], strides = [1, 1]} : vector<20x128xbf16> to vector<10x16xbf16>
    %83 = vector.extract_strided_slice %80 {offsets = [0, 64], sizes = [10, 16], strides = [1, 1]} : vector<20x128xbf16> to vector<10x16xbf16>
    %cst_39 = arith.constant dense<0.000000e+00> : vector<10x10xf32>
    %84 = tpu.matmul %81, %82, %cst_39 {dimension_numbers = #tpu.dot_dimension_numbers<[1], [1], [0], [0], [0, 0, 1, 0], [], []>} : vector<10x16xbf16>, vector<10x16xbf16>, vector<10x10xf32> -> vector<10x10xf32>
    %85 = arith.addf %84, %49 : vector<10x10xf32>
    %cst_40 = arith.constant dense<0xFF800000> : vector<10xf32>
    %86 = vector.multi_reduction <maximumf>, %85, %cst_40 [1] : vector<10x10xf32> to vector<10xf32>
    %87 = vector.shape_cast %86 : vector<10xf32> to vector<10x1xf32>
    %88 = vector.broadcast %87 : vector<10x1xf32> to vector<10x10xf32>
    %89 = arith.subf %85, %88 : vector<10x10xf32>
    %90 = math.exp %89 : vector<10x10xf32>
    %cst_41 = arith.constant dense<0.000000e+00> : vector<10xf32>
    %91 = vector.multi_reduction <add>, %90, %cst_41 [1] : vector<10x10xf32> to vector<10xf32>
    %92 = vector.shape_cast %91 : vector<10xf32> to vector<10x1xf32>
    %93 = tpu.reciprocal %92 {approx = true} : vector<10x1xf32> -> vector<10x1xf32>
    %94 = vector.broadcast %93 : vector<10x1xf32> to vector<10x10xf32>
    %95 = arith.mulf %90, %94 : vector<10x10xf32>
    %96 = arith.truncf %95 : vector<10x10xf32> to vector<10x10xbf16>
    %cst_42 = arith.constant dense<0.000000e+00> : vector<10x16xf32>
    %97 = tpu.matmul %96, %83, %cst_42 {dimension_numbers = #tpu.dot_dimension_numbers<[1], [0], [0], [1], [0, 0, 1, 1], [], []>} : vector<10x10xbf16>, vector<10x16xbf16>, vector<10x16xf32> -> vector<10x16xf32>
    %98 = arith.truncf %97 : vector<10x16xf32> to vector<10x16xbf16>
    %99 = vector.extract_strided_slice %63 {offsets = [0, 0], sizes = [16, 128], strides = [1, 1]} : vector<32x128xbf16> to vector<16x128xbf16>
    %cst_43 = arith.constant dense<0.000000e+00> : vector<10x128xf32>
    %100 = tpu.matmul %98, %99, %cst_43 {dimension_numbers = #tpu.dot_dimension_numbers<[1], [0], [0], [1], [0, 0, 1, 1], [], []>} : vector<10x16xbf16>, vector<16x128xbf16>, vector<10x128xf32> -> vector<10x128xf32>
    %101 = vector.extract_strided_slice %80 {offsets = [0, 16], sizes = [10, 16], strides = [1, 1]} : vector<20x128xbf16> to vector<10x16xbf16>
    %102 = vector.extract_strided_slice %80 {offsets = [0, 48], sizes = [10, 16], strides = [1, 1]} : vector<20x128xbf16> to vector<10x16xbf16>
    %103 = vector.extract_strided_slice %80 {offsets = [0, 80], sizes = [10, 16], strides = [1, 1]} : vector<20x128xbf16> to vector<10x16xbf16>
    %cst_44 = arith.constant dense<0.000000e+00> : vector<10x10xf32>
    %104 = tpu.matmul %101, %102, %cst_44 {dimension_numbers = #tpu.dot_dimension_numbers<[1], [1], [0], [0], [0, 0, 1, 0], [], []>} : vector<10x16xbf16>, vector<10x16xbf16>, vector<10x10xf32> -> vector<10x10xf32>
    %105 = arith.addf %104, %49 : vector<10x10xf32>
    %cst_45 = arith.constant dense<0xFF800000> : vector<10xf32>
    %106 = vector.multi_reduction <maximumf>, %105, %cst_45 [1] : vector<10x10xf32> to vector<10xf32>
    %107 = vector.shape_cast %106 : vector<10xf32> to vector<10x1xf32>
    %108 = vector.broadcast %107 : vector<10x1xf32> to vector<10x10xf32>
    %109 = arith.subf %105, %108 : vector<10x10xf32>
    %110 = math.exp %109 : vector<10x10xf32>
    %cst_46 = arith.constant dense<0.000000e+00> : vector<10xf32>
    %111 = vector.multi_reduction <add>, %110, %cst_46 [1] : vector<10x10xf32> to vector<10xf32>
    %112 = vector.shape_cast %111 : vector<10xf32> to vector<10x1xf32>
    %113 = tpu.reciprocal %112 {approx = true} : vector<10x1xf32> -> vector<10x1xf32>
    %114 = vector.broadcast %113 : vector<10x1xf32> to vector<10x10xf32>
    %115 = arith.mulf %110, %114 : vector<10x10xf32>
    %116 = arith.truncf %115 : vector<10x10xf32> to vector<10x10xbf16>
    %cst_47 = arith.constant dense<0.000000e+00> : vector<10x16xf32>
    %117 = tpu.matmul %116, %103, %cst_47 {dimension_numbers = #tpu.dot_dimension_numbers<[1], [0], [0], [1], [0, 0, 1, 1], [], []>} : vector<10x10xbf16>, vector<10x16xbf16>, vector<10x16xf32> -> vector<10x16xf32>
    %118 = arith.truncf %117 : vector<10x16xf32> to vector<10x16xbf16>
    %119 = vector.extract_strided_slice %63 {offsets = [16, 0], sizes = [16, 128], strides = [1, 1]} : vector<32x128xbf16> to vector<16x128xbf16>
    %cst_48 = arith.constant dense<0.000000e+00> : vector<10x128xf32>
    %120 = tpu.matmul %118, %119, %cst_48 {dimension_numbers = #tpu.dot_dimension_numbers<[1], [0], [0], [1], [0, 0, 1, 1], [], []>} : vector<10x16xbf16>, vector<16x128xbf16>, vector<10x128xf32> -> vector<10x128xf32>
    %121 = arith.addf %100, %120 : vector<10x128xf32>
    %122 = vector.extract_strided_slice %80 {offsets = [10, 0], sizes = [10, 16], strides = [1, 1]} : vector<20x128xbf16> to vector<10x16xbf16>
    %123 = vector.extract_strided_slice %80 {offsets = [10, 32], sizes = [10, 16], strides = [1, 1]} : vector<20x128xbf16> to vector<10x16xbf16>
    %124 = vector.extract_strided_slice %80 {offsets = [10, 64], sizes = [10, 16], strides = [1, 1]} : vector<20x128xbf16> to vector<10x16xbf16>
    %cst_49 = arith.constant dense<0.000000e+00> : vector<10x10xf32>
    %125 = tpu.matmul %122, %123, %cst_49 {dimension_numbers = #tpu.dot_dimension_numbers<[1], [1], [0], [0], [0, 0, 1, 0], [], []>} : vector<10x16xbf16>, vector<10x16xbf16>, vector<10x10xf32> -> vector<10x10xf32>
    %126 = arith.addf %125, %57 : vector<10x10xf32>
    %cst_50 = arith.constant dense<0xFF800000> : vector<10xf32>
    %127 = vector.multi_reduction <maximumf>, %126, %cst_50 [1] : vector<10x10xf32> to vector<10xf32>
    %128 = vector.shape_cast %127 : vector<10xf32> to vector<10x1xf32>
    %129 = vector.broadcast %128 : vector<10x1xf32> to vector<10x10xf32>
    %130 = arith.subf %126, %129 : vector<10x10xf32>
    %131 = math.exp %130 : vector<10x10xf32>
    %cst_51 = arith.constant dense<0.000000e+00> : vector<10xf32>
    %132 = vector.multi_reduction <add>, %131, %cst_51 [1] : vector<10x10xf32> to vector<10xf32>
    %133 = vector.shape_cast %132 : vector<10xf32> to vector<10x1xf32>
    %134 = tpu.reciprocal %133 {approx = true} : vector<10x1xf32> -> vector<10x1xf32>
    %135 = vector.broadcast %134 : vector<10x1xf32> to vector<10x10xf32>
    %136 = arith.mulf %131, %135 : vector<10x10xf32>
    %137 = arith.truncf %136 : vector<10x10xf32> to vector<10x10xbf16>
    %cst_52 = arith.constant dense<0.000000e+00> : vector<10x16xf32>
    %138 = tpu.matmul %137, %124, %cst_52 {dimension_numbers = #tpu.dot_dimension_numbers<[1], [0], [0], [1], [0, 0, 1, 1], [], []>} : vector<10x10xbf16>, vector<10x16xbf16>, vector<10x16xf32> -> vector<10x16xf32>
    %139 = arith.truncf %138 : vector<10x16xf32> to vector<10x16xbf16>
    %140 = vector.extract_strided_slice %63 {offsets = [0, 0], sizes = [16, 128], strides = [1, 1]} : vector<32x128xbf16> to vector<16x128xbf16>
    %cst_53 = arith.constant dense<0.000000e+00> : vector<10x128xf32>
    %141 = tpu.matmul %139, %140, %cst_53 {dimension_numbers = #tpu.dot_dimension_numbers<[1], [0], [0], [1], [0, 0, 1, 1], [], []>} : vector<10x16xbf16>, vector<16x128xbf16>, vector<10x128xf32> -> vector<10x128xf32>
    %142 = vector.extract_strided_slice %80 {offsets = [10, 16], sizes = [10, 16], strides = [1, 1]} : vector<20x128xbf16> to vector<10x16xbf16>
    %143 = vector.extract_strided_slice %80 {offsets = [10, 48], sizes = [10, 16], strides = [1, 1]} : vector<20x128xbf16> to vector<10x16xbf16>
    %144 = vector.extract_strided_slice %80 {offsets = [10, 80], sizes = [10, 16], strides = [1, 1]} : vector<20x128xbf16> to vector<10x16xbf16>
    %cst_54 = arith.constant dense<0.000000e+00> : vector<10x10xf32>
    %145 = tpu.matmul %142, %143, %cst_54 {dimension_numbers = #tpu.dot_dimension_numbers<[1], [1], [0], [0], [0, 0, 1, 0], [], []>} : vector<10x16xbf16>, vector<10x16xbf16>, vector<10x10xf32> -> vector<10x10xf32>
    %146 = arith.addf %145, %57 : vector<10x10xf32>
    %cst_55 = arith.constant dense<0xFF800000> : vector<10xf32>
    %147 = vector.multi_reduction <maximumf>, %146, %cst_55 [1] : vector<10x10xf32> to vector<10xf32>
    %148 = vector.shape_cast %147 : vector<10xf32> to vector<10x1xf32>
    %149 = vector.broadcast %148 : vector<10x1xf32> to vector<10x10xf32>
    %150 = arith.subf %146, %149 : vector<10x10xf32>
    %151 = math.exp %150 : vector<10x10xf32>
    %cst_56 = arith.constant dense<0.000000e+00> : vector<10xf32>
    %152 = vector.multi_reduction <add>, %151, %cst_56 [1] : vector<10x10xf32> to vector<10xf32>
    %153 = vector.shape_cast %152 : vector<10xf32> to vector<10x1xf32>
    %154 = tpu.reciprocal %153 {approx = true} : vector<10x1xf32> -> vector<10x1xf32>
    %155 = vector.broadcast %154 : vector<10x1xf32> to vector<10x10xf32>
    %156 = arith.mulf %151, %155 : vector<10x10xf32>
    %157 = arith.truncf %156 : vector<10x10xf32> to vector<10x10xbf16>
    %cst_57 = arith.constant dense<0.000000e+00> : vector<10x16xf32>
    %158 = tpu.matmul %157, %144, %cst_57 {dimension_numbers = #tpu.dot_dimension_numbers<[1], [0], [0], [1], [0, 0, 1, 1], [], []>} : vector<10x10xbf16>, vector<10x16xbf16>, vector<10x16xf32> -> vector<10x16xf32>
    %159 = arith.truncf %158 : vector<10x16xf32> to vector<10x16xbf16>
    %160 = vector.extract_strided_slice %63 {offsets = [16, 0], sizes = [16, 128], strides = [1, 1]} : vector<32x128xbf16> to vector<16x128xbf16>
    %cst_58 = arith.constant dense<0.000000e+00> : vector<10x128xf32>
    %161 = tpu.matmul %159, %160, %cst_58 {dimension_numbers = #tpu.dot_dimension_numbers<[1], [0], [0], [1], [0, 0, 1, 1], [], []>} : vector<10x16xbf16>, vector<16x128xbf16>, vector<10x128xf32> -> vector<10x128xf32>
    %162 = arith.addf %141, %161 : vector<10x128xf32>
    %163 = tpu.concatenate %121, %162 in 0 : vector<10x128xf32>, vector<10x128xf32> -> vector<20x128xf32>
    %164 = vector.broadcast %70 : vector<1x128xf32> to vector<20x128xf32>
    %165 = arith.addf %163, %164 : vector<20x128xf32>
    %166 = arith.extf %40 : vector<20x128xbf16> to vector<20x128xf32>
    %167 = arith.addf %166, %165 : vector<20x128xf32>
    %cst_59 = arith.constant dense<0.000000e+00> : vector<20xf32>
    %168 = vector.multi_reduction <add>, %167, %cst_59 [1] : vector<20x128xf32> to vector<20xf32>
    %169 = vector.shape_cast %168 : vector<20xf32> to vector<20x1xf32>
    %cst_60 = arith.constant 3.125000e-02 : f32
    %170 = vector.broadcast %cst_60 : f32 to vector<20x1xf32>
    %171 = arith.mulf %169, %170 : vector<20x1xf32>
    %172 = vector.broadcast %171 : vector<20x1xf32> to vector<20x128xf32>
    %173 = arith.subf %167, %172 : vector<20x128xf32>
    %174 = vector.broadcast %4 : vector<1x128xf32> to vector<20x128xf32>
    %175 = arith.mulf %173, %174 : vector<20x128xf32>
    %176 = arith.mulf %175, %175 : vector<20x128xf32>
    %cst_61 = arith.constant dense<0.000000e+00> : vector<20xf32>
    %177 = vector.multi_reduction <add>, %176, %cst_61 [1] : vector<20x128xf32> to vector<20xf32>
    %178 = vector.shape_cast %177 : vector<20xf32> to vector<20x1xf32>
    %cst_62 = arith.constant 3.125000e-02 : f32
    %179 = vector.broadcast %cst_62 : f32 to vector<20x1xf32>
    %180 = arith.mulf %178, %179 : vector<20x1xf32>
    %cst_63 = arith.constant 9.99999996E-13 : f32
    %181 = vector.broadcast %cst_63 : f32 to vector<20x1xf32>
    %182 = arith.addf %180, %181 : vector<20x1xf32>
    %183 = math.rsqrt %182 : vector<20x1xf32>
    %184 = vector.broadcast %183 : vector<20x1xf32> to vector<20x128xf32>
    %185 = arith.mulf %175, %184 : vector<20x128xf32>
    %186 = vector.broadcast %71 : vector<1x128xf32> to vector<20x128xf32>
    %187 = arith.mulf %185, %186 : vector<20x128xf32>
    %188 = vector.broadcast %72 : vector<1x128xf32> to vector<20x128xf32>
    %189 = arith.addf %187, %188 : vector<20x128xf32>
    %190 = arith.truncf %189 : vector<20x128xf32> to vector<20x128xbf16>
    %cst_64 = arith.constant dense<0.000000e+00> : vector<20x128xf32>
    %191 = tpu.matmul %190, %65, %cst_64 {dimension_numbers = #tpu.dot_dimension_numbers<[1], [0], [0], [1], [0, 0, 1, 1], [], []>} : vector<20x128xbf16>, vector<128x128xbf16>, vector<20x128xf32> -> vector<20x128xf32>
    %192 = vector.broadcast %73 : vector<1x128xf32> to vector<20x128xf32>
    %193 = arith.addf %191, %192 : vector<20x128xf32>
    %cst_65 = arith.constant 5.000000e-01 : f32
    %194 = vector.broadcast %cst_65 : f32 to vector<20x128xf32>
    %195 = arith.mulf %194, %193 : vector<20x128xf32>
    %cst_66 = arith.constant 4.471500e-02 : f32
    %196 = vector.broadcast %cst_66 : f32 to vector<20x128xf32>
    %197 = arith.mulf %196, %193 : vector<20x128xf32>
    %198 = arith.mulf %197, %193 : vector<20x128xf32>
    %199 = arith.mulf %198, %193 : vector<20x128xf32>
    %200 = arith.addf %193, %199 : vector<20x128xf32>
    %cst_67 = arith.constant 0.797884583 : f32
    %201 = vector.broadcast %cst_67 : f32 to vector<20x128xf32>
    %202 = arith.mulf %201, %200 : vector<20x128xf32>
    %203 = math.tanh %202 : vector<20x128xf32>
    %cst_68 = arith.constant 1.000000e+00 : f32
    %204 = vector.broadcast %cst_68 : f32 to vector<20x128xf32>
    %205 = arith.addf %204, %203 : vector<20x128xf32>
    %206 = arith.mulf %195, %205 : vector<20x128xf32>
    %207 = arith.truncf %206 : vector<20x128xf32> to vector<20x128xbf16>
    %cst_69 = arith.constant dense<0.000000e+00> : vector<20x128xf32>
    %208 = tpu.matmul %207, %67, %cst_69 {dimension_numbers = #tpu.dot_dimension_numbers<[1], [0], [0], [1], [0, 0, 1, 1], [], []>} : vector<20x128xbf16>, vector<128x128xbf16>, vector<20x128xf32> -> vector<20x128xf32>
    %209 = vector.broadcast %74 : vector<1x128xf32> to vector<20x128xf32>
    %210 = arith.addf %208, %209 : vector<20x128xf32>
    %211 = arith.extf %190 : vector<20x128xbf16> to vector<20x128xf32>
    %212 = arith.addf %211, %210 : vector<20x128xf32>
    %cst_70 = arith.constant dense<0.000000e+00> : vector<20xf32>
    %213 = vector.multi_reduction <add>, %212, %cst_70 [1] : vector<20x128xf32> to vector<20xf32>
    %214 = vector.shape_cast %213 : vector<20xf32> to vector<20x1xf32>
    %cst_71 = arith.constant 3.125000e-02 : f32
    %215 = vector.broadcast %cst_71 : f32 to vector<20x1xf32>
    %216 = arith.mulf %214, %215 : vector<20x1xf32>
    %217 = vector.broadcast %216 : vector<20x1xf32> to vector<20x128xf32>
    %218 = arith.subf %212, %217 : vector<20x128xf32>
    %219 = vector.broadcast %4 : vector<1x128xf32> to vector<20x128xf32>
    %220 = arith.mulf %218, %219 : vector<20x128xf32>
    %221 = arith.mulf %220, %220 : vector<20x128xf32>
    %cst_72 = arith.constant dense<0.000000e+00> : vector<20xf32>
    %222 = vector.multi_reduction <add>, %221, %cst_72 [1] : vector<20x128xf32> to vector<20xf32>
    %223 = vector.shape_cast %222 : vector<20xf32> to vector<20x1xf32>
    %cst_73 = arith.constant 3.125000e-02 : f32
    %224 = vector.broadcast %cst_73 : f32 to vector<20x1xf32>
    %225 = arith.mulf %223, %224 : vector<20x1xf32>
    %cst_74 = arith.constant 9.99999996E-13 : f32
    %226 = vector.broadcast %cst_74 : f32 to vector<20x1xf32>
    %227 = arith.addf %225, %226 : vector<20x1xf32>
    %228 = math.rsqrt %227 : vector<20x1xf32>
    %229 = vector.broadcast %228 : vector<20x1xf32> to vector<20x128xf32>
    %230 = arith.mulf %220, %229 : vector<20x128xf32>
    %231 = vector.broadcast %75 : vector<1x128xf32> to vector<20x128xf32>
    %232 = arith.mulf %230, %231 : vector<20x128xf32>
    %233 = vector.broadcast %76 : vector<1x128xf32> to vector<20x128xf32>
    %234 = arith.addf %232, %233 : vector<20x128xf32>
    %235 = arith.truncf %234 : vector<20x128xf32> to vector<20x128xbf16>
    %c1_75 = arith.constant 1 : index
    %c0_76 = arith.constant 0 : index
    %c0_77 = arith.constant 0 : index
    %236 = vector.load %arg6[%c1_75, %c0_76, %c0_77] : memref<2x128x128xbf16, #tpu.memory_space<vmem>>, vector<1x128x128xbf16>
    %237 = vector.shape_cast %236 : vector<1x128x128xbf16> to vector<128x128xbf16>
    %c1_78 = arith.constant 1 : index
    %c0_79 = arith.constant 0 : index
    %c0_80 = arith.constant 0 : index
    %238 = vector.load %arg7[%c1_78, %c0_79, %c0_80] : memref<2x1x128xf32, #tpu.memory_space<vmem>>, vector<1x1x128xf32>
    %239 = vector.shape_cast %238 : vector<1x1x128xf32> to vector<1x128xf32>
    %c1_81 = arith.constant 1 : index
    %c0_82 = arith.constant 0 : index
    %c0_83 = arith.constant 0 : index
    %240 = vector.load %arg8[%c1_81, %c0_82, %c0_83] : memref<2x32x128xbf16, #tpu.memory_space<vmem>>, vector<1x32x128xbf16>
    %241 = vector.shape_cast %240 : vector<1x32x128xbf16> to vector<32x128xbf16>
    %c1_84 = arith.constant 1 : index
    %c0_85 = arith.constant 0 : index
    %c0_86 = arith.constant 0 : index
    %242 = vector.load %arg9[%c1_84, %c0_85, %c0_86] : memref<2x128x128xbf16, #tpu.memory_space<vmem>>, vector<1x128x128xbf16>
    %243 = vector.shape_cast %242 : vector<1x128x128xbf16> to vector<128x128xbf16>
    %c1_87 = arith.constant 1 : index
    %c0_88 = arith.constant 0 : index
    %c0_89 = arith.constant 0 : index
    %244 = vector.load %arg10[%c1_87, %c0_88, %c0_89] : memref<2x128x128xbf16, #tpu.memory_space<vmem>>, vector<1x128x128xbf16>
    %245 = vector.shape_cast %244 : vector<1x128x128xbf16> to vector<128x128xbf16>
    %c1_90 = arith.constant 1 : index
    %c0_91 = arith.constant 0 : index
    %c0_92 = arith.constant 0 : index
    %246 = vector.load %arg11[%c1_90, %c0_91, %c0_92] : memref<2x8x128xf32, #tpu.memory_space<vmem>>, vector<1x8x128xf32>
    %247 = vector.shape_cast %246 : vector<1x8x128xf32> to vector<8x128xf32>
    %248 = vector.extract_strided_slice %247 {offsets = [0, 0], sizes = [1, 128], strides = [1, 1]} : vector<8x128xf32> to vector<1x128xf32>
    %249 = vector.extract_strided_slice %247 {offsets = [1, 0], sizes = [1, 128], strides = [1, 1]} : vector<8x128xf32> to vector<1x128xf32>
    %250 = vector.extract_strided_slice %247 {offsets = [2, 0], sizes = [1, 128], strides = [1, 1]} : vector<8x128xf32> to vector<1x128xf32>
    %251 = vector.extract_strided_slice %247 {offsets = [3, 0], sizes = [1, 128], strides = [1, 1]} : vector<8x128xf32> to vector<1x128xf32>
    %252 = vector.extract_strided_slice %247 {offsets = [4, 0], sizes = [1, 128], strides = [1, 1]} : vector<8x128xf32> to vector<1x128xf32>
    %253 = vector.extract_strided_slice %247 {offsets = [5, 0], sizes = [1, 128], strides = [1, 1]} : vector<8x128xf32> to vector<1x128xf32>
    %254 = vector.extract_strided_slice %247 {offsets = [6, 0], sizes = [1, 128], strides = [1, 1]} : vector<8x128xf32> to vector<1x128xf32>
    %cst_93 = arith.constant dense<0.000000e+00> : vector<20x128xf32>
    %255 = tpu.matmul %235, %237, %cst_93 {dimension_numbers = #tpu.dot_dimension_numbers<[1], [0], [0], [1], [0, 0, 1, 1], [], []>} : vector<20x128xbf16>, vector<128x128xbf16>, vector<20x128xf32> -> vector<20x128xf32>
    %256 = vector.broadcast %239 : vector<1x128xf32> to vector<20x128xf32>
    %257 = arith.addf %255, %256 : vector<20x128xf32>
    %258 = arith.truncf %257 : vector<20x128xf32> to vector<20x128xbf16>
    %259 = vector.extract_strided_slice %258 {offsets = [0, 0], sizes = [10, 16], strides = [1, 1]} : vector<20x128xbf16> to vector<10x16xbf16>
    %260 = vector.extract_strided_slice %258 {offsets = [0, 32], sizes = [10, 16], strides = [1, 1]} : vector<20x128xbf16> to vector<10x16xbf16>
    %261 = vector.extract_strided_slice %258 {offsets = [0, 64], sizes = [10, 16], strides = [1, 1]} : vector<20x128xbf16> to vector<10x16xbf16>
    %cst_94 = arith.constant dense<0.000000e+00> : vector<10x10xf32>
    %262 = tpu.matmul %259, %260, %cst_94 {dimension_numbers = #tpu.dot_dimension_numbers<[1], [1], [0], [0], [0, 0, 1, 0], [], []>} : vector<10x16xbf16>, vector<10x16xbf16>, vector<10x10xf32> -> vector<10x10xf32>
    %263 = arith.addf %262, %49 : vector<10x10xf32>
    %cst_95 = arith.constant dense<0xFF800000> : vector<10xf32>
    %264 = vector.multi_reduction <maximumf>, %263, %cst_95 [1] : vector<10x10xf32> to vector<10xf32>
    %265 = vector.shape_cast %264 : vector<10xf32> to vector<10x1xf32>
    %266 = vector.broadcast %265 : vector<10x1xf32> to vector<10x10xf32>
    %267 = arith.subf %263, %266 : vector<10x10xf32>
    %268 = math.exp %267 : vector<10x10xf32>
    %cst_96 = arith.constant dense<0.000000e+00> : vector<10xf32>
    %269 = vector.multi_reduction <add>, %268, %cst_96 [1] : vector<10x10xf32> to vector<10xf32>
    %270 = vector.shape_cast %269 : vector<10xf32> to vector<10x1xf32>
    %271 = tpu.reciprocal %270 {approx = true} : vector<10x1xf32> -> vector<10x1xf32>
    %272 = vector.broadcast %271 : vector<10x1xf32> to vector<10x10xf32>
    %273 = arith.mulf %268, %272 : vector<10x10xf32>
    %274 = arith.truncf %273 : vector<10x10xf32> to vector<10x10xbf16>
    %cst_97 = arith.constant dense<0.000000e+00> : vector<10x16xf32>
    %275 = tpu.matmul %274, %261, %cst_97 {dimension_numbers = #tpu.dot_dimension_numbers<[1], [0], [0], [1], [0, 0, 1, 1], [], []>} : vector<10x10xbf16>, vector<10x16xbf16>, vector<10x16xf32> -> vector<10x16xf32>
    %276 = arith.truncf %275 : vector<10x16xf32> to vector<10x16xbf16>
    %277 = vector.extract_strided_slice %241 {offsets = [0, 0], sizes = [16, 128], strides = [1, 1]} : vector<32x128xbf16> to vector<16x128xbf16>
    %cst_98 = arith.constant dense<0.000000e+00> : vector<10x128xf32>
    %278 = tpu.matmul %276, %277, %cst_98 {dimension_numbers = #tpu.dot_dimension_numbers<[1], [0], [0], [1], [0, 0, 1, 1], [], []>} : vector<10x16xbf16>, vector<16x128xbf16>, vector<10x128xf32> -> vector<10x128xf32>
    %279 = vector.extract_strided_slice %258 {offsets = [0, 16], sizes = [10, 16], strides = [1, 1]} : vector<20x128xbf16> to vector<10x16xbf16>
    %280 = vector.extract_strided_slice %258 {offsets = [0, 48], sizes = [10, 16], strides = [1, 1]} : vector<20x128xbf16> to vector<10x16xbf16>
    %281 = vector.extract_strided_slice %258 {offsets = [0, 80], sizes = [10, 16], strides = [1, 1]} : vector<20x128xbf16> to vector<10x16xbf16>
    %cst_99 = arith.constant dense<0.000000e+00> : vector<10x10xf32>
    %282 = tpu.matmul %279, %280, %cst_99 {dimension_numbers = #tpu.dot_dimension_numbers<[1], [1], [0], [0], [0, 0, 1, 0], [], []>} : vector<10x16xbf16>, vector<10x16xbf16>, vector<10x10xf32> -> vector<10x10xf32>
    %283 = arith.addf %282, %49 : vector<10x10xf32>
    %cst_100 = arith.constant dense<0xFF800000> : vector<10xf32>
    %284 = vector.multi_reduction <maximumf>, %283, %cst_100 [1] : vector<10x10xf32> to vector<10xf32>
    %285 = vector.shape_cast %284 : vector<10xf32> to vector<10x1xf32>
    %286 = vector.broadcast %285 : vector<10x1xf32> to vector<10x10xf32>
    %287 = arith.subf %283, %286 : vector<10x10xf32>
    %288 = math.exp %287 : vector<10x10xf32>
    %cst_101 = arith.constant dense<0.000000e+00> : vector<10xf32>
    %289 = vector.multi_reduction <add>, %288, %cst_101 [1] : vector<10x10xf32> to vector<10xf32>
    %290 = vector.shape_cast %289 : vector<10xf32> to vector<10x1xf32>
    %291 = tpu.reciprocal %290 {approx = true} : vector<10x1xf32> -> vector<10x1xf32>
    %292 = vector.broadcast %291 : vector<10x1xf32> to vector<10x10xf32>
    %293 = arith.mulf %288, %292 : vector<10x10xf32>
    %294 = arith.truncf %293 : vector<10x10xf32> to vector<10x10xbf16>
    %cst_102 = arith.constant dense<0.000000e+00> : vector<10x16xf32>
    %295 = tpu.matmul %294, %281, %cst_102 {dimension_numbers = #tpu.dot_dimension_numbers<[1], [0], [0], [1], [0, 0, 1, 1], [], []>} : vector<10x10xbf16>, vector<10x16xbf16>, vector<10x16xf32> -> vector<10x16xf32>
    %296 = arith.truncf %295 : vector<10x16xf32> to vector<10x16xbf16>
    %297 = vector.extract_strided_slice %241 {offsets = [16, 0], sizes = [16, 128], strides = [1, 1]} : vector<32x128xbf16> to vector<16x128xbf16>
    %cst_103 = arith.constant dense<0.000000e+00> : vector<10x128xf32>
    %298 = tpu.matmul %296, %297, %cst_103 {dimension_numbers = #tpu.dot_dimension_numbers<[1], [0], [0], [1], [0, 0, 1, 1], [], []>} : vector<10x16xbf16>, vector<16x128xbf16>, vector<10x128xf32> -> vector<10x128xf32>
    %299 = arith.addf %278, %298 : vector<10x128xf32>
    %300 = vector.extract_strided_slice %258 {offsets = [10, 0], sizes = [10, 16], strides = [1, 1]} : vector<20x128xbf16> to vector<10x16xbf16>
    %301 = vector.extract_strided_slice %258 {offsets = [10, 32], sizes = [10, 16], strides = [1, 1]} : vector<20x128xbf16> to vector<10x16xbf16>
    %302 = vector.extract_strided_slice %258 {offsets = [10, 64], sizes = [10, 16], strides = [1, 1]} : vector<20x128xbf16> to vector<10x16xbf16>
    %cst_104 = arith.constant dense<0.000000e+00> : vector<10x10xf32>
    %303 = tpu.matmul %300, %301, %cst_104 {dimension_numbers = #tpu.dot_dimension_numbers<[1], [1], [0], [0], [0, 0, 1, 0], [], []>} : vector<10x16xbf16>, vector<10x16xbf16>, vector<10x10xf32> -> vector<10x10xf32>
    %304 = arith.addf %303, %57 : vector<10x10xf32>
    %cst_105 = arith.constant dense<0xFF800000> : vector<10xf32>
    %305 = vector.multi_reduction <maximumf>, %304, %cst_105 [1] : vector<10x10xf32> to vector<10xf32>
    %306 = vector.shape_cast %305 : vector<10xf32> to vector<10x1xf32>
    %307 = vector.broadcast %306 : vector<10x1xf32> to vector<10x10xf32>
    %308 = arith.subf %304, %307 : vector<10x10xf32>
    %309 = math.exp %308 : vector<10x10xf32>
    %cst_106 = arith.constant dense<0.000000e+00> : vector<10xf32>
    %310 = vector.multi_reduction <add>, %309, %cst_106 [1] : vector<10x10xf32> to vector<10xf32>
    %311 = vector.shape_cast %310 : vector<10xf32> to vector<10x1xf32>
    %312 = tpu.reciprocal %311 {approx = true} : vector<10x1xf32> -> vector<10x1xf32>
    %313 = vector.broadcast %312 : vector<10x1xf32> to vector<10x10xf32>
    %314 = arith.mulf %309, %313 : vector<10x10xf32>
    %315 = arith.truncf %314 : vector<10x10xf32> to vector<10x10xbf16>
    %cst_107 = arith.constant dense<0.000000e+00> : vector<10x16xf32>
    %316 = tpu.matmul %315, %302, %cst_107 {dimension_numbers = #tpu.dot_dimension_numbers<[1], [0], [0], [1], [0, 0, 1, 1], [], []>} : vector<10x10xbf16>, vector<10x16xbf16>, vector<10x16xf32> -> vector<10x16xf32>
    %317 = arith.truncf %316 : vector<10x16xf32> to vector<10x16xbf16>
    %318 = vector.extract_strided_slice %241 {offsets = [0, 0], sizes = [16, 128], strides = [1, 1]} : vector<32x128xbf16> to vector<16x128xbf16>
    %cst_108 = arith.constant dense<0.000000e+00> : vector<10x128xf32>
    %319 = tpu.matmul %317, %318, %cst_108 {dimension_numbers = #tpu.dot_dimension_numbers<[1], [0], [0], [1], [0, 0, 1, 1], [], []>} : vector<10x16xbf16>, vector<16x128xbf16>, vector<10x128xf32> -> vector<10x128xf32>
    %320 = vector.extract_strided_slice %258 {offsets = [10, 16], sizes = [10, 16], strides = [1, 1]} : vector<20x128xbf16> to vector<10x16xbf16>
    %321 = vector.extract_strided_slice %258 {offsets = [10, 48], sizes = [10, 16], strides = [1, 1]} : vector<20x128xbf16> to vector<10x16xbf16>
    %322 = vector.extract_strided_slice %258 {offsets = [10, 80], sizes = [10, 16], strides = [1, 1]} : vector<20x128xbf16> to vector<10x16xbf16>
    %cst_109 = arith.constant dense<0.000000e+00> : vector<10x10xf32>
    %323 = tpu.matmul %320, %321, %cst_109 {dimension_numbers = #tpu.dot_dimension_numbers<[1], [1], [0], [0], [0, 0, 1, 0], [], []>} : vector<10x16xbf16>, vector<10x16xbf16>, vector<10x10xf32> -> vector<10x10xf32>
    %324 = arith.addf %323, %57 : vector<10x10xf32>
    %cst_110 = arith.constant dense<0xFF800000> : vector<10xf32>
    %325 = vector.multi_reduction <maximumf>, %324, %cst_110 [1] : vector<10x10xf32> to vector<10xf32>
    %326 = vector.shape_cast %325 : vector<10xf32> to vector<10x1xf32>
    %327 = vector.broadcast %326 : vector<10x1xf32> to vector<10x10xf32>
    %328 = arith.subf %324, %327 : vector<10x10xf32>
    %329 = math.exp %328 : vector<10x10xf32>
    %cst_111 = arith.constant dense<0.000000e+00> : vector<10xf32>
    %330 = vector.multi_reduction <add>, %329, %cst_111 [1] : vector<10x10xf32> to vector<10xf32>
    %331 = vector.shape_cast %330 : vector<10xf32> to vector<10x1xf32>
    %332 = tpu.reciprocal %331 {approx = true} : vector<10x1xf32> -> vector<10x1xf32>
    %333 = vector.broadcast %332 : vector<10x1xf32> to vector<10x10xf32>
    %334 = arith.mulf %329, %333 : vector<10x10xf32>
    %335 = arith.truncf %334 : vector<10x10xf32> to vector<10x10xbf16>
    %cst_112 = arith.constant dense<0.000000e+00> : vector<10x16xf32>
    %336 = tpu.matmul %335, %322, %cst_112 {dimension_numbers = #tpu.dot_dimension_numbers<[1], [0], [0], [1], [0, 0, 1, 1], [], []>} : vector<10x10xbf16>, vector<10x16xbf16>, vector<10x16xf32> -> vector<10x16xf32>
    %337 = arith.truncf %336 : vector<10x16xf32> to vector<10x16xbf16>
    %338 = vector.extract_strided_slice %241 {offsets = [16, 0], sizes = [16, 128], strides = [1, 1]} : vector<32x128xbf16> to vector<16x128xbf16>
    %cst_113 = arith.constant dense<0.000000e+00> : vector<10x128xf32>
    %339 = tpu.matmul %337, %338, %cst_113 {dimension_numbers = #tpu.dot_dimension_numbers<[1], [0], [0], [1], [0, 0, 1, 1], [], []>} : vector<10x16xbf16>, vector<16x128xbf16>, vector<10x128xf32> -> vector<10x128xf32>
    %340 = arith.addf %319, %339 : vector<10x128xf32>
    %341 = tpu.concatenate %299, %340 in 0 : vector<10x128xf32>, vector<10x128xf32> -> vector<20x128xf32>
    %342 = vector.broadcast %248 : vector<1x128xf32> to vector<20x128xf32>
    %343 = arith.addf %341, %342 : vector<20x128xf32>
    %344 = arith.extf %235 : vector<20x128xbf16> to vector<20x128xf32>
    %345 = arith.addf %344, %343 : vector<20x128xf32>
    %cst_114 = arith.constant dense<0.000000e+00> : vector<20xf32>
    %346 = vector.multi_reduction <add>, %345, %cst_114 [1] : vector<20x128xf32> to vector<20xf32>
    %347 = vector.shape_cast %346 : vector<20xf32> to vector<20x1xf32>
    %cst_115 = arith.constant 3.125000e-02 : f32
    %348 = vector.broadcast %cst_115 : f32 to vector<20x1xf32>
    %349 = arith.mulf %347, %348 : vector<20x1xf32>
    %350 = vector.broadcast %349 : vector<20x1xf32> to vector<20x128xf32>
    %351 = arith.subf %345, %350 : vector<20x128xf32>
    %352 = vector.broadcast %4 : vector<1x128xf32> to vector<20x128xf32>
    %353 = arith.mulf %351, %352 : vector<20x128xf32>
    %354 = arith.mulf %353, %353 : vector<20x128xf32>
    %cst_116 = arith.constant dense<0.000000e+00> : vector<20xf32>
    %355 = vector.multi_reduction <add>, %354, %cst_116 [1] : vector<20x128xf32> to vector<20xf32>
    %356 = vector.shape_cast %355 : vector<20xf32> to vector<20x1xf32>
    %cst_117 = arith.constant 3.125000e-02 : f32
    %357 = vector.broadcast %cst_117 : f32 to vector<20x1xf32>
    %358 = arith.mulf %356, %357 : vector<20x1xf32>
    %cst_118 = arith.constant 9.99999996E-13 : f32
    %359 = vector.broadcast %cst_118 : f32 to vector<20x1xf32>
    %360 = arith.addf %358, %359 : vector<20x1xf32>
    %361 = math.rsqrt %360 : vector<20x1xf32>
    %362 = vector.broadcast %361 : vector<20x1xf32> to vector<20x128xf32>
    %363 = arith.mulf %353, %362 : vector<20x128xf32>
    %364 = vector.broadcast %249 : vector<1x128xf32> to vector<20x128xf32>
    %365 = arith.mulf %363, %364 : vector<20x128xf32>
    %366 = vector.broadcast %250 : vector<1x128xf32> to vector<20x128xf32>
    %367 = arith.addf %365, %366 : vector<20x128xf32>
    %368 = arith.truncf %367 : vector<20x128xf32> to vector<20x128xbf16>
    %cst_119 = arith.constant dense<0.000000e+00> : vector<20x128xf32>
    %369 = tpu.matmul %368, %243, %cst_119 {dimension_numbers = #tpu.dot_dimension_numbers<[1], [0], [0], [1], [0, 0, 1, 1], [], []>} : vector<20x128xbf16>, vector<128x128xbf16>, vector<20x128xf32> -> vector<20x128xf32>
    %370 = vector.broadcast %251 : vector<1x128xf32> to vector<20x128xf32>
    %371 = arith.addf %369, %370 : vector<20x128xf32>
    %cst_120 = arith.constant 5.000000e-01 : f32
    %372 = vector.broadcast %cst_120 : f32 to vector<20x128xf32>
    %373 = arith.mulf %372, %371 : vector<20x128xf32>
    %cst_121 = arith.constant 4.471500e-02 : f32
    %374 = vector.broadcast %cst_121 : f32 to vector<20x128xf32>
    %375 = arith.mulf %374, %371 : vector<20x128xf32>
    %376 = arith.mulf %375, %371 : vector<20x128xf32>
    %377 = arith.mulf %376, %371 : vector<20x128xf32>
    %378 = arith.addf %371, %377 : vector<20x128xf32>
    %cst_122 = arith.constant 0.797884583 : f32
    %379 = vector.broadcast %cst_122 : f32 to vector<20x128xf32>
    %380 = arith.mulf %379, %378 : vector<20x128xf32>
    %381 = math.tanh %380 : vector<20x128xf32>
    %cst_123 = arith.constant 1.000000e+00 : f32
    %382 = vector.broadcast %cst_123 : f32 to vector<20x128xf32>
    %383 = arith.addf %382, %381 : vector<20x128xf32>
    %384 = arith.mulf %373, %383 : vector<20x128xf32>
    %385 = arith.truncf %384 : vector<20x128xf32> to vector<20x128xbf16>
    %cst_124 = arith.constant dense<0.000000e+00> : vector<20x128xf32>
    %386 = tpu.matmul %385, %245, %cst_124 {dimension_numbers = #tpu.dot_dimension_numbers<[1], [0], [0], [1], [0, 0, 1, 1], [], []>} : vector<20x128xbf16>, vector<128x128xbf16>, vector<20x128xf32> -> vector<20x128xf32>
    %387 = vector.broadcast %252 : vector<1x128xf32> to vector<20x128xf32>
    %388 = arith.addf %386, %387 : vector<20x128xf32>
    %389 = arith.extf %368 : vector<20x128xbf16> to vector<20x128xf32>
    %390 = arith.addf %389, %388 : vector<20x128xf32>
    %cst_125 = arith.constant dense<0.000000e+00> : vector<20xf32>
    %391 = vector.multi_reduction <add>, %390, %cst_125 [1] : vector<20x128xf32> to vector<20xf32>
    %392 = vector.shape_cast %391 : vector<20xf32> to vector<20x1xf32>
    %cst_126 = arith.constant 3.125000e-02 : f32
    %393 = vector.broadcast %cst_126 : f32 to vector<20x1xf32>
    %394 = arith.mulf %392, %393 : vector<20x1xf32>
    %395 = vector.broadcast %394 : vector<20x1xf32> to vector<20x128xf32>
    %396 = arith.subf %390, %395 : vector<20x128xf32>
    %397 = vector.broadcast %4 : vector<1x128xf32> to vector<20x128xf32>
    %398 = arith.mulf %396, %397 : vector<20x128xf32>
    %399 = arith.mulf %398, %398 : vector<20x128xf32>
    %cst_127 = arith.constant dense<0.000000e+00> : vector<20xf32>
    %400 = vector.multi_reduction <add>, %399, %cst_127 [1] : vector<20x128xf32> to vector<20xf32>
    %401 = vector.shape_cast %400 : vector<20xf32> to vector<20x1xf32>
    %cst_128 = arith.constant 3.125000e-02 : f32
    %402 = vector.broadcast %cst_128 : f32 to vector<20x1xf32>
    %403 = arith.mulf %401, %402 : vector<20x1xf32>
    %cst_129 = arith.constant 9.99999996E-13 : f32
    %404 = vector.broadcast %cst_129 : f32 to vector<20x1xf32>
    %405 = arith.addf %403, %404 : vector<20x1xf32>
    %406 = math.rsqrt %405 : vector<20x1xf32>
    %407 = vector.broadcast %406 : vector<20x1xf32> to vector<20x128xf32>
    %408 = arith.mulf %398, %407 : vector<20x128xf32>
    %409 = vector.broadcast %253 : vector<1x128xf32> to vector<20x128xf32>
    %410 = arith.mulf %408, %409 : vector<20x128xf32>
    %411 = vector.broadcast %254 : vector<1x128xf32> to vector<20x128xf32>
    %412 = arith.addf %410, %411 : vector<20x128xf32>
    %413 = tpu.iota {dimensions = array<i32: 0>} : vector<8x8xi32>
    %c0_130 = arith.constant 0 : index
    %c0_131 = arith.constant 0 : index
    %414 = vector.load %arg2[%c0_130, %c0_131] : memref<2x8xi32, #tpu.memory_space<vmem>>, vector<1x8xi32>
    %415 = vector.broadcast %414 : vector<1x8xi32> to vector<8x8xi32>
    %416 = arith.cmpi eq, %413, %415 : vector<8x8xi32>
    %417 = arith.extui %416 : vector<8x8xi1> to vector<8x8xi32>
    %418 = arith.sitofp %417 : vector<8x8xi32> to vector<8x8xf32>
    %cst_132 = arith.constant dense<0.000000e+00> : vector<8xf32>
    %419 = vector.multi_reduction <add>, %418, %cst_132 [1] : vector<8x8xf32> to vector<8xf32>
    %420 = vector.shape_cast %419 : vector<8xf32> to vector<8x1xf32>
    %421 = vector.extract_strided_slice %412 {offsets = [1, 0], sizes = [8, 128], strides = [1, 1]} : vector<20x128xf32> to vector<8x128xf32>
    %cst_133 = arith.constant dense<0.000000e+00> : vector<8x128xf32>
    %422 = tpu.matmul %418, %421, %cst_133 {dimension_numbers = #tpu.dot_dimension_numbers<[1], [0], [0], [1], [0, 0, 1, 1], [], []>} : vector<8x8xf32>, vector<8x128xf32>, vector<8x128xf32> -> vector<8x128xf32>
    %cst_134 = arith.constant 1.000000e+00 : f32
    %423 = vector.broadcast %cst_134 : f32 to vector<8x1xf32>
    %424 = arith.maximumf %420, %423 : vector<8x1xf32>
    %425 = vector.broadcast %424 : vector<8x1xf32> to vector<8x128xf32>
    %426 = arith.divf %422, %425 : vector<8x128xf32>
    %c0_135 = arith.constant 0 : index
    %c0_136 = arith.constant 0 : index
    %c0_137 = arith.constant 0 : index
    %427 = vector.load %arg12[%c0_135, %c0_136, %c0_137] : memref<2x8x128xf32, #tpu.memory_space<vmem>>, vector<1x8x128xf32>
    %428 = vector.shape_cast %427 : vector<1x8x128xf32> to vector<8x128xf32>
    %429 = vector.shape_cast %426 : vector<8x128xf32> to vector<1x8x128xf32>
    tpu.vector_store %arg12[%c0_135, %c0_136, %c0_137], %429 {strides = array<i32>} : memref<2x8x128xf32, #tpu.memory_space<vmem>>, vector<1x8x128xf32>,
    %c1_138 = arith.constant 1 : index
    %c0_139 = arith.constant 0 : index
    %430 = vector.load %arg2[%c1_138, %c0_139] : memref<2x8xi32, #tpu.memory_space<vmem>>, vector<1x8xi32>
    %431 = vector.broadcast %430 : vector<1x8xi32> to vector<8x8xi32>
    %432 = arith.cmpi eq, %413, %431 : vector<8x8xi32>
    %433 = arith.extui %432 : vector<8x8xi1> to vector<8x8xi32>
    %434 = arith.sitofp %433 : vector<8x8xi32> to vector<8x8xf32>
    %cst_140 = arith.constant dense<0.000000e+00> : vector<8xf32>
    %435 = vector.multi_reduction <add>, %434, %cst_140 [1] : vector<8x8xf32> to vector<8xf32>
    %436 = vector.shape_cast %435 : vector<8xf32> to vector<8x1xf32>
    %437 = vector.extract_strided_slice %412 {offsets = [11, 0], sizes = [8, 128], strides = [1, 1]} : vector<20x128xf32> to vector<8x128xf32>
    %cst_141 = arith.constant dense<0.000000e+00> : vector<8x128xf32>
    %438 = tpu.matmul %434, %437, %cst_141 {dimension_numbers = #tpu.dot_dimension_numbers<[1], [0], [0], [1], [0, 0, 1, 1], [], []>} : vector<8x8xf32>, vector<8x128xf32>, vector<8x128xf32> -> vector<8x128xf32>
    %cst_142 = arith.constant 1.000000e+00 : f32
    %439 = vector.broadcast %cst_142 : f32 to vector<8x1xf32>
    %440 = arith.maximumf %436, %439 : vector<8x1xf32>
    %441 = vector.broadcast %440 : vector<8x1xf32> to vector<8x128xf32>
    %442 = arith.divf %438, %441 : vector<8x128xf32>
    %c1_143 = arith.constant 1 : index
    %c0_144 = arith.constant 0 : index
    %c0_145 = arith.constant 0 : index
    %443 = vector.load %arg12[%c1_143, %c0_144, %c0_145] : memref<2x8x128xf32, #tpu.memory_space<vmem>>, vector<1x8x128xf32>
    %444 = vector.shape_cast %443 : vector<1x8x128xf32> to vector<8x128xf32>
    %445 = vector.shape_cast %442 : vector<8x128xf32> to vector<1x8x128xf32>
    tpu.vector_store %arg12[%c1_143, %c0_144, %c0_145], %445 {strides = array<i32>} : memref<2x8x128xf32, #tpu.memory_space<vmem>>, vector<1x8x128xf32>,
    return
  }
}

</mosaic_0001>

<bundles_post_ra>
// kernel: bert_like_embedder_forward.1
= control target key start
LH: loop header
LB: loop body
LE: loop exit
PB: predicated region body
PF: predicated region fallthrough
CT: control target
= control target key end

     0   :  { %17 = vsyncpa [#allocation3], 0  ;;  %s4458_s0 = inlined_call_operand.vmem [shape: s32[20,1], index: 0, kind: input, shape index: {}]   ;;  %s4459_s1 = inlined_call_operand.vmem [shape: s32[2,10], index: 1, kind: input, shape index: {}]   ;;  %s4460_s2 = inlined_call_operand.vmem [shape: s32[2,8], index: 2, kind: input, shape index: {}]   ;;  %s4461_s3 = inlined_call_operand.hbm [shape: f32[50,128], index: 3, kind: input, shape index: {}]   ;;  %s4462_s4 = inlined_call_operand.vmem [shape: f32[10,128], index: 4, kind: input, shape index: {}]   ;;  %s4463_s5 = inlined_call_operand.vmem [shape: f32[2,128], index: 5, kind: input, shape index: {}]   ;;  %s4464_s6 = inlined_call_operand.hbm [shape: bf16[2,128,128], index: 6, kind: input, shape index: {}]   ;;  %s4465_s7 = inlined_call_operand.vmem [shape: f32[2,1,128], index: 7, kind: input, shape index: {}]   ;;  %s4466_s8 = inlined_call_operand.vmem [shape: bf16[2,32,128], index: 8, kind: input, shape index: {}]   ;;  %s4467_s9 = inlined_call_operand.hbm [shape: bf16[2,128,128], index: 9, kind: input, shape index: {}]   ;;  %s4468_s10 = inlined_call_operand.hbm [shape: bf16[2,128,128], index: 10, kind: input, shape index: {}]   ;;  %s4469_s11 = inlined_call_operand.hbm [shape: f32[2,8,128], index: 11, kind: input, shape index: {}]   ;;  %s4470_s12 = inlined_call_operand.hbm [shape: f32[2,8,128], index: 12, kind: output, shape index: {}]  }
   0x1   :  { %18 = vsyncpa [#allocation6], 0 }
   0x2   :  { %19 = vsyncpa [#allocation9], 0 }
   0x3   :  { %20 = vsyncpa [#allocation4], 0  ;;  %s3807_s21 = smov [#allocation5]   ;;  %s3667_s25 = scalar_lea.hbm %s4464_s6, 2048 }
   0x4   :  { %s48_s22 = sshll.u32 %s3807_s21, 4  ;;  %p3668_p0 = scmp.ne.s32.totalorder %s4464_s6, %s3667_s25  ;;  %s49_s22 = int_to_ptr.vmem [resolvable:$true] %s48_s22 }
   0x5   :  { %p3671_p1 = scmp.lt.u32.totalorder %s3667_s25, %s4464_s6 }
   0x7   :  { %p3673_p2 = pnand %p3671_p1, %p3668_p0 }
   0x9   :  { %3676 = shalt.err (!%p3673_p2)
}
   0xa   :  { %s3677_s30 = scalar_lea.vmem %s49_s22, 2048  ;;  %p3682_p4 = scmp.lt.s32.totalorder %s49_s22, %s49_s22 }
   0xb   :  { %p3678_p3 = scmp.ne.s32.totalorder %s49_s22, %s3677_s30  ;;  %p3683_p5 = scmp.lt.s32.totalorder %s3677_s30, %s3677_s30 }
   0xd   :  { %p3684_p6 = por %p3683_p5, %p3682_p4 }
   0xf   :  { %p3685_p7 = pnand %p3684_p6, %p3678_p3 }
  0x11   :  { %3688 = shalt.err (!%p3685_p7)
}
  0x12   :  { %s3808_s13 = smov 64   ;;  %s3809_s14 = smov 4  }
  0x13   :  { %54 = dma.hbm_to_vmem [thread:$0]  %s4464_s6, 2048, %s49_s22, [#allocation6], %s3808_s13, %s3808_s13, %s3809_s14  }
  0x14   :  { %s3810_s17 = smov [#allocation8]   ;;  %s3811_s19 = smov [#allocation2]  }
  0x15   :  { %s76_s18 = sshll.u32 %s3810_s17, 4  ;;  %s32_s20 = sshll.u32 %s3811_s19, 4  ;;  %s77_s18 = int_to_ptr.vmem [resolvable:$true] %s76_s18  ;;  %s33_s20 = int_to_ptr.vmem [resolvable:$true] %s32_s20 }
  0x16   :  { %s3689_s24 = scalar_lea.hbm %s4468_s10, 2048 }
  0x17   :  { %p3690_p8 = scmp.ne.s32.totalorder %s4468_s10, %s3689_s24  ;;  %p3693_p9 = scmp.lt.u32.totalorder %s3689_s24, %s4468_s10 }
  0x19   :  { %p3695_p10 = pnand %p3693_p9, %p3690_p8 }
  0x1b   :  { %3698 = shalt.err (!%p3695_p10)
}
  0x1c   :  { %s3699_s6 = scalar_lea.vmem %s77_s18, 2048  ;;  %p3704_p12 = scmp.lt.s32.totalorder %s77_s18, %s77_s18 }
  0x1d   :  { %p3700_p11 = scmp.ne.s32.totalorder %s77_s18, %s3699_s6  ;;  %p3705_p13 = scmp.lt.s32.totalorder %s3699_s6, %s3699_s6 }
  0x1f   :  { %p3706_p0 = por %p3705_p13, %p3704_p12 }
  0x21   :  { %p3707_p1 = pnand %p3706_p0, %p3700_p11 }
  0x23   :  { %3710 = shalt.err (!%p3707_p1)
}
  0x24   :  { %82 = dma.hbm_to_vmem [thread:$0]  %s4468_s10, 2048, %s77_s18, [#allocation9], %s3808_s13, %s3808_s13, %s3809_s14  }
  0x25   :  { %s3711_s16 = scalar_lea.hbm %s4461_s3, 896 }
  0x26   :  { %p3712_p2 = scmp.ne.s32.totalorder %s4461_s3, %s3711_s16  ;;  %p3715_p3 = scmp.lt.u32.totalorder %s3711_s16, %s4461_s3 }
  0x28   :  { %p3717_p4 = pnand %p3715_p3, %p3712_p2 }
  0x2a   :  { %3720 = shalt.err (!%p3717_p4)
}
  0x2b   :  { %s3721_s24 = scalar_lea.vmem %s33_s20, 896  ;;  %p3726_p6 = scmp.lt.s32.totalorder %s33_s20, %s33_s20 }
  0x2c   :  { %p3722_p5 = scmp.ne.s32.totalorder %s33_s20, %s3721_s24  ;;  %p3727_p7 = scmp.lt.s32.totalorder %s3721_s24, %s3721_s24 }
  0x2e   :  { %p3728_p8 = por %p3727_p7, %p3726_p6 }
  0x30   :  { %p3729_p9 = pnand %p3728_p8, %p3722_p5 }
  0x32   :  { %3732 = shalt.err (!%p3729_p9)
}
  0x33   :  { %s3812_s10 = smov 128   ;;  %s3813_s18 = smov 8  }
  0x34   :  { %38 = dma.hbm_to_vmem [thread:$0]  %s4461_s3, 896, %s33_s20, [#allocation3], %s3812_s10, %s3812_s10, %s3813_s18  }
  0x35   :  { %s3814_s27 = smov [#allocation7]   ;;  %s3815_s6 = smov [#allocation10]  }
  0x36   :  { %s64_s28 = sshll.u32 %s3814_s27, 4  ;;  %s88_s22 = sshll.u32 %s3815_s6, 4  ;;  %s65_s28 = int_to_ptr.vmem [resolvable:$true] %s64_s28  ;;  %s89_s22 = int_to_ptr.vmem [resolvable:$true] %s88_s22 }
  0x37   :  { %s3733_s15 = scalar_lea.hbm %s4467_s9, 2048 }
  0x38   :  { %p3734_p10 = scmp.ne.s32.totalorder %s4467_s9, %s3733_s15  ;;  %p3737_p11 = scmp.lt.u32.totalorder %s3733_s15, %s4467_s9 }
  0x3a   :  { %p3739_p12 = pnand %p3737_p11, %p3734_p10 }
  0x3c   :  { %3742 = shalt.err (!%p3739_p12)
}
  0x3d   :  { %s3743_s3 = scalar_lea.vmem %s65_s28, 2048  ;;  %p3748_p0 = scmp.lt.s32.totalorder %s65_s28, %s65_s28 }
  0x3e   :  { %p3744_p13 = scmp.ne.s32.totalorder %s65_s28, %s3743_s3  ;;  %p3749_p1 = scmp.lt.s32.totalorder %s3743_s3, %s3743_s3 }
  0x40   :  { %p3750_p2 = por %p3749_p1, %p3748_p0 }
  0x42   :  { %p3751_p3 = pnand %p3750_p2, %p3744_p13 }
  0x44   :  { %3754 = shalt.err (!%p3751_p3)
}
  0x45   :  { %70 = dma.hbm_to_vmem [thread:$0]  %s4467_s9, 2048, %s65_s28, [#allocation6], %s3808_s13, %s3808_s13, %s3809_s14  }
  0x46   :  { %s3755_s26 = scalar_lea.hbm %s4469_s11, 256 }
  0x47   :  { %p3756_p4 = scmp.ne.s32.totalorder %s4469_s11, %s3755_s26  ;;  %p3759_p5 = scmp.lt.u32.totalorder %s3755_s26, %s4469_s11 }
  0x49   :  { %p3761_p6 = pnand %p3759_p5, %p3756_p4 }
  0x4b   :  { %3764 = shalt.err (!%p3761_p6)
}
  0x4c   :  { %s3765_s15 = scalar_lea.vmem %s89_s22, 256  ;;  %p3770_p8 = scmp.lt.s32.totalorder %s89_s22, %s89_s22 }
  0x4d   :  { %p3766_p7 = scmp.ne.s32.totalorder %s89_s22, %s3765_s15  ;;  %p3771_p9 = scmp.lt.s32.totalorder %s3765_s15, %s3765_s15 }
  0x4f   :  { %p3772_p10 = por %p3771_p9, %p3770_p8 }
  0x51   :  { %p3773_p11 = pnand %p3772_p10, %p3766_p7 }
  0x53   :  { %3776 = shalt.err (!%p3773_p11)
}
  0x54   :  { %94 = dma.hbm_to_vmem [thread:$0]  %s4469_s11, 256, %s89_s22, [#allocation9], %s3812_s10, %s3812_s10, %s3813_s18  }
  0x55   :  { %3799 = dma.done.wait [#allocation3], 896  }
  0x56   :  { %3800 = vsyncadd [#allocation3], 4294966400 }
  0x57   :  { %3801 = dma.done.wait [#allocation6], 4096  }
  0x58   :  { %3802 = vsyncadd [#allocation6], 4294963200 }
  0x59   :  { %3803 = dma.done.wait [#allocation9], 2304  }
  0x5a   :  { %3804 = vsyncadd [#allocation9], 4294964992  ;;  %v3816_v0 = vmov 0   ;;  %v3817_v1 = vmov 0.0|0.0   ;;  %v116_v2 = vld [vmem:[%s4458_s0] sm:$0xff]  ;;  %v138_v5 = vld [vmem:[#allocation2 + $0x8] sm:$0xff]  ;;  %v111_v16 = vlaneseq }
  0x5b   :  { %3503 = vset.pattern.permute.xlu0 %v3816_v0  ;;  %3504 = vset.pattern.permute.xlu1 %v3816_v0  ;;  %v118_v3 = vld [vmem:[%s4458_s0 + $0x10] sm:$0xf]  ;;  %v137_v4 = vld [vmem:[#allocation2] sm:$0xff]  ;;  %v117_v7 = vld [vmem:[%s4458_s0 + $0x8] sm:$0xff]  ;;  %vm3818_vm0 = vmmov 0   ;;  %v3819_v10 = vmov 0.0  }
  0x5c   :  { %3468 = vmatprep.subr.bf16.mxu0 %v3817_v1  ;;  %120 = vperm.xlu0 %3503, %v116_v2   ;;  %v139_v6 = vld [vmem:[#allocation2 + $0x10] sm:$0xff]  ;;  %v3469_v8 = vpack.c.bf16 %v138_v5, %v137_v4  ;;  %v140_v9 = vld [vmem:[#allocation2 + $0x18] sm:$0xff]  ;;  %v141_v11 = vld [vmem:[#allocation2 + $0x20] sm:$0xff]  ;;  %vm148_vm1 = vcmask 1041408   ;;  %v112_v17 = vand.u32 127, %v111_v16  ;;  %vm155_vm2 = vcmask 408576  }
  0x5d   :  { %126 = vperm.xlu1 %3504, %v118_v3   ;;  %3185 = vmatprep.mubr.msk.f32.mxu0 %vm3818_vm0, %v3819_v10  ;;  %v142_v12 = vld [vmem:[#allocation2 + $0x28] sm:$0xff]  ;;  %v3472_v13 = vpack.c.bf16 %v140_v9, %v139_v6  ;;  %v143_v15 = vld [vmem:[#allocation2 + $0x30] sm:$0x3]  ;;  %v144_v24 = vld [vmem:[%s4462_s4] sm:$0xff]  ;;  %vm254_vm6 = vcmask 1043456   ;;  %s3820_s27 = smov 80  }
  0x5e   :  { %3470 = vmatpush3.bf16.msra.mxu0 %v3469_v8  ;;  %v3475_v14 = vpack.c.bf16 %v142_v12, %v141_v11  ;;  %v149_v25 = vrot.slane %v144_v24, 6  ;;  %v145_v26 = vld [vmem:[%s4462_s4 + $0x8] sm:$0x3]  ;;  %vm113_vm7 = vcmp.lt.s32.totalorder %v112_v17, 32  ;;  %v3505_v57 = vld [vmem:[#allocation5] sm:$0xff]   ;;  %v3506_v58 = vld [vmem:[#allocation5 + $0x8] sm:$0xff]  }
  0x5f   :  { %3471 = vmatprep.subr.bf16.mxu0 %v3817_v1  ;;  %v150_v30 = vrot.slane %v145_v26, 6  ;;  %v3999_v42 = vsel %vm113_vm7, 1.0, %v3819_v10  ;;  %3194 = vmatprep.subr.bf16.mxu1 %v3505_v57  ;;  %v3507_v59 = vld [vmem:[#allocation5 + $0x10] sm:$0xff]   ;;  %v3508_v60 = vld [vmem:[#allocation5 + $0x18] sm:$0xff]   ;;  %v3509_v61 = vld [vmem:[#allocation5 + $0x20] sm:$0xff]   ;;  %s3821_s6 = smov 96  }
  0x60   :  { %123 = vperm.xlu0 %3503, %v117_v7   ;;  %v154_v31 = vsel %vm148_vm1, %v145_v26, %v149_v25  ;;  %3195 = vmatpush3.bf16.msra.mxu1 %v3505_v57  ;;  %v3510_v62 = vld [vmem:[#allocation5 + $0x28] sm:$0xff]   ;;  %v3511_v63 = vld [vmem:[#allocation5 + $0x30] sm:$0xff]   ;;  %v3512_v0 = vld [vmem:[#allocation5 + $0x38] sm:$0xff]   ;;  %s3822_s29 = smov 112   ;;  %vm477_vm8 = vcmask 130048   ;;  %vm525_vm10 = vcmask 80896  }
  0x61   :  { %v151_v35 = vsel %vm148_vm1, %v149_v25, %v150_v30  ;;  %3196 = vmatprep.subr.bf16.mxu1 %v3506_v58  ;;  %vm529_vm11 = vcmask 74752   ;;  %vm826_vm12 = vcmask 1042432   ;;  %vm555_vm13 = vcmask 1044480  }
  0x62   :  { %3473 = vmatpush3.bf16.msra.mxu0 %v3472_v13  ;;  %v2958_v13 = vld [vmem:[%s4463_s5] ss:$0 sm:$0xff]  ;;  %vm2749_vm15 = vcmask 64512  }
  0x63   :  { %3474 = vmatprep.subr.bf16.mxu0 %v3817_v1 }
  0x64   :  { %3197 = vmatpush3.bf16.msra.mxu1 %v3506_v58 }
  0x65   :  { %3198 = vmatprep.subr.bf16.mxu1 %v3507_v59 }
  0x66   :  { %3476 = vmatpush3.bf16.msra.mxu0 %v3475_v14 }
  0x67   :  { %3183 = vmatprep.subr.mxu0 %v3819_v10 }
  0x68   :  { %3199 = vmatpush3.bf16.msra.mxu1 %v3507_v59 }
  0x69   :  { %3200 = vmatprep.subr.bf16.mxu1 %v3508_v60 }
  0x6a   :  { %3184 = vmatpush3.msk.msra.mxu0 %vm148_vm1, %v143_v15 }
  0x6b   :  { %3214 = vmatprep.subr.bf16.mxu0 %v3819_v10 }
  0x6c   :  { %3201 = vmatpush3.bf16.msra.mxu1 %v3508_v60 }
  0x6d   :  { %3202 = vmatprep.subr.bf16.mxu1 %v3509_v61 }
  0x70   :  { %3203 = vmatpush3.bf16.msra.mxu1 %v3509_v61 }
  0x71   :  { %3204 = vmatprep.subr.bf16.mxu1 %v3510_v62 }
  0x74   :  { %3205 = vmatpush3.bf16.msra.mxu1 %v3510_v62 }
  0x75   :  { %3206 = vmatprep.subr.bf16.mxu1 %v3511_v63 }
  0x78   :  { %3207 = vmatpush3.bf16.msra.mxu1 %v3511_v63 }
  0x79   :  { %3208 = vmatprep.subr.bf16.mxu1 %v3512_v0 }
  0x7c   :  { %3209 = vmatpush3.bf16.msra.mxu1 %v3512_v0 }
  0x7d   :  { %3226 = vmatprep.subr.bf16.mxu1 %v3819_v10 }
  0xdb   :  { %v121_v18 = vpop.permute.xlu0 %120 }
  0xdc   :  { %vm128_vm3 = vcmp.eq.s32.totalorder %v112_v17, %v121_v18  ;;  %v127_v20 = vpop.permute.xlu1 %126  ;;  %v2959_v18 = vld [vmem:[%s4463_s5 + $0x1] ss:$0 sm:$0xff] }
  0xdd   :  { %v2951_v19 = vsel %vm128_vm3, 1.0, %v3819_v10  ;;  %vm130_vm5 = vcmp.eq.s32.totalorder %v112_v17, %v127_v20 }
  0xde   :  { %3186 = vmatmul.mubr.msk.f32.vlgmr.msra.gmra.mrb[0].mxu0 %vm155_vm2, %v2951_v19  ;;  %v2953_v23 = vsel %vm130_vm5, 1.0, %v3819_v10 }
  0xdf   :  { %v124_v21 = vpop.permute.xlu0 %123  ;;  %3188 = vmatprep.mubr.msk.f32.mxu0 %vm3818_vm0, %v3819_v10 }
  0xe0   :  { %vm129_vm4 = vcmp.eq.s32.totalorder %v112_v17, %v124_v21 }
  0xe1   :  { %v2952_v22 = vsel %vm129_vm4, 1.0, %v3819_v10 }
  0xe2   :  { %3189 = vmatmul.mubr.msk.f32.gmra.mrb[2].mxu0 %vm155_vm2, %v2952_v22 }
  0xe3   :  { %3191 = vmatprep.mubr.msk.f32.mxu0 %vm3818_vm0, %v3819_v10 }
  0xe6   :  { %3192 = vmatmul.mubr.msk.f32.gmra.mrb[4].mxu0 %vm155_vm2, %v2953_v23  ;;  %vm2755_vm2 = vcmask 1046528  }
  0xe7   :  { %3216 = vmatprep.mubr.msk.bf16.mxu0 %vm3818_vm0, %v3819_v10 }
 0x1b1   :  { %v234_v27 = vpop.f32.mrb[0].mxu0 }
 0x1b2   :  { %v235_v28 = vadd.f32 %v234_v27, %v144_v24  ;;  %v3187_v29 = vpop.f32.mrb[1].mxu0 }
 0x1b4   :  { %250 = vadd.xlane.f32.xlu1 %v235_v28 }
 0x1b5   :  { %v239_v32 = vpop.f32.mrb[2].mxu0 }
 0x1b6   :  { %v240_v33 = vadd.f32 %v239_v32, %v154_v31  ;;  %v3190_v34 = vpop.f32.mrb[3].mxu0 }
 0x1b8   :  { %252 = vadd.xlane.f32.xlu0 %v240_v33 }
 0x1b9   :  { %v244_v36 = vpop.f32.mrb[4].mxu0 }
 0x1ba   :  { %v245_v37 = vadd.f32 %v244_v36, %v151_v35  ;;  %v3193_v38 = vpop.f32.mrb[5].mxu0 }
 0x1bc   :  { %v255_v39 = vsel %vm254_vm6, %v245_v37, 0.0 }
 0x1bd   :  { %256 = vadd.xlane.f32.xlu0 %v255_v39 }
 0x241   :  { %v251_v40 = vpop.xlane.xlu1 %250 }
 0x242   :  { %v258_v41 = vmul.f32 0.03125, %v251_v40 }
 0x244   :  { %v261_v43 = vsub.f32 %v235_v28, %v258_v41  ;;  %v2960_v28 = vld [vmem:[%s4465_s7] ss:$0 sm:$0xff] }
 0x245   :  { %v253_v44 = vpop.xlane.xlu0 %252 }
 0x246   :  { %v259_v45 = vmul.f32 0.03125, %v253_v44  ;;  %v264_v46 = vmul.f32 %v3999_v42, %v261_v43  ;;  %v305_v43 = vld [vmem:[%s4459_s1] sm:$0x3]  ;;  %v4048_v44 = vshrl.u32 %v111_v16, 7  ;;  %s3823_s1 = smov 48  }
 0x247   :  { %vm306_vm9 = vcmp.ne.s32.totalorder %v305_v43, 0 }
 0x248   :  { %v262_v47 = vsub.f32 %v240_v33, %v259_v45  ;;  %v267_v48 = vmul.f32 %v264_v46, %v264_v46  ;;  %v4051_v45 = vsub.s32 0, %v4048_v44 }
 0x24a   :  { %270 = vadd.xlane.f32.xlu1 %v267_v48  ;;  %v257_v49 = vpop.xlane.xlu0 %256  ;;  %v265_v50 = vmul.f32 %v3999_v42, %v262_v47 }
 0x24b   :  { %v260_v51 = vmul.f32 0.03125, %v257_v49 }
 0x24c   :  { %v268_v52 = vmul.f32 %v265_v50, %v265_v50 }
 0x24d   :  { %v263_v53 = vsub.f32 %v245_v37, %v260_v51 }
 0x24e   :  { %272 = vadd.xlane.f32.xlu0 %v268_v52 }
 0x24f   :  { %v266_v54 = vmul.f32 %v3999_v42, %v263_v53 }
 0x251   :  { %v269_v55 = vmul.f32 %v266_v54, %v266_v54 }
 0x253   :  { %v274_v56 = vsel %vm254_vm6, %v269_v55, 0.0 }
 0x254   :  { %275 = vadd.xlane.f32.xlu1 %v274_v56 }
 0x2d7   :  { %v271_v1 = vpop.xlane.xlu1 %270 }
 0x2d8   :  { %v277_v2 = vmul.f32 0.03125, %v271_v1 }
 0x2da   :  { %v280_v3 = vadd.f32 1e-12, %v277_v2 }
 0x2db   :  { %v273_v4 = vpop.xlane.xlu0 %272 }
 0x2dc   :  { %3557 = vrsqrt.f32 %v280_v3  ;;  %v278_v5 = vmul.f32 0.03125, %v273_v4 }
 0x2de   :  { %v281_v6 = vadd.f32 1e-12, %v278_v5 }
 0x2e0   :  { %3559 = vrsqrt.f32 %v281_v6 }
 0x2e1   :  { %v276_v7 = vpop.xlane.xlu1 %275 }
 0x2e2   :  { %v279_v8 = vmul.f32 0.03125, %v276_v7 }
 0x2e4   :  { %v282_v9 = vadd.f32 1e-12, %v279_v8 }
 0x2e6   :  { %v3558_v11 = vpop.eup %3557  ;;  %3561 = vrsqrt.f32 %v282_v9 }
 0x2e7   :  { %v286_v12 = vmul.f32 %v3558_v11, %v264_v46  ;;  %v4054_v46 = vsel %vm306_vm9, -1e+09, %v3819_v10 }
 0x2e8   :  { %v4058_v47 = vrot.slane %v4054_v46, %v4051_v45 }
 0x2e9   :  { %v293_v17 = vmul.f32 %v2958_v13, %v286_v12 }
 0x2ea   :  { %v3560_v14 = vpop.eup %3559 }
 0x2eb   :  { %v287_v15 = vmul.f32 %v3560_v14, %v265_v50  ;;  %v300_v20 = vadd.f32 %v2959_v18, %v293_v17 }
 0x2ed   :  { %v294_v19 = vmul.f32 %v2958_v13, %v287_v15 }
 0x2ef   :  { %v301_v21 = vadd.f32 %v2959_v18, %v294_v19 }
 0x2f0   :  { %v3562_v22 = vpop.eup %3561 }
 0x2f1   :  { %v4012_v23 = vpack.c.bf16 %v301_v21, %v300_v20  ;;  %v288_v24 = vmul.f32 %v3562_v22, %v266_v54 }
 0x2f3   :  { %3210 = vmatprep.mubr.bf16.mxu1 %v4012_v23  ;;  %v295_v25 = vmul.f32 %v2958_v13, %v288_v24 }
 0x2f5   :  { %v302_v26 = vadd.f32 %v2959_v18, %v295_v25 }
 0x2f7   :  { %v4015_v27 = vpack.c.bf16 %v302_v26, %v302_v26 }
 0x2f9   :  { %3211 = vmatmul.mubr.bf16.vlgmr.msra.gmra.mrb[0].mxu1 %v4015_v27 }
 0x2fa   :  { %3228 = vmatprep.mubr.msk.bf16.mxu1 %vm3818_vm0, %v3819_v10 }
 0x3cc   :  { %v3212_v29 = vpop.f32.mrb[0].mxu1 }
 0x3cd   :  { %v4023_v30 = vadd.f32 %v3212_v29, %v2960_v28  ;;  %v458_v31 = vpop.f32.mrb[1].mxu1 }
 0x3ce   :  { %v3213_v32 = vpop.f32.mrb[2].mxu1  ;;  %v459_v34 = vadd.f32 %v2960_v28, %v458_v31 }
 0x3cf   :  { %v461_v33 = vpop.f32.mrb[3].mxu1  ;;  %v473_v21 = vpack.c.bf16 %v4023_v30, %v4023_v30 }
 0x3d0   :  { %v462_v35 = vadd.f32 %v2960_v28, %v461_v33 }
 0x3d1   :  { %v828_v24 = vrot.slane %v473_v21, 5 }
 0x3d2   :  { %v4025_v36 = vpack.c.bf16 %v462_v35, %v459_v34 }
 0x3d4   :  { %603 = vrot.lane.b32.xlu1 %v4025_v36, %s3820_s27  ;;  %475 = vrot.lane.b32.xlu0 %v4025_v36, %s3821_s6  ;;  %v827_v22 = vrot.slane %v4025_v36, 5 }
 0x3d6   :  { %v4078_v25 = vsel %vm826_vm12, %v827_v22, %v828_v24 }
 0x3d8   :  { %601 = vrot.lane.b32.xlu1 %v4025_v36, %s3822_s29 }
 0x446   :  { %v604_v37 = vpop.permute.xlu1 %603  ;;  %v476_v38 = vpop.permute.xlu0 %475 }
 0x447   :  { %v609_v39 = vsel %vm477_vm8, %v604_v37, 0  ;;  %v482_v40 = vsel %vm477_vm8, %v476_v38, 0 }
 0x448   :  { %3215 = vmatpush3.bf16.xpose.msra.mxu0 %v482_v40  ;;  %3227 = vmatpush3.bf16.xpose.msra.mxu1 %v609_v39 }
 0x449   :  { %3220 = vmatprep.subr.bf16.mxu0 %v3819_v10  ;;  %3238 = vmatprep.subr.bf16.mxu1 %v3819_v10 }
 0x44a   :  { %v602_v41 = vpop.permute.xlu1 %601 }
 0x44f   :  { %3217 = vmatmul.mubr.msk.bf16.vlgmr.msra.gmra.mrb[8].mxu0 %vm477_vm8, %v4025_v36  ;;  %3229 = vmatmul.mubr.msk.bf16.vlgmr.msra.gmra.mrb[4].mxu1 %vm477_vm8, %v602_v41 }
 0x450   :  { %3222 = vmatprep.mubr.msk.bf16.mxu0 %vm3818_vm0, %v3819_v10  ;;  %3240 = vmatprep.mubr.msk.bf16.mxu1 %vm3818_vm0, %v3819_v10 }
 0x522   :  { %v518_v48 = vpop.f32.mrb[8].mxu0  ;;  %v645_v49 = vpop.f32.mrb[4].mxu1 }
 0x523   :  { %v519_v50 = vadd.f32 %v518_v48, %v4058_v47  ;;  %v3218_v51 = vpop.f32.mrb[9].mxu0  ;;  %v3230_v52 = vpop.f32.mrb[5].mxu1  ;;  %v646_v54 = vadd.f32 %v645_v49, %v4058_v47 }
 0x524   :  { %v521_v16 = vpop.f32.mrb[10].mxu0  ;;  %v648_v53 = vpop.f32.mrb[6].mxu1  ;;  %v3514_v51 = vld [vmem:[%s4466_s8 + $0x8] sm:$0xff]  }
 0x525   :  { %v522_v55 = vadd.f32 %v521_v16, %v4058_v47  ;;  %v3219_v56 = vpop.f32.mrb[11].mxu0  ;;  %v3231_v57 = vpop.f32.mrb[7].mxu1  ;;  %v526_v58 = vsel %vm525_vm10, %v519_v50, -inf  ;;  %v649_v60 = vadd.f32 %v648_v53, %v4058_v47  ;;  %v652_v61 = vsel %vm525_vm10, %v646_v54, -inf  ;;  %3239 = vmatpush3.bf16.msra.mxu1 %v3514_v51 }
 0x526   :  { %527 = vmax.xlane.f32.xlu0 %v526_v58  ;;  %3250 = vmatprep.subr.bf16.mxu1 %v3819_v10 }
 0x527   :  { %v530_v59 = vsel %vm529_vm11, %v522_v55, -inf  ;;  %v655_v62 = vsel %vm529_vm11, %v649_v60, -inf }
 0x528   :  { %531 = vmax.xlane.f32.xlu1 %v530_v59 }
 0x52a   :  { %653 = vmax.xlane.f32.xlu0 %v652_v61 }
 0x52e   :  { %656 = vmax.xlane.f32.xlu0 %v655_v62 }
 0x5b3   :  { %v528_v63 = vpop.xlane.xlu0 %527 }
 0x5b4   :  { %v533_v0 = vsub.f32 %v519_v50, %v528_v63  ;;  %v4101_v50 = vld [vmem:[%s4466_s8] sm:$0xff]  }
 0x5b5   :  { %v532_v1 = vpop.xlane.xlu1 %531 }
 0x5b6   :  { %v535_v2 = vmul.f32 1.442695, %v533_v0  ;;  %v534_v3 = vsub.f32 %v522_v55, %v532_v1 }
 0x5b7   :  { %v654_v4 = vpop.xlane.xlu0 %653 }
 0x5b8   :  { %3563 = vpow2.f32 %v535_v2  ;;  %v537_v5 = vmul.f32 1.442695, %v534_v3  ;;  %v658_v6 = vsub.f32 %v646_v54, %v654_v4 }
 0x5ba   :  { %3565 = vpow2.f32 %v537_v5  ;;  %v660_v7 = vmul.f32 1.442695, %v658_v6  ;;  %v4127_v6 = vld [vmem:[#allocation10] sm:$0xff] }
 0x5bb   :  { %v657_v8 = vpop.xlane.xlu0 %656 }
 0x5bc   :  { %3567 = vpow2.f32 %v660_v7  ;;  %v659_v9 = vsub.f32 %v649_v60, %v657_v8  ;;  %v4131_v7 = vrot.slane %v4127_v6, %v4051_v45 }
 0x5be   :  { %v662_v11 = vmul.f32 1.442695, %v659_v9 }
 0x5c0   :  { %3569 = vpow2.f32 %v662_v11 }
 0x5c2   :  { %v3564_v12 = vpop.eup %3563 }
 0x5c3   :  { %v539_v13 = vsel %vm525_vm10, %v3564_v12, 0.0 }
 0x5c4   :  { %v3566_v14 = vpop.eup %3565  ;;  %540 = vadd.xlane.f32.xlu1 %v539_v13 }
 0x5c5   :  { %v542_v15 = vsel %vm529_vm11, %v3566_v14, 0.0 }
 0x5c6   :  { %v3568_v17 = vpop.eup %3567  ;;  %543 = vadd.xlane.f32.xlu0 %v542_v15 }
 0x5c7   :  { %v664_v18 = vsel %vm525_vm10, %v3568_v17, 0.0 }
 0x5c8   :  { %665 = vadd.xlane.f32.xlu1 %v664_v18  ;;  %v1179_v18 = vunpack.c.l.bf16 %v4012_v23 }
 0x5ca   :  { %v3570_v19 = vpop.eup %3569 }
 0x5cb   :  { %v667_v20 = vsel %vm529_vm11, %v3570_v19, 0.0 }
 0x5cc   :  { %668 = vadd.xlane.f32.xlu0 %v667_v20 }
 0x5d9   :  { %550 = vrot.lane.b32.xlu1 %v4025_v36, %s3808_s13 }
 0x5dd   :  { %830 = vrot.lane.b32.xlu1 %v4078_v25, %s3821_s6 }
 0x5e1   :  { %954 = vrot.lane.b32.xlu1 %v4078_v25, %s3820_s27 }
 0x5e2   :  { %675 = vrot.lane.b32.xlu0 %v4025_v36, %s3823_s1 }
 0x5e6   :  { %952 = vrot.lane.b32.xlu0 %v4078_v25, %s3822_s29 }
 0x651   :  { %v541_v26 = vpop.xlane.xlu1 %540 }
 0x652   :  { %3571 = vrcp.f32 %v541_v26 }
 0x653   :  { %v544_v28 = vpop.xlane.xlu0 %543 }
 0x654   :  { %3573 = vrcp.f32 %v544_v28 }
 0x655   :  { %v666_v29 = vpop.xlane.xlu1 %665 }
 0x656   :  { %3575 = vrcp.f32 %v666_v29 }
 0x659   :  { %v669_v30 = vpop.xlane.xlu0 %668  ;;  %v551_v31 = vpop.permute.xlu1 %550 }
 0x65a   :  { %3577 = vrcp.f32 %v669_v30  ;;  %v557_v32 = vsel %vm555_vm13, %v551_v31, 0 }
 0x65b   :  { %3221 = vmatpush3.bf16.msra.mxu0 %v557_v32 }
 0x65c   :  { %v3572_v33 = vpop.eup %3571  ;;  %3232 = vmatprep.subr.bf16.mxu0 %v3819_v10 }
 0x65d   :  { %v547_v35 = vmul.f32 %v3572_v33, %v3564_v12  ;;  %v676_v37 = vpop.permute.xlu0 %675  ;;  %v831_v58 = vpop.permute.xlu1 %830  ;;  %v4134_v12 = vsub.s32 1, %v4048_v44 }
 0x65e   :  { %v3574_v34 = vpop.eup %3573  ;;  %v681_v40 = vsel %vm555_vm13, %v676_v37, 0  ;;  %v836_v62 = vsel %vm477_vm8, %v831_v58, 0 }
 0x65f   :  { %v548_v36 = vmul.f32 %v3574_v34, %v3566_v14 }
 0x660   :  { %v3576_v39 = vpop.eup %3575 }
 0x661   :  { %v549_v38 = vpack.c.bf16 %v548_v36, %v547_v35  ;;  %v672_v48 = vmul.f32 %v3576_v39, %v3568_v17  ;;  %v955_v63 = vpop.permute.xlu1 %954  ;;  %v953_v1 = vpop.permute.xlu0 %952 }
 0x662   :  { %v960_v0 = vsel %vm477_vm8, %v955_v63, 0 }
 0x663   :  { %3223 = vmatmul.mubr.msk.bf16.vlgmr.msra.gmra.mrb[12].mxu0 %vm525_vm10, %v549_v38 }
 0x664   :  { %v3578_v41 = vpop.eup %3577  ;;  %3233 = vmatpush3.bf16.msra.mxu0 %v681_v40  ;;  %3234 = vmatprep.mubr.msk.bf16.mxu0 %vm3818_vm0, %v3819_v10 }
 0x665   :  { %v673_v43 = vmul.f32 %v3578_v41, %v3570_v19  ;;  %3244 = vmatprep.subr.bf16.mxu0 %v3819_v10  ;;  %v4142_v19 = vrot.slane %v4054_v46, %v4134_v12 }
 0x667   :  { %v674_v49 = vpack.c.bf16 %v673_v43, %v672_v48 }
 0x66b   :  { %3235 = vmatmul.mubr.msk.bf16.vlgmr.msra.gmra.mrb[16].mxu0 %vm525_vm10, %v674_v49 }
 0x66c   :  { %3246 = vmatprep.mubr.msk.bf16.mxu0 %vm3818_vm0, %v3819_v10  ;;  %3245 = vmatpush3.bf16.msra.mxu0 %v4101_v50 }
 0x66d   :  { %3256 = vmatprep.subr.bf16.mxu0 %v3819_v10 }
 0x736   :  { %v593_v52 = vpop.f32.mrb[12].mxu0 }
 0x737   :  { %v3224_v16 = vpop.f32.mrb[13].mxu0 }
 0x738   :  { %v596_v53 = vpop.f32.mrb[14].mxu0 }
 0x739   :  { %v600_v54 = vpack.c.bf16 %v596_v53, %v593_v52  ;;  %v3225_v55 = vpop.f32.mrb[15].mxu0 }
 0x73b   :  { %3247 = vmatmul.mubr.msk.bf16.vlgmr.msra.gmra.mrb[20].mxu0 %vm477_vm8, %v600_v54 }
 0x73c   :  { %3258 = vmatprep.mubr.msk.bf16.mxu0 %vm3818_vm0, %v3819_v10 }
 0x73e   :  { %v717_v56 = vpop.f32.mrb[16].mxu0 }
 0x73f   :  { %v3236_v57 = vpop.f32.mrb[17].mxu0 }
 0x740   :  { %v720_v59 = vpop.f32.mrb[18].mxu0 }
 0x741   :  { %v724_v60 = vpack.c.bf16 %v720_v59, %v717_v56  ;;  %v3237_v61 = vpop.f32.mrb[19].mxu0 }
 0x743   :  { %3241 = vmatmul.mubr.msk.bf16.vlgmr.msra.gmra.mrb[8].mxu1 %vm477_vm8, %v724_v60 }
 0x744   :  { %3251 = vmatpush3.bf16.xpose.msra.mxu1 %v836_v62  ;;  %3252 = vmatprep.mubr.msk.bf16.mxu1 %vm3818_vm0, %v3819_v10 }
 0x745   :  { %3262 = vmatprep.subr.bf16.mxu1 %v3819_v10 }
 0x74b   :  { %3253 = vmatmul.mubr.msk.bf16.vlgmr.msra.gmra.mrb[12].mxu1 %vm477_vm8, %v4078_v25 }
 0x74c   :  { %3263 = vmatpush3.bf16.xpose.msra.mxu1 %v960_v0  ;;  %3264 = vmatprep.mubr.msk.bf16.mxu1 %vm3818_vm0, %v3819_v10 }
 0x74d   :  { %3274 = vmatprep.subr.bf16.mxu1 %v3819_v10 }
 0x753   :  { %3265 = vmatmul.mubr.msk.bf16.vlgmr.msra.gmra.mrb[16].mxu1 %vm477_vm8, %v953_v1 }
 0x754   :  { %3275 = vmatpush3.bf16.msra.mxu1 %v3514_v51  ;;  %3276 = vmatprep.mubr.msk.bf16.mxu1 %vm3818_vm0, %v3819_v10 }
 0x755   :  { %3280 = vmatprep.subr.bf16.mxu1 %v3819_v10 }
 0x80e   :  { %v818_v2 = vpop.f32.mrb[20].mxu0 }
 0x80f   :  { %v3248_v3 = vpop.f32.mrb[21].mxu0 }
 0x810   :  { %v821_v4 = vpop.f32.mrb[22].mxu0 }
 0x811   :  { %v3249_v5 = vpop.f32.mrb[23].mxu0 }
 0x816   :  { %v768_v8 = vpop.f32.mrb[8].mxu1 }
 0x817   :  { %v819_v9 = vadd.f32 %v818_v2, %v768_v8  ;;  %v3242_v11 = vpop.f32.mrb[9].mxu1 }
 0x818   :  { %v771_v13 = vpop.f32.mrb[10].mxu1 }
 0x819   :  { %v1176_v14 = vadd.f32 %v4131_v7, %v819_v9  ;;  %v4137_v15 = vadd.f32 %v821_v4, %v771_v13  ;;  %v3243_v17 = vpop.f32.mrb[11].mxu1 }
 0x81b   :  { %v4144_v20 = vadd.f32 %v1179_v18, %v1176_v14 }
 0x81e   :  { %v872_v21 = vpop.f32.mrb[12].mxu1 }
 0x81f   :  { %v873_v22 = vadd.f32 %v872_v21, %v4142_v19  ;;  %v3254_v24 = vpop.f32.mrb[13].mxu1 }
 0x820   :  { %v875_v26 = vpop.f32.mrb[14].mxu1 }
 0x821   :  { %v876_v28 = vadd.f32 %v875_v26, %v4142_v19  ;;  %v3255_v29 = vpop.f32.mrb[15].mxu1  ;;  %v879_v30 = vsel %vm525_vm10, %v873_v22, -inf }
 0x822   :  { %880 = vmax.xlane.f32.xlu1 %v879_v30 }
 0x823   :  { %v882_v31 = vsel %vm529_vm11, %v876_v28, -inf }
 0x824   :  { %883 = vmax.xlane.f32.xlu0 %v882_v31 }
 0x826   :  { %v996_v32 = vpop.f32.mrb[16].mxu1 }
 0x827   :  { %v997_v46 = vadd.f32 %v996_v32, %v4142_v19  ;;  %v3266_v33 = vpop.f32.mrb[17].mxu1 }
 0x828   :  { %v999_v34 = vpop.f32.mrb[18].mxu1 }
 0x829   :  { %v1000_v35 = vadd.f32 %v999_v34, %v4142_v19  ;;  %v3267_v36 = vpop.f32.mrb[19].mxu1  ;;  %v1003_v37 = vsel %vm525_vm10, %v997_v46, -inf }
 0x82a   :  { %1004 = vmax.xlane.f32.xlu0 %v1003_v37 }
 0x82b   :  { %v1006_v38 = vsel %vm529_vm11, %v1000_v35, -inf }
 0x82c   :  { %1007 = vmax.xlane.f32.xlu1 %v1006_v38 }
 0x8af   :  { %v881_v39 = vpop.xlane.xlu1 %880 }
 0x8b0   :  { %v885_v40 = vsub.f32 %v873_v22, %v881_v39 }
 0x8b1   :  { %v884_v41 = vpop.xlane.xlu0 %883 }
 0x8b2   :  { %v887_v43 = vmul.f32 1.442695, %v885_v40  ;;  %v886_v48 = vsub.f32 %v876_v28, %v884_v41 }
 0x8b4   :  { %3579 = vpow2.f32 %v887_v43  ;;  %v889_v49 = vmul.f32 1.442695, %v886_v48 }
 0x8b6   :  { %3581 = vpow2.f32 %v889_v49 }
 0x8b7   :  { %v1005_v51 = vpop.xlane.xlu0 %1004 }
 0x8b8   :  { %v1009_v52 = vsub.f32 %v997_v46, %v1005_v51 }
 0x8b9   :  { %v1008_v16 = vpop.xlane.xlu1 %1007 }
 0x8ba   :  { %v1011_v53 = vmul.f32 1.442695, %v1009_v52  ;;  %v1010_v54 = vsub.f32 %v1000_v35, %v1008_v16 }
 0x8bc   :  { %3583 = vpow2.f32 %v1011_v53  ;;  %v1013_v55 = vmul.f32 1.442695, %v1010_v54  ;;  %v1180_v54 = vunpack.c.h.bf16 %v4012_v23 }
 0x8be   :  { %v3580_v56 = vpop.eup %3579  ;;  %3585 = vpow2.f32 %v1013_v55 }
 0x8bf   :  { %v891_v57 = vsel %vm525_vm10, %v3580_v56, 0.0 }
 0x8c0   :  { %v3582_v58 = vpop.eup %3581  ;;  %892 = vadd.xlane.f32.xlu0 %v891_v57  ;;  %v1181_v57 = vunpack.c.l.bf16 %v4015_v27 }
 0x8c1   :  { %v894_v59 = vsel %vm529_vm11, %v3582_v58, 0.0 }
 0x8c2   :  { %895 = vadd.xlane.f32.xlu1 %v894_v59 }
 0x8c6   :  { %v3584_v60 = vpop.eup %3583 }
 0x8c7   :  { %v1015_v61 = vsel %vm525_vm10, %v3584_v60, 0.0 }
 0x8c8   :  { %v3586_v62 = vpop.eup %3585  ;;  %1016 = vadd.xlane.f32.xlu0 %v1015_v61 }
 0x8c9   :  { %v1018_v63 = vsel %vm529_vm11, %v3586_v62, 0.0 }
 0x8ca   :  { %1019 = vadd.xlane.f32.xlu1 %v1018_v63 }
 0x8db   :  { %1026 = vrot.lane.b32.xlu1 %v4078_v25, %s3823_s1 }
 0x8de   :  { %902 = vrot.lane.b32.xlu0 %v4078_v25, %s3808_s13 }
 0x8ff   :  { %1185 = vadd.xlane.f32.xlu1 %v4144_v20 }
 0x94d   :  { %v893_v0 = vpop.xlane.xlu0 %892 }
 0x94e   :  { %3587 = vrcp.f32 %v893_v0 }
 0x94f   :  { %v896_v1 = vpop.xlane.xlu1 %895 }
 0x950   :  { %3589 = vrcp.f32 %v896_v1 }
 0x955   :  { %v1017_v2 = vpop.xlane.xlu0 %1016 }
 0x956   :  { %3591 = vrcp.f32 %v1017_v2 }
 0x957   :  { %v1020_v3 = vpop.xlane.xlu1 %1019 }
 0x958   :  { %v3588_v4 = vpop.eup %3587  ;;  %3593 = vrcp.f32 %v1020_v3 }
 0x959   :  { %v903_v5 = vpop.permute.xlu0 %902  ;;  %v899_v11 = vmul.f32 %v3588_v4, %v3580_v56  ;;  %v3516_v4 = vld [vmem:[#allocation7 + $0x8] sm:$0xff]  }
 0x95a   :  { %v3590_v8 = vpop.eup %3589  ;;  %v908_v9 = vsel %vm555_vm13, %v903_v5, 0  ;;  %v3517_v5 = vld [vmem:[#allocation7 + $0x10] sm:$0xff]  }
 0x95b   :  { %v900_v13 = vmul.f32 %v3590_v8, %v3582_v58  ;;  %3257 = vmatpush3.bf16.msra.mxu0 %v908_v9  ;;  %v1027_v14 = vpop.permute.xlu1 %1026  ;;  %v3518_v8 = vld [vmem:[#allocation7 + $0x18] sm:$0xff]   ;;  %v3519_v9 = vld [vmem:[#allocation7 + $0x20] sm:$0xff]  }
 0x95c   :  { %3268 = vmatprep.subr.bf16.mxu0 %v3819_v10  ;;  %v1032_v17 = vsel %vm555_vm13, %v1027_v14, 0  ;;  %v3522_v14 = vld [vmem:[#allocation7 + $0x38] sm:$0xff]  }
 0x95d   :  { %v901_v25 = vpack.c.bf16 %v900_v13, %v899_v11  ;;  %v3520_v11 = vld [vmem:[#allocation7 + $0x28] sm:$0xff]   ;;  %v3521_v13 = vld [vmem:[#allocation7 + $0x30] sm:$0xff]  }
 0x95f   :  { %3259 = vmatmul.mubr.msk.bf16.vlgmr.msra.gmra.mrb[24].mxu0 %vm525_vm10, %v901_v25 }
 0x960   :  { %v3592_v18 = vpop.eup %3591  ;;  %3269 = vmatpush3.bf16.msra.mxu0 %v1032_v17  ;;  %3270 = vmatprep.mubr.msk.bf16.mxu0 %vm3818_vm0, %v3819_v10 }
 0x961   :  { %v1023_v22 = vmul.f32 %v3592_v18, %v3584_v60  ;;  %v3515_v60 = vld [vmem:[#allocation7] sm:$0xff]  }
 0x962   :  { %v3594_v21 = vpop.eup %3593  ;;  %3286 = vmatprep.subr.bf16.mxu0 %v3515_v60 }
 0x963   :  { %v1024_v24 = vmul.f32 %v3594_v21, %v3586_v62 }
 0x965   :  { %v1025_v26 = vpack.c.bf16 %v1024_v24, %v1023_v22 }
 0x967   :  { %3271 = vmatmul.mubr.msk.bf16.vlgmr.msra.gmra.mrb[28].mxu0 %vm525_vm10, %v1025_v26 }
 0x968   :  { %3287 = vmatpush3.bf16.msra.mxu0 %v3515_v60 }
 0x969   :  { %3288 = vmatprep.subr.bf16.mxu0 %v3516_v4 }
 0x96c   :  { %3289 = vmatpush3.bf16.msra.mxu0 %v3516_v4 }
 0x96d   :  { %3290 = vmatprep.subr.bf16.mxu0 %v3517_v5 }
 0x970   :  { %3291 = vmatpush3.bf16.msra.mxu0 %v3517_v5 }
 0x971   :  { %3292 = vmatprep.subr.bf16.mxu0 %v3518_v8 }
 0x974   :  { %3293 = vmatpush3.bf16.msra.mxu0 %v3518_v8 }
 0x975   :  { %3294 = vmatprep.subr.bf16.mxu0 %v3519_v9 }
 0x978   :  { %3295 = vmatpush3.bf16.msra.mxu0 %v3519_v9 }
 0x979   :  { %3296 = vmatprep.subr.bf16.mxu0 %v3520_v11 }
 0x97c   :  { %3297 = vmatpush3.bf16.msra.mxu0 %v3520_v11 }
 0x97d   :  { %3298 = vmatprep.subr.bf16.mxu0 %v3521_v13 }
 0x980   :  { %3299 = vmatpush3.bf16.msra.mxu0 %v3521_v13 }
 0x981   :  { %3300 = vmatprep.subr.bf16.mxu0 %v3522_v14 }
 0x984   :  { %3301 = vmatpush3.bf16.msra.mxu0 %v3522_v14 }
 0x98c   :  { %v1186_v28 = vpop.xlane.xlu1 %1185 }
 0x98d   :  { %v1192_v29 = vmul.f32 0.03125, %v1186_v28 }
 0x98f   :  { %v1195_v30 = vsub.f32 %v4144_v20, %v1192_v29 }
 0x991   :  { %v4172_v31 = vmul.f32 %v3999_v42, %v1195_v30 }
 0x993   :  { %v1201_v32 = vmul.f32 %v4172_v31, %v4172_v31 }
 0x995   :  { %1204 = vadd.xlane.f32.xlu1 %v1201_v32 }
 0xa22   :  { %v1205_v25 = vpop.xlane.xlu1 %1204 }
 0xa23   :  { %v1211_v17 = vmul.f32 0.03125, %v1205_v25 }
 0xa25   :  { %v1214_v18 = vadd.f32 1e-12, %v1211_v17 }
 0xa27   :  { %3595 = vrsqrt.f32 %v1214_v18 }
 0xa31   :  { %v3596_v30 = vpop.eup %3595 }
 0xa32   :  { %v944_v46 = vpop.f32.mrb[24].mxu0  ;;  %v1220_v32 = vmul.f32 %v3596_v30, %v4172_v31 }
 0xa33   :  { %v3260_v33 = vpop.f32.mrb[25].mxu0 }
 0xa34   :  { %v947_v34 = vpop.f32.mrb[26].mxu0  ;;  %v1232_v33 = vsub.s32 2, %v4048_v44 }
 0xa35   :  { %v951_v35 = vpack.c.bf16 %v947_v34, %v944_v46  ;;  %v3261_v36 = vpop.f32.mrb[27].mxu0  ;;  %v1226_v46 = vrot.slane %v4127_v6, %v4134_v12 }
 0xa37   :  { %v1227_v36 = vmul.f32 %v1226_v46, %v1220_v32 }
 0xa3a   :  { %v1068_v37 = vpop.f32.mrb[28].mxu0 }
 0xa3b   :  { %v3272_v38 = vpop.f32.mrb[29].mxu0 }
 0xa3c   :  { %v1071_v39 = vpop.f32.mrb[30].mxu0 }
 0xa3d   :  { %v1075_v40 = vpack.c.bf16 %v1071_v39, %v1068_v37  ;;  %v3273_v41 = vpop.f32.mrb[31].mxu0  ;;  %v1233_v37 = vrot.slane %v4127_v6, %v1232_v33 }
 0xa3f   :  { %3277 = vmatmul.mubr.msk.bf16.vlgmr.msra.gmra.mrb[20].mxu1 %vm477_vm8, %v1075_v40  ;;  %v1234_v40 = vadd.f32 %v1233_v37, %v1227_v36 }
 0xa40   :  { %3281 = vmatpush3.bf16.msra.mxu1 %v4101_v50  ;;  %3282 = vmatprep.mubr.msk.bf16.mxu1 %vm3818_vm0, %v3819_v10 }
 0xa4b   :  { %3283 = vmatmul.mubr.msk.bf16.vlgmr.msra.gmra.mrb[20].mxu1 %vm477_vm8, %v951_v35 }
 0xb1e   :  { %v1157_v20 = vpop.f32.mrb[20].mxu1 }
 0xb1f   :  { %v1166_v43 = vrot.slane %v1157_v20, 6  ;;  %v3284_v48 = vpop.f32.mrb[21].mxu1 }
 0xb20   :  { %v1160_v49 = vpop.f32.mrb[22].mxu1 }
 0xb21   :  { %v1167_v51 = vrot.slane %v1160_v49, 6  ;;  %v3285_v52 = vpop.f32.mrb[23].mxu1  ;;  %v1171_v16 = vsel %vm148_vm1, %v4137_v15, %v1166_v43 }
 0xb22   :  { %v1177_v53 = vadd.f32 %v4131_v7, %v1171_v16  ;;  %v3524_v52 = vld [vmem:[#allocation8 + $0x8] sm:$0xff]   ;;  %v3525_v16 = vld [vmem:[#allocation8 + $0x10] sm:$0xff]  }
 0xb23   :  { %v1168_v50 = vsel %vm148_vm1, %v1166_v43, %v1167_v51  ;;  %v3523_v51 = vld [vmem:[#allocation8] sm:$0xff]  }
 0xb24   :  { %v1183_v55 = vadd.f32 %v1180_v54, %v1177_v53  ;;  %v1178_v56 = vadd.f32 %v4131_v7, %v1168_v50  ;;  %3306 = vmatprep.subr.bf16.mxu1 %v3523_v51  ;;  %v3526_v53 = vld [vmem:[#allocation8 + $0x18] sm:$0xff]   ;;  %v3527_v54 = vld [vmem:[#allocation8 + $0x20] sm:$0xff]   ;;  %v3528_v50 = vld [vmem:[#allocation8 + $0x28] sm:$0xff]  }
 0xb25   :  { %3307 = vmatpush3.bf16.msra.mxu1 %v3523_v51 }
 0xb26   :  { %1187 = vadd.xlane.f32.xlu0 %v1183_v55  ;;  %v1184_v58 = vadd.f32 %v1181_v57, %v1178_v56  ;;  %3308 = vmatprep.subr.bf16.mxu1 %v3524_v52  ;;  %v3530_v56 = vld [vmem:[#allocation8 + $0x38] sm:$0xff]   ;;  %v1241_v57 = vsub.s32 3, %v4048_v44 }
 0xb28   :  { %v1189_v59 = vsel %vm254_vm6, %v1184_v58, 0.0 }
 0xb29   :  { %3309 = vmatpush3.bf16.msra.mxu1 %v3524_v52 }
 0xb2a   :  { %1190 = vadd.xlane.f32.xlu0 %v1189_v59  ;;  %3310 = vmatprep.subr.bf16.mxu1 %v3525_v16 }
 0xb2d   :  { %3311 = vmatpush3.bf16.msra.mxu1 %v3525_v16 }
 0xb2e   :  { %3312 = vmatprep.subr.bf16.mxu1 %v3526_v53 }
 0xb31   :  { %3313 = vmatpush3.bf16.msra.mxu1 %v3526_v53 }
 0xb32   :  { %3314 = vmatprep.subr.bf16.mxu1 %v3527_v54 }
 0xb35   :  { %3315 = vmatpush3.bf16.msra.mxu1 %v3527_v54 }
 0xb36   :  { %3316 = vmatprep.subr.bf16.mxu1 %v3528_v50 }
 0xb39   :  { %3317 = vmatpush3.bf16.msra.mxu1 %v3528_v50 }
 0xbb3   :  { %v1188_v15 = vpop.xlane.xlu0 %1187 }
 0xbb4   :  { %v1193_v61 = vmul.f32 0.03125, %v1188_v15 }
 0xbb6   :  { %v1196_v62 = vsub.f32 %v1183_v55, %v1193_v61  ;;  %v3529_v55 = vld [vmem:[#allocation8 + $0x30] sm:$0xff]  }
 0xbb7   :  { %v1191_v63 = vpop.xlane.xlu0 %1190  ;;  %3318 = vmatprep.subr.bf16.mxu1 %v3529_v55 }
 0xbb8   :  { %v1194_v23 = vmul.f32 0.03125, %v1191_v63  ;;  %v1199_v0 = vmul.f32 %v3999_v42, %v1196_v62  ;;  %3319 = vmatpush3.bf16.msra.mxu1 %v3529_v55 }
 0xbb9   :  { %3320 = vmatprep.subr.bf16.mxu1 %v3530_v56 }
 0xbba   :  { %v1197_v1 = vsub.f32 %v1184_v58, %v1194_v23  ;;  %v1202_v2 = vmul.f32 %v1199_v0, %v1199_v0  ;;  %v1242_v58 = vrot.slane %v4127_v6, %v1241_v57 }
 0xbbc   :  { %1206 = vadd.xlane.f32.xlu0 %v1202_v2  ;;  %v1200_v27 = vmul.f32 %v3999_v42, %v1197_v1  ;;  %3321 = vmatpush3.bf16.msra.mxu1 %v3530_v56 }
 0xbbd   :  { %3346 = vmatprep.subr.bf16.mxu1 %v3819_v10 }
 0xbbe   :  { %v1203_v7 = vmul.f32 %v1200_v27, %v1200_v27 }
 0xbc0   :  { %v1208_v3 = vsel %vm254_vm6, %v1203_v7, 0.0 }
 0xbc1   :  { %1209 = vadd.xlane.f32.xlu1 %v1208_v3 }
 0xc49   :  { %v1207_v21 = vpop.xlane.xlu0 %1206 }
 0xc4a   :  { %v1212_v22 = vmul.f32 0.03125, %v1207_v21 }
 0xc4c   :  { %v1215_v24 = vadd.f32 1e-12, %v1212_v22 }
 0xc4e   :  { %3597 = vrsqrt.f32 %v1215_v24  ;;  %v1210_v26 = vpop.xlane.xlu1 %1209 }
 0xc4f   :  { %v1213_v28 = vmul.f32 0.03125, %v1210_v26 }
 0xc51   :  { %v1216_v29 = vadd.f32 1e-12, %v1213_v28 }
 0xc53   :  { %3599 = vrsqrt.f32 %v1216_v29 }
 0xc58   :  { %v3598_v34 = vpop.eup %3597 }
 0xc59   :  { %v1221_v35 = vmul.f32 %v3598_v34, %v1199_v0 }
 0xc5b   :  { %v1228_v38 = vmul.f32 %v1226_v46, %v1221_v35 }
 0xc5d   :  { %v3600_v39 = vpop.eup %3599  ;;  %v1235_v41 = vadd.f32 %v1233_v37, %v1228_v38  ;;  %v1370_v38 = vsub.s32 4, %v4048_v44 }
 0xc5e   :  { %v1222_v20 = vmul.f32 %v3600_v39, %v1200_v27 }
 0xc5f   :  { %v4199_v43 = vpack.c.bf16 %v1235_v41, %v1234_v40  ;;  %v1371_v39 = vrot.slane %v4127_v6, %v1370_v38 }
 0xc60   :  { %v1229_v31 = vmul.f32 %v1226_v46, %v1222_v20 }
 0xc61   :  { %3302 = vmatprep.mubr.bf16.mxu0 %v4199_v43  ;;  %v1468_v52 = vunpack.c.l.bf16 %v4199_v43  ;;  %v1469_v55 = vunpack.c.h.bf16 %v4199_v43 }
 0xc62   :  { %v1236_v48 = vadd.f32 %v1233_v37, %v1229_v31 }
 0xc64   :  { %v4202_v49 = vpack.c.bf16 %v1236_v48, %v1236_v48 }
 0xc66   :  { %3303 = vmatmul.mubr.bf16.vlgmr.msra.gmra.mrb[32].mxu0 %v4202_v49  ;;  %v1470_v31 = vunpack.c.l.bf16 %v4202_v49 }
 0xd39   :  { %v3304_v59 = vpop.f32.mrb[32].mxu0 }
 0xd3a   :  { %v1334_v60 = vadd.f32 %v3304_v59, %v1242_v58  ;;  %v1325_v15 = vpop.f32.mrb[33].mxu0  ;;  %v3531_v59 = vld [vmem:[#allocation5 + $0x40] sm:$0xff]  }
 0xd3b   :  { %v1326_v61 = vadd.f32 %v1325_v15, %v1242_v58  ;;  %v3305_v62 = vpop.f32.mrb[34].mxu0  ;;  %3326 = vmatprep.subr.bf16.mxu0 %v3531_v59 }
 0xd3c   :  { %v1344_v63 = vmul.f32 0.044715, %v1334_v60  ;;  %v1328_v23 = vpop.f32.mrb[35].mxu0  ;;  %v1341_v28 = vmul.f32 0.5, %v1334_v60  ;;  %3327 = vmatpush3.bf16.msra.mxu0 %v3531_v59 }
 0xd3d   :  { %v1342_v0 = vmul.f32 0.044715, %v1326_v61  ;;  %v1329_v1 = vadd.f32 %v1328_v23, %v1242_v58  ;;  %v1339_v29 = vmul.f32 0.5, %v1326_v61 }
 0xd3e   :  { %v1347_v2 = vmul.f32 %v1344_v63, %v1334_v60 }
 0xd3f   :  { %v1345_v27 = vmul.f32 %v1342_v0, %v1326_v61  ;;  %v1343_v7 = vmul.f32 0.044715, %v1329_v1  ;;  %v1340_v30 = vmul.f32 0.5, %v1329_v1 }
 0xd40   :  { %v1350_v3 = vmul.f32 %v1347_v2, %v1334_v60 }
 0xd41   :  { %v1348_v4 = vmul.f32 %v1345_v27, %v1326_v61  ;;  %v1346_v5 = vmul.f32 %v1343_v7, %v1329_v1 }
 0xd42   :  { %v1353_v8 = vadd.f32 %v1350_v3, %v1334_v60 }
 0xd43   :  { %v1349_v9 = vmul.f32 %v1346_v5, %v1329_v1  ;;  %v1351_v11 = vadd.f32 %v1348_v4, %v1326_v61 }
 0xd44   :  { %v1356_v13 = vmul.f32 0.7978846, %v1353_v8  ;;  %v3532_v8 = vld [vmem:[#allocation5 + $0x48] sm:$0xff]  }
 0xd45   :  { %v1352_v14 = vadd.f32 %v1349_v9, %v1329_v1  ;;  %v1354_v25 = vmul.f32 0.7978846, %v1351_v11  ;;  %3328 = vmatprep.subr.bf16.mxu0 %v3532_v8  ;;  %v3533_v9 = vld [vmem:[#allocation5 + $0x50] sm:$0xff]   ;;  %v3534_v11 = vld [vmem:[#allocation5 + $0x58] sm:$0xff]  }
 0xd46   :  { %3601 = vtanh.f32 %v1356_v13  ;;  %3329 = vmatpush3.bf16.msra.mxu0 %v3532_v8  ;;  %v3535_v13 = vld [vmem:[#allocation5 + $0x60] sm:$0xff]  }
 0xd47   :  { %v1355_v17 = vmul.f32 0.7978846, %v1352_v14  ;;  %3603 = vtanh.f32 %v1354_v25  ;;  %3330 = vmatprep.subr.bf16.mxu0 %v3533_v9  ;;  %v3536_v14 = vld [vmem:[#allocation5 + $0x68] sm:$0xff]   ;;  %v3537_v25 = vld [vmem:[#allocation5 + $0x70] sm:$0xff]  }
 0xd49   :  { %3605 = vtanh.f32 %v1355_v17  ;;  %v3538_v17 = vld [vmem:[#allocation5 + $0x78] sm:$0xff]  }
 0xd4a   :  { %3331 = vmatpush3.bf16.msra.mxu0 %v3533_v9 }
 0xd4b   :  { %3332 = vmatprep.subr.bf16.mxu0 %v3534_v11 }
 0xd4e   :  { %3333 = vmatpush3.bf16.msra.mxu0 %v3534_v11 }
 0xd4f   :  { %3334 = vmatprep.subr.bf16.mxu0 %v3535_v13 }
 0xd50   :  { %v3602_v18 = vpop.eup %3601 }
 0xd51   :  { %v3604_v21 = vpop.eup %3603  ;;  %v1362_v22 = vadd.f32 1.0, %v3602_v18 }
 0xd52   :  { %v1360_v24 = vadd.f32 1.0, %v3604_v21  ;;  %3335 = vmatpush3.bf16.msra.mxu0 %v3535_v13 }
 0xd53   :  { %v3606_v26 = vpop.eup %3605  ;;  %v1365_v46 = vmul.f32 %v1362_v22, %v1341_v28  ;;  %3336 = vmatprep.subr.bf16.mxu0 %v3536_v14 }
 0xd54   :  { %v1361_v32 = vadd.f32 1.0, %v3606_v26  ;;  %v1363_v34 = vmul.f32 %v1360_v24, %v1339_v29 }
 0xd55   :  { %v1367_v37 = vpack.c.bf16 %v1365_v46, %v1365_v46  ;;  %v1514_v46 = vsub.s32 5, %v4048_v44 }
 0xd56   :  { %v1364_v35 = vmul.f32 %v1361_v32, %v1340_v30  ;;  %3337 = vmatpush3.bf16.msra.mxu0 %v3536_v14 }
 0xd57   :  { %3338 = vmatprep.subr.bf16.mxu0 %v3537_v25 }
 0xd58   :  { %v1366_v36 = vpack.c.bf16 %v1364_v35, %v1363_v34  ;;  %v1515_v34 = vrot.slane %v4127_v6, %v1514_v46  ;;  %v1521_v35 = vsub.s32 6, %v4048_v44 }
 0xd5a   :  { %3322 = vmatprep.mubr.bf16.mxu1 %v1366_v36  ;;  %3339 = vmatpush3.bf16.msra.mxu0 %v3537_v25 }
 0xd5b   :  { %3323 = vmatmul.mubr.bf16.vlgmr.msra.gmra.mrb[24].mxu1 %v1367_v37  ;;  %3340 = vmatprep.subr.bf16.mxu0 %v3538_v17 }
 0xd5c   :  { %3348 = vmatprep.mubr.msk.bf16.mxu1 %vm3818_vm0, %v3819_v10 }
 0xd5e   :  { %3341 = vmatpush3.bf16.msra.mxu0 %v3538_v17 }
 0xd5f   :  { %3364 = vmatprep.subr.bf16.mxu0 %v3819_v10 }
 0xe2e   :  { %v3324_v40 = vpop.f32.mrb[24].mxu1 }
 0xe2f   :  { %v1463_v41 = vadd.f32 %v3324_v40, %v1371_v39  ;;  %v1454_v20 = vpop.f32.mrb[25].mxu1 }
 0xe30   :  { %v1455_v48 = vadd.f32 %v1454_v20, %v1371_v39  ;;  %v3325_v51 = vpop.f32.mrb[26].mxu1  ;;  %v1522_v20 = vrot.slane %v4127_v6, %v1521_v35  ;;  %v3004_v6 = vld [vmem:[%s4465_s7 + $0x1] ss:$0 sm:$0xff] }
 0xe31   :  { %v1457_v16 = vpop.f32.mrb[27].mxu1  ;;  %v1473_v53 = vadd.f32 %v1470_v31, %v1463_v41 }
 0xe32   :  { %v1458_v54 = vadd.f32 %v1457_v16, %v1371_v39  ;;  %v1471_v50 = vadd.f32 %v1468_v52, %v1455_v48 }
 0xe33   :  { %v1478_v58 = vsel %vm254_vm6, %v1473_v53, 0.0 }
 0xe34   :  { %1474 = vadd.xlane.f32.xlu0 %v1471_v50  ;;  %v1472_v56 = vadd.f32 %v1469_v55, %v1458_v54 }
 0xe36   :  { %1476 = vadd.xlane.f32.xlu1 %v1472_v56 }
 0xe38   :  { %1479 = vadd.xlane.f32.xlu0 %v1478_v58 }
 0xec1   :  { %v1475_v49 = vpop.xlane.xlu0 %1474 }
 0xec2   :  { %v1481_v60 = vmul.f32 0.03125, %v1475_v49 }
 0xec3   :  { %v1477_v15 = vpop.xlane.xlu1 %1476 }
 0xec4   :  { %v1484_v61 = vsub.f32 %v1471_v50, %v1481_v60  ;;  %v1482_v62 = vmul.f32 0.03125, %v1477_v15 }
 0xec5   :  { %v1480_v63 = vpop.xlane.xlu0 %1479 }
 0xec6   :  { %v1485_v23 = vsub.f32 %v1472_v56, %v1482_v62  ;;  %v1483_v0 = vmul.f32 0.03125, %v1480_v63  ;;  %v1487_v1 = vmul.f32 %v3999_v42, %v1484_v61 }
 0xec8   :  { %v1486_v43 = vsub.f32 %v1473_v53, %v1483_v0  ;;  %v1490_v2 = vmul.f32 %v1487_v1, %v1487_v1  ;;  %v1488_v27 = vmul.f32 %v3999_v42, %v1485_v23 }
 0xeca   :  { %1493 = vadd.xlane.f32.xlu1 %v1490_v2  ;;  %v1491_v7 = vmul.f32 %v1488_v27, %v1488_v27  ;;  %v1489_v3 = vmul.f32 %v3999_v42, %v1486_v43 }
 0xecc   :  { %1495 = vadd.xlane.f32.xlu0 %v1491_v7  ;;  %v1492_v4 = vmul.f32 %v1489_v3, %v1489_v3 }
 0xece   :  { %v1497_v5 = vsel %vm254_vm6, %v1492_v4, 0.0 }
 0xecf   :  { %1498 = vadd.xlane.f32.xlu1 %v1497_v5 }
 0xf57   :  { %v1494_v18 = vpop.xlane.xlu1 %1493 }
 0xf58   :  { %v1500_v21 = vmul.f32 0.03125, %v1494_v18 }
 0xf59   :  { %v1496_v22 = vpop.xlane.xlu0 %1495 }
 0xf5a   :  { %v1503_v24 = vadd.f32 1e-12, %v1500_v21  ;;  %v1501_v26 = vmul.f32 0.03125, %v1496_v22 }
 0xf5c   :  { %3607 = vrsqrt.f32 %v1503_v24  ;;  %v1504_v28 = vadd.f32 1e-12, %v1501_v26  ;;  %v1499_v29 = vpop.xlane.xlu1 %1498 }
 0xf5d   :  { %v1502_v30 = vmul.f32 0.03125, %v1499_v29 }
 0xf5e   :  { %3609 = vrsqrt.f32 %v1504_v28 }
 0xf5f   :  { %v1505_v32 = vadd.f32 1e-12, %v1502_v30 }
 0xf61   :  { %3611 = vrsqrt.f32 %v1505_v32 }
 0xf66   :  { %v3608_v36 = vpop.eup %3607 }
 0xf67   :  { %v1509_v37 = vmul.f32 %v3608_v36, %v1487_v1 }
 0xf68   :  { %v3610_v39 = vpop.eup %3609 }
 0xf69   :  { %v1510_v40 = vmul.f32 %v3610_v39, %v1488_v27  ;;  %v1516_v41 = vmul.f32 %v1515_v34, %v1509_v37 }
 0xf6b   :  { %v3612_v31 = vpop.eup %3611  ;;  %v1517_v48 = vmul.f32 %v1515_v34, %v1510_v40  ;;  %v1523_v52 = vadd.f32 %v1522_v20, %v1516_v41 }
 0xf6c   :  { %v1511_v51 = vmul.f32 %v3612_v31, %v1489_v3 }
 0xf6d   :  { %v1524_v16 = vadd.f32 %v1522_v20, %v1517_v48 }
 0xf6e   :  { %v1518_v53 = vmul.f32 %v1515_v34, %v1511_v51 }
 0xf6f   :  { %v4233_v54 = vpack.c.bf16 %v1524_v16, %v1523_v52 }
 0xf70   :  { %v1525_v50 = vadd.f32 %v1522_v20, %v1518_v53 }
 0xf71   :  { %3342 = vmatprep.mubr.bf16.mxu0 %v4233_v54 }
 0xf72   :  { %v4236_v55 = vpack.c.bf16 %v1525_v50, %v1525_v50 }
 0xf74   :  { %3343 = vmatmul.mubr.bf16.vlgmr.msra.gmra.mrb[36].mxu0 %v4236_v55 }
 0xf75   :  { %3366 = vmatprep.mubr.msk.bf16.mxu0 %vm3818_vm0, %v3819_v10 }
0x1047   :  { %v3344_v56 = vpop.f32.mrb[36].mxu0 }
0x1048   :  { %v4244_v58 = vadd.f32 %v3344_v56, %v3004_v6  ;;  %v1676_v59 = vpop.f32.mrb[37].mxu0 }
0x1049   :  { %v3345_v49 = vpop.f32.mrb[38].mxu0  ;;  %v1677_v15 = vadd.f32 %v3004_v6, %v1676_v59 }
0x104a   :  { %v1679_v60 = vpop.f32.mrb[39].mxu0 }
0x104b   :  { %v1680_v61 = vadd.f32 %v3004_v6, %v1679_v60  ;;  %v1691_v60 = vpack.c.bf16 %v4244_v58, %v4244_v58 }
0x104d   :  { %v4246_v62 = vpack.c.bf16 %v1680_v61, %v1677_v15  ;;  %v2041_v61 = vrot.slane %v1691_v60, 5 }
0x104f   :  { %1693 = vrot.lane.b32.xlu0 %v4246_v62, %s3821_s6  ;;  %v2040_v15 = vrot.slane %v4246_v62, 5 }
0x1053   :  { %1817 = vrot.lane.b32.xlu0 %v4246_v62, %s3820_s27 }
0x1057   :  { %1815 = vrot.lane.b32.xlu0 %v4246_v62, %s3822_s29 }
0x10c1   :  { %v1694_v63 = vpop.permute.xlu0 %1693 }
0x10c2   :  { %v1699_v23 = vsel %vm477_vm8, %v1694_v63, 0  ;;  %v4286_v63 = vsel %vm826_vm12, %v2040_v15, %v2041_v61 }
0x10c3   :  { %3347 = vmatpush3.bf16.xpose.msra.mxu1 %v1699_v23 }
0x10c4   :  { %3352 = vmatprep.subr.bf16.mxu1 %v3819_v10 }
0x10c5   :  { %v1818_v36 = vpop.permute.xlu0 %1817 }
0x10c6   :  { %v1823_v39 = vsel %vm477_vm8, %v1818_v36, 0 }
0x10c9   :  { %v1816_v40 = vpop.permute.xlu0 %1815 }
0x10ca   :  { %3349 = vmatmul.mubr.msk.bf16.vlgmr.msra.gmra.mrb[28].mxu1 %vm477_vm8, %v4246_v62 }
0x10cb   :  { %3354 = vmatprep.mubr.msk.bf16.mxu1 %vm3818_vm0, %v3819_v10 }
0x119d   :  { %v1735_v0 = vpop.f32.mrb[28].mxu1 }
0x119e   :  { %v1736_v1 = vadd.f32 %v1735_v0, %v4058_v47  ;;  %v3350_v43 = vpop.f32.mrb[29].mxu1 }
0x119f   :  { %v1738_v2 = vpop.f32.mrb[30].mxu1 }
0x11a0   :  { %v1739_v27 = vadd.f32 %v1738_v2, %v4058_v47  ;;  %v3351_v7 = vpop.f32.mrb[31].mxu1  ;;  %v1742_v3 = vsel %vm525_vm10, %v1736_v1, -inf }
0x11a1   :  { %1743 = vmax.xlane.f32.xlu1 %v1742_v3 }
0x11a2   :  { %v1745_v4 = vsel %vm529_vm11, %v1739_v27, -inf }
0x11a5   :  { %1746 = vmax.xlane.f32.xlu1 %v1745_v4  ;;  %v3540_v4 = vld [vmem:[%s4466_s8 + $0x18] sm:$0xff]  }
0x122e   :  { %v1744_v5 = vpop.xlane.xlu1 %1743 }
0x122f   :  { %v1748_v8 = vsub.f32 %v1736_v1, %v1744_v5 }
0x1231   :  { %v1750_v9 = vmul.f32 1.442695, %v1748_v8 }
0x1232   :  { %v1747_v11 = vpop.xlane.xlu1 %1746 }
0x1233   :  { %3613 = vpow2.f32 %v1750_v9  ;;  %v1749_v13 = vsub.f32 %v1739_v27, %v1747_v11 }
0x1235   :  { %v1752_v14 = vmul.f32 1.442695, %v1749_v13 }
0x1237   :  { %3615 = vpow2.f32 %v1752_v14 }
0x123d   :  { %v3614_v25 = vpop.eup %3613 }
0x123e   :  { %v1754_v17 = vsel %vm525_vm10, %v3614_v25, 0.0 }
0x123f   :  { %1755 = vadd.xlane.f32.xlu1 %v1754_v17  ;;  %v4307_v17 = vld [vmem:[%s4466_s8 + $0x10] sm:$0xff]  }
0x1241   :  { %v3616_v18 = vpop.eup %3615 }
0x1242   :  { %v1757_v21 = vsel %vm529_vm11, %v3616_v18, 0.0 }
0x1243   :  { %1758 = vadd.xlane.f32.xlu1 %v1757_v21 }
0x1254   :  { %1765 = vrot.lane.b32.xlu1 %v4246_v62, %s3808_s13 }
0x12cc   :  { %v1756_v22 = vpop.xlane.xlu1 %1755 }
0x12cd   :  { %3617 = vrcp.f32 %v1756_v22 }
0x12d0   :  { %v1759_v24 = vpop.xlane.xlu1 %1758 }
0x12d1   :  { %3619 = vrcp.f32 %v1759_v24 }
0x12d4   :  { %v1766_v26 = vpop.permute.xlu1 %1765 }
0x12d5   :  { %v1771_v28 = vsel %vm555_vm13, %v1766_v26, 0 }
0x12d6   :  { %3353 = vmatpush3.bf16.msra.mxu1 %v1771_v28 }
0x12d7   :  { %3358 = vmatprep.subr.bf16.mxu1 %v3819_v10  ;;  %v3618_v29 = vpop.eup %3617 }
0x12d8   :  { %v1762_v32 = vmul.f32 %v3618_v29, %v3614_v25 }
0x12db   :  { %v3620_v30 = vpop.eup %3619 }
0x12dc   :  { %v1763_v34 = vmul.f32 %v3620_v30, %v3616_v18 }
0x12de   :  { %v1764_v37 = vpack.c.bf16 %v1763_v34, %v1762_v32 }
0x12e0   :  { %3355 = vmatmul.mubr.msk.bf16.vlgmr.msra.gmra.mrb[32].mxu1 %vm525_vm10, %v1764_v37 }
0x12e1   :  { %3359 = vmatpush3.bf16.xpose.msra.mxu1 %v1823_v39  ;;  %3360 = vmatprep.mubr.msk.bf16.mxu1 %vm3818_vm0, %v3819_v10 }
0x12e2   :  { %3370 = vmatprep.subr.bf16.mxu1 %v3819_v10 }
0x12e8   :  { %3361 = vmatmul.mubr.msk.bf16.vlgmr.msra.gmra.mrb[36].mxu1 %vm477_vm8, %v1816_v40 }
0x12e9   :  { %3372 = vmatprep.mubr.msk.bf16.mxu1 %vm3818_vm0, %v3819_v10  ;;  %3371 = vmatpush3.bf16.msra.mxu1 %v3540_v4 }
0x12ea   :  { %3382 = vmatprep.subr.bf16.mxu1 %v3819_v10 }
0x13b3   :  { %v1807_v41 = vpop.f32.mrb[32].mxu1 }
0x13b4   :  { %v3356_v20 = vpop.f32.mrb[33].mxu1 }
0x13b5   :  { %v1810_v31 = vpop.f32.mrb[34].mxu1  ;;  %v4332_v20 = vld [vmem:[#allocation10 + $0x8] sm:$0xff] }
0x13b6   :  { %v1814_v48 = vpack.c.bf16 %v1810_v31, %v1807_v41  ;;  %v3357_v51 = vpop.f32.mrb[35].mxu1  ;;  %v4336_v31 = vrot.slane %v4332_v20, %v4051_v45 }
0x13bb   :  { %v1859_v52 = vpop.f32.mrb[36].mxu1 }
0x13bc   :  { %v1860_v16 = vadd.f32 %v1859_v52, %v4058_v47  ;;  %v3362_v53 = vpop.f32.mrb[37].mxu1 }
0x13bd   :  { %v1862_v50 = vpop.f32.mrb[38].mxu1 }
0x13be   :  { %v1863_v6 = vadd.f32 %v1862_v50, %v4058_v47  ;;  %v3363_v56 = vpop.f32.mrb[39].mxu1  ;;  %v1866_v59 = vsel %vm525_vm10, %v1860_v16, -inf }
0x13bf   :  { %1867 = vmax.xlane.f32.xlu0 %v1866_v59  ;;  %v2392_v56 = vunpack.c.l.bf16 %v4233_v54 }
0x13c0   :  { %v1869_v49 = vsel %vm529_vm11, %v1863_v6, -inf }
0x13c1   :  { %1870 = vmax.xlane.f32.xlu1 %v1869_v49 }
0x13d2   :  { %2043 = vrot.lane.b32.xlu1 %v4286_v63, %s3821_s6 }
0x13d6   :  { %2167 = vrot.lane.b32.xlu1 %v4286_v63, %s3820_s27 }
0x144c   :  { %v1868_v47 = vpop.xlane.xlu0 %1867 }
0x144d   :  { %v1872_v23 = vsub.f32 %v1860_v16, %v1868_v47 }
0x144e   :  { %v1871_v0 = vpop.xlane.xlu1 %1870 }
0x144f   :  { %v1874_v1 = vmul.f32 1.442695, %v1872_v23  ;;  %v1873_v43 = vsub.f32 %v1863_v6, %v1871_v0 }
0x1451   :  { %3621 = vpow2.f32 %v1874_v1  ;;  %v1876_v2 = vmul.f32 1.442695, %v1873_v43 }
0x1452   :  { %v2044_v24 = vpop.permute.xlu1 %2043 }
0x1453   :  { %3623 = vpow2.f32 %v1876_v2  ;;  %v2049_v30 = vsel %vm477_vm8, %v2044_v24, 0 }
0x1456   :  { %v2168_v36 = vpop.permute.xlu1 %2167 }
0x1457   :  { %v2173_v40 = vsel %vm477_vm8, %v2168_v36, 0 }
0x145b   :  { %v3622_v58 = vpop.eup %3621 }
0x145c   :  { %v1878_v27 = vsel %vm525_vm10, %v3622_v58, 0.0 }
0x145d   :  { %v3624_v7 = vpop.eup %3623  ;;  %1879 = vadd.xlane.f32.xlu0 %v1878_v27 }
0x145e   :  { %v1881_v3 = vsel %vm529_vm11, %v3624_v7, 0.0 }
0x1461   :  { %1882 = vadd.xlane.f32.xlu0 %v1881_v3 }
0x1477   :  { %1889 = vrot.lane.b32.xlu0 %v4246_v62, %s3823_s1 }
0x147b   :  { %2165 = vrot.lane.b32.xlu0 %v4286_v63, %s3822_s29 }
0x14ea   :  { %v1880_v5 = vpop.xlane.xlu0 %1879 }
0x14eb   :  { %3625 = vrcp.f32 %v1880_v5 }
0x14ee   :  { %v1883_v8 = vpop.xlane.xlu0 %1882 }
0x14ef   :  { %3627 = vrcp.f32 %v1883_v8 }
0x14f2   :  { %v1890_v9 = vpop.permute.xlu0 %1889 }
0x14f3   :  { %v1895_v11 = vsel %vm555_vm13, %v1890_v9, 0 }
0x14f4   :  { %3365 = vmatpush3.bf16.msra.mxu0 %v1895_v11 }
0x14f5   :  { %3376 = vmatprep.subr.bf16.mxu0 %v3819_v10  ;;  %v3626_v62 = vpop.eup %3625 }
0x14f6   :  { %v1886_v14 = vmul.f32 %v3626_v62, %v3622_v58  ;;  %v2166_v41 = vpop.permute.xlu0 %2165 }
0x14f9   :  { %v3628_v13 = vpop.eup %3627 }
0x14fa   :  { %v1887_v25 = vmul.f32 %v3628_v13, %v3624_v7 }
0x14fc   :  { %v1888_v18 = vpack.c.bf16 %v1887_v25, %v1886_v14 }
0x14fe   :  { %3367 = vmatmul.mubr.msk.bf16.vlgmr.msra.gmra.mrb[40].mxu0 %vm525_vm10, %v1888_v18 }
0x14ff   :  { %3377 = vmatpush3.bf16.msra.mxu0 %v4307_v17  ;;  %3378 = vmatprep.mubr.msk.bf16.mxu0 %vm3818_vm0, %v3819_v10 }
0x1500   :  { %3388 = vmatprep.subr.bf16.mxu0 %v3819_v10 }
0x1506   :  { %3379 = vmatmul.mubr.msk.bf16.vlgmr.msra.gmra.mrb[44].mxu0 %vm477_vm8, %v1814_v48 }
0x1507   :  { %3390 = vmatprep.mubr.msk.bf16.mxu0 %vm3818_vm0, %v3819_v10 }
0x15d1   :  { %v1931_v21 = vpop.f32.mrb[40].mxu0 }
0x15d2   :  { %v3368_v22 = vpop.f32.mrb[41].mxu0 }
0x15d3   :  { %v1934_v26 = vpop.f32.mrb[42].mxu0 }
0x15d4   :  { %v1938_v28 = vpack.c.bf16 %v1934_v26, %v1931_v21  ;;  %v3369_v29 = vpop.f32.mrb[43].mxu0 }
0x15d6   :  { %3373 = vmatmul.mubr.msk.bf16.vlgmr.msra.gmra.mrb[40].mxu1 %vm477_vm8, %v1938_v28 }
0x15d7   :  { %3383 = vmatpush3.bf16.xpose.msra.mxu1 %v2049_v30  ;;  %3384 = vmatprep.mubr.msk.bf16.mxu1 %vm3818_vm0, %v3819_v10 }
0x15d8   :  { %3394 = vmatprep.subr.bf16.mxu1 %v3819_v10 }
0x15d9   :  { %v2032_v32 = vpop.f32.mrb[44].mxu0 }
0x15da   :  { %v3380_v34 = vpop.f32.mrb[45].mxu0 }
0x15db   :  { %v2035_v37 = vpop.f32.mrb[46].mxu0 }
0x15dc   :  { %v3381_v39 = vpop.f32.mrb[47].mxu0 }
0x15de   :  { %3385 = vmatmul.mubr.msk.bf16.vlgmr.msra.gmra.mrb[44].mxu1 %vm477_vm8, %v4286_v63 }
0x15df   :  { %3395 = vmatpush3.bf16.xpose.msra.mxu1 %v2173_v40  ;;  %3396 = vmatprep.mubr.msk.bf16.mxu1 %vm3818_vm0, %v3819_v10 }
0x15e0   :  { %3406 = vmatprep.subr.bf16.mxu1 %v3819_v10 }
0x15e6   :  { %3397 = vmatmul.mubr.msk.bf16.vlgmr.msra.gmra.mrb[48].mxu1 %vm477_vm8, %v2166_v41 }
0x15e7   :  { %3407 = vmatpush3.bf16.msra.mxu1 %v3540_v4  ;;  %3408 = vmatprep.mubr.msk.bf16.mxu1 %vm3818_vm0, %v3819_v10 }
0x15e8   :  { %3412 = vmatprep.subr.bf16.mxu1 %v3819_v10 }
0x16a9   :  { %v1982_v48 = vpop.f32.mrb[40].mxu1 }
0x16aa   :  { %v2033_v51 = vadd.f32 %v2032_v32, %v1982_v48  ;;  %v3374_v52 = vpop.f32.mrb[41].mxu1 }
0x16ab   :  { %v1985_v16 = vpop.f32.mrb[42].mxu1 }
0x16ac   :  { %v2389_v53 = vadd.f32 %v4336_v31, %v2033_v51  ;;  %v4339_v50 = vadd.f32 %v2035_v37, %v1985_v16  ;;  %v3375_v6 = vpop.f32.mrb[43].mxu1 }
0x16ae   :  { %v4342_v59 = vadd.f32 %v2392_v56, %v2389_v53 }
0x16b1   :  { %v2085_v49 = vpop.f32.mrb[44].mxu1 }
0x16b2   :  { %v2086_v60 = vadd.f32 %v2085_v49, %v4142_v19  ;;  %v3386_v15 = vpop.f32.mrb[45].mxu1 }
0x16b3   :  { %v2088_v61 = vpop.f32.mrb[46].mxu1 }
0x16b4   :  { %v2089_v45 = vadd.f32 %v2088_v61, %v4142_v19  ;;  %v3387_v47 = vpop.f32.mrb[47].mxu1  ;;  %v2092_v23 = vsel %vm525_vm10, %v2086_v60, -inf }
0x16b5   :  { %2093 = vmax.xlane.f32.xlu1 %v2092_v23 }
0x16b6   :  { %v2095_v0 = vsel %vm529_vm11, %v2089_v45, -inf }
0x16b7   :  { %2096 = vmax.xlane.f32.xlu0 %v2095_v0 }
0x16b9   :  { %v2209_v1 = vpop.f32.mrb[48].mxu1 }
0x16ba   :  { %v2210_v43 = vadd.f32 %v2209_v1, %v4142_v19  ;;  %v3398_v2 = vpop.f32.mrb[49].mxu1 }
0x16bb   :  { %v2212_v58 = vpop.f32.mrb[50].mxu1 }
0x16bc   :  { %v2213_v27 = vadd.f32 %v2212_v58, %v4142_v19  ;;  %v3399_v7 = vpop.f32.mrb[51].mxu1  ;;  %v2216_v3 = vsel %vm525_vm10, %v2210_v43, -inf }
0x16bd   :  { %2217 = vmax.xlane.f32.xlu0 %v2216_v3 }
0x16be   :  { %v2219_v4 = vsel %vm529_vm11, %v2213_v27, -inf }
0x16bf   :  { %2220 = vmax.xlane.f32.xlu1 %v2219_v4 }
0x1742   :  { %v2094_v5 = vpop.xlane.xlu1 %2093 }
0x1743   :  { %v2098_v8 = vsub.f32 %v2086_v60, %v2094_v5 }
0x1744   :  { %v2097_v9 = vpop.xlane.xlu0 %2096 }
0x1745   :  { %v2100_v11 = vmul.f32 1.442695, %v2098_v8  ;;  %v2099_v62 = vsub.f32 %v2089_v45, %v2097_v9 }
0x1747   :  { %3629 = vpow2.f32 %v2100_v11  ;;  %v2102_v13 = vmul.f32 1.442695, %v2099_v62 }
0x1749   :  { %3631 = vpow2.f32 %v2102_v13 }
0x174a   :  { %v2218_v14 = vpop.xlane.xlu0 %2217 }
0x174b   :  { %v2222_v25 = vsub.f32 %v2210_v43, %v2218_v14 }
0x174c   :  { %v2221_v18 = vpop.xlane.xlu1 %2220 }
0x174d   :  { %v2224_v21 = vmul.f32 1.442695, %v2222_v25  ;;  %v2223_v19 = vsub.f32 %v2213_v27, %v2221_v18 }
0x174f   :  { %3633 = vpow2.f32 %v2224_v21  ;;  %v2226_v22 = vmul.f32 1.442695, %v2223_v19 }
0x1751   :  { %v3630_v24 = vpop.eup %3629  ;;  %3635 = vpow2.f32 %v2226_v22 }
0x1752   :  { %v2104_v26 = vsel %vm525_vm10, %v3630_v24, 0.0 }
0x1753   :  { %v3632_v28 = vpop.eup %3631  ;;  %2105 = vadd.xlane.f32.xlu0 %v2104_v26 }
0x1754   :  { %v2107_v29 = vsel %vm529_vm11, %v3632_v28, 0.0 }
0x1755   :  { %2108 = vadd.xlane.f32.xlu1 %v2107_v29  ;;  %v2394_v29 = vunpack.c.l.bf16 %v4236_v55 }
0x1759   :  { %v3634_v30 = vpop.eup %3633 }
0x175a   :  { %v2228_v32 = vsel %vm525_vm10, %v3634_v30, 0.0 }
0x175b   :  { %v3636_v34 = vpop.eup %3635  ;;  %2229 = vadd.xlane.f32.xlu0 %v2228_v32 }
0x175c   :  { %v2231_v36 = vsel %vm529_vm11, %v3636_v34, 0.0 }
0x175d   :  { %2232 = vadd.xlane.f32.xlu1 %v2231_v36 }
0x176e   :  { %2239 = vrot.lane.b32.xlu1 %v4286_v63, %s3823_s1 }
0x1771   :  { %2115 = vrot.lane.b32.xlu0 %v4286_v63, %s3808_s13 }
0x1792   :  { %2398 = vadd.xlane.f32.xlu1 %v4342_v59 }
0x17e0   :  { %v2106_v37 = vpop.xlane.xlu0 %2105 }
0x17e1   :  { %3637 = vrcp.f32 %v2106_v37 }
0x17e2   :  { %v2109_v39 = vpop.xlane.xlu1 %2108 }
0x17e3   :  { %3639 = vrcp.f32 %v2109_v39 }
0x17e8   :  { %v2230_v40 = vpop.xlane.xlu0 %2229 }
0x17e9   :  { %3641 = vrcp.f32 %v2230_v40 }
0x17ea   :  { %v2233_v41 = vpop.xlane.xlu1 %2232 }
0x17eb   :  { %v3638_v48 = vpop.eup %3637  ;;  %3643 = vrcp.f32 %v2233_v41 }
0x17ec   :  { %v2116_v51 = vpop.permute.xlu0 %2115  ;;  %v2112_v53 = vmul.f32 %v3638_v48, %v3630_v24  ;;  %v2393_v24 = vunpack.c.h.bf16 %v4233_v54 }
0x17ed   :  { %v3640_v52 = vpop.eup %3639  ;;  %v2121_v16 = vsel %vm555_vm13, %v2116_v51, 0 }
0x17ee   :  { %v2113_v6 = vmul.f32 %v3640_v52, %v3632_v28  ;;  %3389 = vmatpush3.bf16.msra.mxu0 %v2121_v16  ;;  %v2240_v56 = vpop.permute.xlu1 %2239  ;;  %v3542_v52 = vld [vmem:[#allocation7 + $0x48] sm:$0xff]   ;;  %v3543_v16 = vld [vmem:[#allocation7 + $0x50] sm:$0xff]  }
0x17ef   :  { %3400 = vmatprep.subr.bf16.mxu0 %v3819_v10  ;;  %v2245_v49 = vsel %vm555_vm13, %v2240_v56, 0  ;;  %v3546_v56 = vld [vmem:[#allocation7 + $0x68] sm:$0xff]  }
0x17f0   :  { %v2114_v63 = vpack.c.bf16 %v2113_v6, %v2112_v53  ;;  %v3544_v53 = vld [vmem:[#allocation7 + $0x58] sm:$0xff]   ;;  %v3545_v6 = vld [vmem:[#allocation7 + $0x60] sm:$0xff]  }
0x17f2   :  { %3391 = vmatmul.mubr.msk.bf16.vlgmr.msra.gmra.mrb[48].mxu0 %vm525_vm10, %v2114_v63  ;;  %v3547_v63 = vld [vmem:[#allocation7 + $0x70] sm:$0xff]  }
0x17f3   :  { %v3642_v60 = vpop.eup %3641  ;;  %3401 = vmatpush3.bf16.msra.mxu0 %v2245_v49  ;;  %3402 = vmatprep.mubr.msk.bf16.mxu0 %vm3818_vm0, %v3819_v10  ;;  %v3548_v49 = vld [vmem:[#allocation7 + $0x78] sm:$0xff]  }
0x17f4   :  { %v2236_v61 = vmul.f32 %v3642_v60, %v3634_v30 }
0x17f5   :  { %v3644_v15 = vpop.eup %3643 }
0x17f6   :  { %v2237_v45 = vmul.f32 %v3644_v15, %v3636_v34  ;;  %v3541_v34 = vld [vmem:[#allocation7 + $0x40] sm:$0xff]  }
0x17f7   :  { %3418 = vmatprep.subr.bf16.mxu0 %v3541_v34 }
0x17f8   :  { %v2238_v47 = vpack.c.bf16 %v2237_v45, %v2236_v61 }
0x17fa   :  { %3403 = vmatmul.mubr.msk.bf16.vlgmr.msra.gmra.mrb[52].mxu0 %vm525_vm10, %v2238_v47 }
0x17fb   :  { %3419 = vmatpush3.bf16.msra.mxu0 %v3541_v34 }
0x17fc   :  { %3420 = vmatprep.subr.bf16.mxu0 %v3542_v52 }
0x17ff   :  { %3421 = vmatpush3.bf16.msra.mxu0 %v3542_v52 }
0x1800   :  { %3422 = vmatprep.subr.bf16.mxu0 %v3543_v16 }
0x1803   :  { %3423 = vmatpush3.bf16.msra.mxu0 %v3543_v16 }
0x1804   :  { %3424 = vmatprep.subr.bf16.mxu0 %v3544_v53 }
0x1807   :  { %3425 = vmatpush3.bf16.msra.mxu0 %v3544_v53 }
0x1808   :  { %3426 = vmatprep.subr.bf16.mxu0 %v3545_v6 }
0x180b   :  { %3427 = vmatpush3.bf16.msra.mxu0 %v3545_v6 }
0x180c   :  { %3428 = vmatprep.subr.bf16.mxu0 %v3546_v56 }
0x180f   :  { %3429 = vmatpush3.bf16.msra.mxu0 %v3546_v56 }
0x1810   :  { %3430 = vmatprep.subr.bf16.mxu0 %v3547_v63 }
0x1813   :  { %3431 = vmatpush3.bf16.msra.mxu0 %v3547_v63 }
0x1814   :  { %3432 = vmatprep.subr.bf16.mxu0 %v3548_v49 }
0x1817   :  { %3433 = vmatpush3.bf16.msra.mxu0 %v3548_v49 }
0x1818   :  { %3458 = vmatprep.subr.mxu0 %v3819_v10 }
0x181f   :  { %v2399_v23 = vpop.xlane.xlu1 %2398 }
0x1820   :  { %v2405_v0 = vmul.f32 0.03125, %v2399_v23 }
0x1822   :  { %v2408_v1 = vsub.f32 %v4342_v59, %v2405_v0 }
0x1824   :  { %v4370_v43 = vmul.f32 %v3999_v42, %v2408_v1 }
0x1826   :  { %v2414_v2 = vmul.f32 %v4370_v43, %v4370_v43 }
0x1828   :  { %2417 = vadd.xlane.f32.xlu1 %v2414_v2 }
0x18b5   :  { %v2418_v60 = vpop.xlane.xlu1 %2417 }
0x18b6   :  { %v2424_v15 = vmul.f32 0.03125, %v2418_v60 }
0x18b8   :  { %v2427_v61 = vadd.f32 1e-12, %v2424_v15 }
0x18ba   :  { %3645 = vrsqrt.f32 %v2427_v61 }
0x18c5   :  { %v2157_v58 = vpop.f32.mrb[48].mxu0 }
0x18c6   :  { %v3392_v27 = vpop.f32.mrb[49].mxu0 }
0x18c7   :  { %v2160_v7 = vpop.f32.mrb[50].mxu0 }
0x18c8   :  { %v2164_v3 = vpack.c.bf16 %v2160_v7, %v2157_v58  ;;  %v3393_v4 = vpop.f32.mrb[51].mxu0  ;;  %v3646_v58 = vpop.eup %3645  ;;  %v2439_v7 = vrot.slane %v4332_v20, %v4134_v12  ;;  %v3549_v12 = vld [vmem:[#allocation8 + $0x40] sm:$0xff]  }
0x18c9   :  { %v2433_v27 = vmul.f32 %v3646_v58, %v4370_v43 }
0x18cd   :  { %v2281_v5 = vpop.f32.mrb[52].mxu0 }
0x18ce   :  { %v3404_v8 = vpop.f32.mrb[53].mxu0 }
0x18cf   :  { %v2284_v9 = vpop.f32.mrb[54].mxu0  ;;  %v2446_v8 = vrot.slane %v4332_v20, %v1232_v33  ;;  %v3550_v33 = vld [vmem:[#allocation8 + $0x48] sm:$0xff]  }
0x18d0   :  { %v2288_v11 = vpack.c.bf16 %v2284_v9, %v2281_v5  ;;  %v3405_v62 = vpop.f32.mrb[55].mxu0  ;;  %v2440_v5 = vmul.f32 %v2439_v7, %v2433_v27 }
0x18d2   :  { %3409 = vmatmul.mubr.msk.bf16.vlgmr.msra.gmra.mrb[52].mxu1 %vm477_vm8, %v2288_v11  ;;  %v2447_v62 = vadd.f32 %v2446_v8, %v2440_v5 }
0x18d3   :  { %3413 = vmatpush3.bf16.msra.mxu1 %v4307_v17  ;;  %3414 = vmatprep.mubr.msk.bf16.mxu1 %vm3818_vm0, %v3819_v10 }
0x18d4   :  { %3438 = vmatprep.subr.bf16.mxu1 %v3549_v12 }
0x18de   :  { %3415 = vmatmul.mubr.msk.bf16.vlgmr.msra.gmra.mrb[52].mxu1 %vm477_vm8, %v2164_v3 }
0x18df   :  { %3439 = vmatpush3.bf16.msra.mxu1 %v3549_v12 }
0x18e0   :  { %3440 = vmatprep.subr.bf16.mxu1 %v3550_v33 }
0x18e3   :  { %3441 = vmatpush3.bf16.msra.mxu1 %v3550_v33 }
0x19b1   :  { %v2370_v59 = vpop.f32.mrb[52].mxu1 }
0x19b2   :  { %v2379_v13 = vrot.slane %v2370_v59, 6  ;;  %v3416_v14 = vpop.f32.mrb[53].mxu1 }
0x19b3   :  { %v2373_v25 = vpop.f32.mrb[54].mxu1 }
0x19b4   :  { %v2380_v18 = vrot.slane %v2373_v25, 6  ;;  %v3417_v21 = vpop.f32.mrb[55].mxu1  ;;  %v2384_v19 = vsel %vm148_vm1, %v4339_v50, %v2379_v13 }
0x19b5   :  { %v2390_v22 = vadd.f32 %v4336_v31, %v2384_v19  ;;  %v3551_v21 = vld [vmem:[#allocation8 + $0x50] sm:$0xff]   ;;  %v3552_v19 = vld [vmem:[#allocation8 + $0x58] sm:$0xff]  }
0x19b6   :  { %v2381_v17 = vsel %vm148_vm1, %v2379_v13, %v2380_v18  ;;  %3442 = vmatprep.subr.bf16.mxu1 %v3551_v21 }
0x19b7   :  { %v2396_v26 = vadd.f32 %v2393_v24, %v2390_v22  ;;  %v2391_v28 = vadd.f32 %v4336_v31, %v2381_v17  ;;  %3443 = vmatpush3.bf16.msra.mxu1 %v3551_v21  ;;  %v3553_v22 = vld [vmem:[#allocation8 + $0x60] sm:$0xff]   ;;  %v3554_v24 = vld [vmem:[#allocation8 + $0x68] sm:$0xff]   ;;  %v3555_v17 = vld [vmem:[#allocation8 + $0x70] sm:$0xff]  }
0x19b8   :  { %3444 = vmatprep.subr.bf16.mxu1 %v3552_v19 }
0x19b9   :  { %2400 = vadd.xlane.f32.xlu0 %v2396_v26  ;;  %v2397_v30 = vadd.f32 %v2394_v29, %v2391_v28  ;;  %v2455_v28 = vrot.slane %v4332_v20, %v1241_v57 }
0x19bb   :  { %v2402_v32 = vsel %vm254_vm6, %v2397_v30, 0.0  ;;  %3445 = vmatpush3.bf16.msra.mxu1 %v3552_v19 }
0x19bc   :  { %3446 = vmatprep.subr.bf16.mxu1 %v3553_v22 }
0x19bd   :  { %2403 = vadd.xlane.f32.xlu0 %v2402_v32 }
0x19bf   :  { %3447 = vmatpush3.bf16.msra.mxu1 %v3553_v22 }
0x19c0   :  { %3448 = vmatprep.subr.bf16.mxu1 %v3554_v24 }
0x19c3   :  { %3449 = vmatpush3.bf16.msra.mxu1 %v3554_v24 }
0x19c4   :  { %3450 = vmatprep.subr.bf16.mxu1 %v3555_v17 }
0x19c7   :  { %3451 = vmatpush3.bf16.msra.mxu1 %v3555_v17 }
0x1a46   :  { %v2401_v50 = vpop.xlane.xlu0 %2400 }
0x1a47   :  { %v2406_v36 = vmul.f32 0.03125, %v2401_v50 }
0x1a49   :  { %v2409_v37 = vsub.f32 %v2396_v26, %v2406_v36  ;;  %v3556_v26 = vld [vmem:[#allocation8 + $0x78] sm:$0xff]  }
0x1a4a   :  { %v2404_v39 = vpop.xlane.xlu0 %2403  ;;  %3452 = vmatprep.subr.bf16.mxu1 %v3556_v26 }
0x1a4b   :  { %v2407_v54 = vmul.f32 0.03125, %v2404_v39  ;;  %v2412_v40 = vmul.f32 %v3999_v42, %v2409_v37  ;;  %3453 = vmatpush3.bf16.msra.mxu1 %v3556_v26 }
0x1a4d   :  { %v2410_v41 = vsub.f32 %v2397_v30, %v2407_v54  ;;  %v2415_v48 = vmul.f32 %v2412_v40, %v2412_v40 }
0x1a4f   :  { %2419 = vadd.xlane.f32.xlu0 %v2415_v48  ;;  %v2413_v55 = vmul.f32 %v3999_v42, %v2410_v41 }
0x1a51   :  { %v2416_v31 = vmul.f32 %v2413_v55, %v2413_v55 }
0x1a53   :  { %v2421_v51 = vsel %vm254_vm6, %v2416_v31, 0.0 }
0x1a54   :  { %2422 = vadd.xlane.f32.xlu1 %v2421_v51 }
0x1adc   :  { %v2420_v45 = vpop.xlane.xlu0 %2419 }
0x1add   :  { %v2425_v47 = vmul.f32 0.03125, %v2420_v45 }
0x1adf   :  { %v2428_v23 = vadd.f32 1e-12, %v2425_v47 }
0x1ae1   :  { %3647 = vrsqrt.f32 %v2428_v23  ;;  %v2423_v0 = vpop.xlane.xlu1 %2422 }
0x1ae2   :  { %v2426_v1 = vmul.f32 0.03125, %v2423_v0 }
0x1ae4   :  { %v2429_v2 = vadd.f32 1e-12, %v2426_v1 }
0x1ae6   :  { %3649 = vrsqrt.f32 %v2429_v2 }
0x1aeb   :  { %v3648_v3 = vpop.eup %3647 }
0x1aec   :  { %v2434_v4 = vmul.f32 %v3648_v3, %v2412_v40 }
0x1aee   :  { %v2441_v9 = vmul.f32 %v2439_v7, %v2434_v4  ;;  %v2584_v4 = vrot.slane %v4332_v20, %v1370_v38 }
0x1af0   :  { %v3650_v11 = vpop.eup %3649  ;;  %v2448_v59 = vadd.f32 %v2446_v8, %v2441_v9 }
0x1af1   :  { %v2435_v13 = vmul.f32 %v3650_v11, %v2413_v55 }
0x1af2   :  { %v4397_v14 = vpack.c.bf16 %v2448_v59, %v2447_v62 }
0x1af3   :  { %v2442_v25 = vmul.f32 %v2439_v7, %v2435_v13 }
0x1af4   :  { %3434 = vmatprep.mubr.bf16.mxu0 %v4397_v14  ;;  %v2681_v13 = vunpack.c.l.bf16 %v4397_v14  ;;  %v2682_v21 = vunpack.c.h.bf16 %v4397_v14 }
0x1af5   :  { %v2449_v43 = vadd.f32 %v2446_v8, %v2442_v25 }
0x1af7   :  { %v4400_v18 = vpack.c.bf16 %v2449_v43, %v2449_v43 }
0x1af9   :  { %3435 = vmatmul.mubr.bf16.vlgmr.msra.gmra.mrb[56].mxu0 %v4400_v18  ;;  %v2683_v11 = vunpack.c.l.bf16 %v4400_v18 }
0x1afa   :  { %3460 = vmatprep.mubr.msk.f32.mxu0 %vm3818_vm0, %v3819_v10 }
0x1bcc   :  { %v3436_v29 = vpop.f32.mrb[56].mxu0 }
0x1bcd   :  { %v2547_v30 = vadd.f32 %v3436_v29, %v2455_v28  ;;  %v2538_v32 = vpop.f32.mrb[57].mxu0 }
0x1bce   :  { %v2539_v34 = vadd.f32 %v2538_v32, %v2455_v28  ;;  %v3437_v50 = vpop.f32.mrb[58].mxu0 }
0x1bcf   :  { %v2557_v36 = vmul.f32 0.044715, %v2547_v30  ;;  %v2541_v37 = vpop.f32.mrb[59].mxu0  ;;  %v2554_v47 = vmul.f32 0.5, %v2547_v30 }
0x1bd0   :  { %v2555_v39 = vmul.f32 0.044715, %v2539_v34  ;;  %v2542_v54 = vadd.f32 %v2541_v37, %v2455_v28  ;;  %v2552_v23 = vmul.f32 0.5, %v2539_v34 }
0x1bd1   :  { %v2560_v40 = vmul.f32 %v2557_v36, %v2547_v30 }
0x1bd2   :  { %v2558_v41 = vmul.f32 %v2555_v39, %v2539_v34  ;;  %v2556_v48 = vmul.f32 0.044715, %v2542_v54  ;;  %v2553_v0 = vmul.f32 0.5, %v2542_v54 }
0x1bd3   :  { %v2563_v55 = vmul.f32 %v2560_v40, %v2547_v30  ;;  %v3043_v40 = vld [vmem:[%s4460_s2] ss:$0 sm:$0xff] }
0x1bd4   :  { %v2561_v31 = vmul.f32 %v2558_v41, %v2539_v34  ;;  %v2559_v51 = vmul.f32 %v2556_v48, %v2542_v54  ;;  %vm2746_vm14 = vcmp.eq.s32.totalorder %v4048_v44, %v3043_v40  ;;  %v3046_v41 = vld [vmem:[%s4460_s2 + $0x1] ss:$0 sm:$0xff]  ;;  %s3824_s2 = smov [#allocation11]  }
0x1bd5   :  { %v2566_v52 = vadd.f32 %v2563_v55, %v2547_v30  ;;  %v3044_v48 = vsel %vm2746_vm14, 1.0, %v3819_v10  ;;  %vm2842_vm1 = vcmp.eq.s32.totalorder %v4048_v44, %v3046_v41  ;;  %s2936_s20 = sshll.u32 %s3824_s2, 4  ;;  %s2937_s20 = int_to_ptr.vmem [resolvable:$true] %s2936_s20 }
0x1bd6   :  { %v2562_v16 = vmul.f32 %v2559_v51, %v2542_v54  ;;  %v2564_v53 = vadd.f32 %v2561_v31, %v2539_v34  ;;  %v2750_v55 = vsel %vm2749_vm15, %v3044_v48, 0.0  ;;  %s3777_s4 = scalar_lea.vmem %s2937_s20, 256  ;;  %p3782_p13 = scmp.lt.s32.totalorder %s2937_s20, %s2937_s20 }
0x1bd7   :  { %v2569_v6 = vmul.f32 0.7978846, %v2566_v52  ;;  %p3778_p12 = scmp.ne.s32.totalorder %s2937_s20, %s3777_s4  ;;  %p3783_p0 = scmp.lt.s32.totalorder %s3777_s4, %s3777_s4 }
0x1bd8   :  { %v2565_v57 = vadd.f32 %v2562_v16, %v2542_v54  ;;  %v2567_v56 = vmul.f32 0.7978846, %v2564_v53 }
0x1bd9   :  { %3651 = vtanh.f32 %v2569_v6  ;;  %p3784_p1 = por %p3783_p0, %p3782_p13 }
0x1bda   :  { %v2568_v63 = vmul.f32 0.7978846, %v2565_v57  ;;  %3653 = vtanh.f32 %v2567_v56 }
0x1bdb   :  { %p3785_p2 = pnand %p3784_p1, %p3778_p12 }
0x1bdc   :  { %3655 = vtanh.f32 %v2568_v63 }
0x1be3   :  { %v3652_v49 = vpop.eup %3651 }
0x1be4   :  { %v3654_v60 = vpop.eup %3653  ;;  %v2575_v15 = vadd.f32 1.0, %v3652_v49 }
0x1be5   :  { %v2573_v61 = vadd.f32 1.0, %v3654_v60  ;;  %v2728_v60 = vrot.slane %v4332_v20, %v1514_v46 }
0x1be6   :  { %v3656_v45 = vpop.eup %3655  ;;  %v2578_v2 = vmul.f32 %v2575_v15, %v2554_v47 }
0x1be7   :  { %v2574_v1 = vadd.f32 1.0, %v3656_v45  ;;  %v2576_v58 = vmul.f32 %v2573_v61, %v2552_v23  ;;  %v2735_v45 = vrot.slane %v4332_v20, %v1521_v35 }
0x1be8   :  { %v2580_v3 = vpack.c.bf16 %v2578_v2, %v2578_v2 }
0x1be9   :  { %v2577_v27 = vmul.f32 %v2574_v1, %v2553_v0 }
0x1beb   :  { %v2579_v7 = vpack.c.bf16 %v2577_v27, %v2576_v58 }
0x1bed   :  { %3454 = vmatprep.mubr.bf16.mxu1 %v2579_v7 }
0x1bee   :  { %3455 = vmatmul.mubr.bf16.vlgmr.msra.gmra.mrb[56].mxu1 %v2580_v3 }
0x1cc1   :  { %v3456_v5 = vpop.f32.mrb[56].mxu1 }
0x1cc2   :  { %v2676_v8 = vadd.f32 %v3456_v5, %v2584_v4  ;;  %v2667_v9 = vpop.f32.mrb[57].mxu1 }
0x1cc3   :  { %v2668_v62 = vadd.f32 %v2667_v9, %v2584_v4  ;;  %v3457_v59 = vpop.f32.mrb[58].mxu1 }
0x1cc4   :  { %v2670_v25 = vpop.f32.mrb[59].mxu1  ;;  %v2686_v43 = vadd.f32 %v2683_v11, %v2676_v8 }
0x1cc5   :  { %v2671_v12 = vadd.f32 %v2670_v25, %v2584_v4  ;;  %v2684_v33 = vadd.f32 %v2681_v13, %v2668_v62 }
0x1cc6   :  { %v2691_v38 = vsel %vm254_vm6, %v2686_v43, 0.0 }
0x1cc7   :  { %2687 = vadd.xlane.f32.xlu0 %v2684_v33  ;;  %v2685_v19 = vadd.f32 %v2682_v21, %v2671_v12 }
0x1cc9   :  { %2689 = vadd.xlane.f32.xlu1 %v2685_v19 }
0x1ccb   :  { %2692 = vadd.xlane.f32.xlu0 %v2691_v38 }
0x1d54   :  { %v2688_v22 = vpop.xlane.xlu0 %2687 }
0x1d55   :  { %v2694_v24 = vmul.f32 0.03125, %v2688_v22 }
0x1d56   :  { %v2690_v17 = vpop.xlane.xlu1 %2689 }
0x1d57   :  { %v2697_v18 = vsub.f32 %v2684_v33, %v2694_v24  ;;  %v2695_v26 = vmul.f32 0.03125, %v2690_v17 }
0x1d58   :  { %v2693_v28 = vpop.xlane.xlu0 %2692 }
0x1d59   :  { %v2698_v29 = vsub.f32 %v2685_v19, %v2695_v26  ;;  %v2696_v30 = vmul.f32 0.03125, %v2693_v28  ;;  %v2700_v32 = vmul.f32 %v3999_v42, %v2697_v18 }
0x1d5b   :  { %v2699_v34 = vsub.f32 %v2686_v43, %v2696_v30  ;;  %v2703_v50 = vmul.f32 %v2700_v32, %v2700_v32  ;;  %v2701_v14 = vmul.f32 %v3999_v42, %v2698_v29 }
0x1d5d   :  { %2706 = vadd.xlane.f32.xlu1 %v2703_v50  ;;  %v2704_v36 = vmul.f32 %v2701_v14, %v2701_v14  ;;  %v2702_v37 = vmul.f32 %v3999_v42, %v2699_v34  ;;  %v3047_v42 = vsel %vm2842_vm1, 1.0, %v3819_v10 }
0x1d5e   :  { %v2845_v31 = vsel %vm2749_vm15, %v3047_v42, 0.0 }
0x1d5f   :  { %2708 = vadd.xlane.f32.xlu0 %v2704_v36  ;;  %v2705_v39 = vmul.f32 %v2702_v37, %v2702_v37 }
0x1d61   :  { %v2710_v54 = vsel %vm254_vm6, %v2705_v39, 0.0 }
0x1d62   :  { %2711 = vadd.xlane.f32.xlu1 %v2710_v54 }
0x1d63   :  { %2751 = vadd.xlane.f32.xlu0 %v2750_v55 }
0x1d66   :  { %2846 = vadd.xlane.f32.xlu1 %v2845_v31 }
0x1dea   :  { %v2707_v51 = vpop.xlane.xlu1 %2706 }
0x1deb   :  { %v2713_v52 = vmul.f32 0.03125, %v2707_v51 }
0x1dec   :  { %v2709_v16 = vpop.xlane.xlu0 %2708 }
0x1ded   :  { %v2716_v53 = vadd.f32 1e-12, %v2713_v52  ;;  %v2714_v6 = vmul.f32 0.03125, %v2709_v16 }
0x1def   :  { %3657 = vrsqrt.f32 %v2716_v53  ;;  %v2717_v57 = vadd.f32 1e-12, %v2714_v6  ;;  %v2712_v56 = vpop.xlane.xlu1 %2711 }
0x1df0   :  { %v2715_v63 = vmul.f32 0.03125, %v2712_v56  ;;  %v2752_v35 = vpop.xlane.xlu0 %2751 }
0x1df1   :  { %3659 = vrsqrt.f32 %v2717_v57  ;;  %v2833_v20 = vmax.f32 %v2752_v35, 1.0 }
0x1df2   :  { %v2718_v49 = vadd.f32 1e-12, %v2715_v63 }
0x1df3   :  { %v2847_v62 = vpop.xlane.xlu1 %2846 }
0x1df4   :  { %3661 = vrsqrt.f32 %v2718_v49  ;;  %v2926_v59 = vmax.f32 %v2847_v62, 1.0 }
0x1df5   :  { %3663 = vrcp.f32 %v2833_v20 }
0x1df6   :  { %3665 = vrcp.f32 %v2926_v59 }
0x1df9   :  { %v3658_v15 = vpop.eup %3657 }
0x1dfa   :  { %v2722_v61 = vmul.f32 %v3658_v15, %v2700_v32 }
0x1dfb   :  { %v3660_v47 = vpop.eup %3659 }
0x1dfc   :  { %v2723_v23 = vmul.f32 %v3660_v47, %v2701_v14  ;;  %v2729_v0 = vmul.f32 %v2728_v60, %v2722_v61 }
0x1dfe   :  { %v3662_v1 = vpop.eup %3661  ;;  %v2730_v2 = vmul.f32 %v2728_v60, %v2723_v23  ;;  %v2736_v58 = vadd.f32 %v2735_v45, %v2729_v0 }
0x1dff   :  { %v2724_v27 = vmul.f32 %v3662_v1, %v2702_v37  ;;  %v3664_v13 = vpop.eup %3663 }
0x1e00   :  { %v2737_v7 = vadd.f32 %v2735_v45, %v2730_v2  ;;  %v2756_v4 = vrot.slane %v2736_v58, 1  ;;  %v3666_v33 = vpop.eup %3665 }
0x1e01   :  { %v2731_v3 = vmul.f32 %v2728_v60, %v2724_v27 }
0x1e02   :  { %v2757_v5 = vrot.slane %v2737_v7, 1  ;;  %v2849_v9 = vrot.slane %v2737_v7, 3 }
0x1e03   :  { %v2738_v8 = vadd.f32 %v2735_v45, %v2731_v3 }
0x1e04   :  { %v2758_v46 = vsel %vm2755_vm2, %v2756_v4, %v2757_v5 }
0x1e05   :  { %3459 = vmatpush3.msra.mxu0 %v2758_v46  ;;  %v2850_v11 = vrot.slane %v2738_v8, 3 }
0x1e06   :  { %3463 = vmatprep.subr.mxu0 %v3819_v10  ;;  %3461 = vmatmul.mubr.msk.f32.vlgmr.msra.gmra.mrb[6].mxu0 %vm2749_vm15, %v3044_v48 }
0x1e07   :  { %v2851_v44 = vsel %vm555_vm13, %v2849_v9, %v2850_v11  ;;  %3465 = vmatprep.mubr.msk.f32.mxu0 %vm3818_vm0, %v3819_v10 }
0x1e08   :  { %3464 = vmatpush3.msra.mxu0 %v2851_v44 }
0x1e0a   :  { %3466 = vmatmul.mubr.msk.f32.vlgmr.msra.gmra.mrb[60].mxu0 %vm2749_vm15, %v3047_v42 }
0x1ed9   :  { %v2829_v25 = vpop.f32.mrb[6].mxu0 }
0x1eda   :  { %v2835_v43 = vmul.f32 %v3664_v13, %v2829_v25  ;;  %v3462_v12 = vpop.f32.mrb[7].mxu0 }
0x1edc   :  { %2836 = vst [vmem:[#allocation11] sm:$0xff] %v2835_v43 }
0x1edd   :  { %v2922_v21 = vpop.f32.mrb[60].mxu0 }
0x1ede   :  { %v2928_v19 = vmul.f32 %v3666_v33, %v2922_v21  ;;  %v3467_v10 = vpop.f32.mrb[61].mxu0 }
0x1ee0   :  { %2930 = vst [vmem:[#allocation11 + $0x8] sm:$0xff] %v2928_v19 }
0x1ee1   :  { %3788 = shalt.err (!%p3785_p2)
}
0x1ee2   :  { %s3789_s25 = scalar_lea.hbm %s4470_s12, 256 }
0x1ee3   :  { %p3790_p3 = scmp.ne.s32.totalorder %s4470_s12, %s3789_s25  ;;  %p3793_p4 = scmp.lt.u32.totalorder %s3789_s25, %s4470_s12 }
0x1ee5   :  { %p3795_p5 = pnand %p3793_p4, %p3790_p3 }
0x1ee7   :  { %3798 = shalt.err (!%p3795_p5)
}
0x1ee8   :  { %2942 = dma.vmem_to_hbm [thread:$0]  %s2937_s20, 256, %s4470_s12, [#allocation4], %s3812_s10, %s3812_s10, %s3813_s18  }
0x1ee9   :  { %3805 = dma.done.wait [#allocation4], 256  }
0x1eea   :  { %3806 = vsyncadd [#allocation4], 4294967040 }
0x1eeb   :  { %2946 = vsyncpa [#allocation3], 1 }
0x1eec   :  { %2947 = vsyncpa [#allocation6], 1 }
0x1eed   :  { %2948 = vsyncpa [#allocation9], 1 }
0x1eee   :  { %2949 = vsyncpa [#allocation4], 1 }

</bundles_post_ra>
